<compile_context>
chip_gen: v7x
topology: tpu7x:2x2x1
jax: 0.10.0
libtpu: 0.0.40
codegen_flags: <defaults>
</compile_context>

<pallas_src>
import functools

import jax
import jax.numpy as jnp
from jax import lax
from jax.experimental import pallas as pl
from jax.experimental.pallas import tpu as pltpu


def _conv1x1_kernel(w_ref, x_ref, o_ref):
    # w_ref: (tn, Cin) weight tile (bf16 by default); x_ref: (Cin, M) same dtype.
    # Single MXU matmul, f32 accumulation, no materialized casts.
    o_ref[...] = jnp.dot(
        w_ref[...], x_ref[...], preferred_element_type=jnp.float32
    ).astype(o_ref.dtype)


def prepare_weight(w, weight_dtype=jnp.bfloat16):
    """One-time weight prep: [Cout, Cin, 1, 1] -> [Cout, Cin] in stream dtype."""
    Cout, Cin, kh, kw = w.shape
    assert (kh, kw) == (1, 1)
    return w.reshape(Cout, Cin).astype(weight_dtype)


def pick_weight_tile(Cout):
    """tn = Cout (single grid step) on single-TC chips; Cout/2 on 2-TC v7x."""
    kind = ""
    try:
        kind = jax.devices()[0].device_kind.lower()
    except Exception:
        pass
    if ("v7" in kind or "7x" in kind) and Cout % 2 == 0 and (Cout // 2) % 8 == 0:
        return Cout // 2  # split weight stream across the two TensorCores
    return Cout  # v5e / v6e: one grid step, no per-step overhead


@functools.partial(jax.jit, static_argnames=("tn",))
def conv1x1(x, w_mat, *, tn):
    """1x1 conv. x: [N, Cin, H, W] f32; w_mat: [Cout, Cin] (from prepare_weight)."""
    N, Cin, H, W = x.shape
    Cout, Cin_w = w_mat.shape
    assert Cin_w == Cin
    assert Cout % tn == 0, "Cout must be divisible by the weight tile"
    assert tn % 8 == 0

    M = N * H * W
    if N == 1:
        x_mat = x.reshape(Cin, M)  # pure reshape, no data movement
    else:
        # TODO(synk): for N > 1 this transpose materializes; the target module has N == 1.
        x_mat = jnp.transpose(x, (1, 0, 2, 3)).reshape(Cin, M)

    # Cast activations to the weight streaming dtype (bf16 by default) in the
    # wrapper: halves the resident-activation DMA and enables the native
    # bf16xbf16 MXU path with no in-kernel casts.
    x_mat = x_mat.astype(w_mat.dtype)

    out_dtype = jnp.float32
    bytes_accessed = (
        Cout * Cin * jnp.dtype(w_mat.dtype).itemsize  # weight stream (dominant)
        + Cin * M * jnp.dtype(x_mat.dtype).itemsize   # resident activations
        + Cout * M * jnp.dtype(out_dtype).itemsize    # output writeback
    )

    out = pl.pallas_call(
        _conv1x1_kernel,
        out_shape=jax.ShapeDtypeStruct((Cout, M), out_dtype),
        grid_spec=pl.GridSpec(
            grid=(Cout // tn,),
            in_specs=[
                pl.BlockSpec((tn, Cin), lambda j: (j, 0)),  # stream weight tiles
                pl.BlockSpec((Cin, M), lambda j: (0, 0)),   # activations stay resident
            ],
            out_specs=pl.BlockSpec((tn, M), lambda j: (j, 0)),
        ),
        compiler_params=pltpu.CompilerParams(
            dimension_semantics=("parallel",),
        ),
        cost_estimate=pl.CostEstimate(
            flops=2 * Cout * Cin * M,
            transcendentals=0,
            bytes_accessed=int(bytes_accessed),
        ),
    )(w_mat, x_mat)

    if N == 1:
        return out.reshape(1, Cout, H, W)  # pure reshape, no data movement
    return jnp.transpose(out.reshape(Cout, N, H, W), (1, 0, 2, 3))


if __name__ == "__main__":
    key = jax.random.PRNGKey(0)
    kx, kw = jax.random.split(key)

    # Shapes implied by the module's forward: x671 = [1, 384, 7, 7]
    N, Cin, H, W = 1, 384, 7, 7
    Cout = 2304

    x = jax.random.normal(kx, (N, Cin, H, W), dtype=jnp.float32)
    # Deterministic synthetic weights (Kaiming-ish scale).
    w = jax.random.normal(kw, (Cout, Cin, 1, 1), dtype=jnp.float32) * (1.0 / Cin) ** 0.5

    # One-time weight prep (bf16 streaming; use weight_dtype=jnp.float32 for exact f32).
    w_mat = prepare_weight(w, weight_dtype=jnp.bfloat16)
    tn = pick_weight_tile(Cout)

    y = conv1x1(x, w_mat, tn=tn)
    jax.block_until_ready(y)
    assert y.shape == (N, Cout, H, W), y.shape

    # Cross-check against lax conv with IDENTICALLY quantized weights and
    # activations (bf16->f32), so the check verifies the kernel math exactly;
    # the bf16 streaming is a deliberate, flagged perf choice.
    w_ref = w_mat.astype(jnp.float32).reshape(Cout, Cin, 1, 1)
    x_ref = x.astype(jnp.bfloat16).astype(jnp.float32)
    y_ref = lax.conv_general_dilated(
        x_ref, w_ref, window_strides=(1, 1), padding="VALID",
        dimension_numbers=("NCHW", "OIHW", "NCHW"),
        precision=lax.Precision.HIGHEST,
    )
    assert jnp.allclose(y, y_ref, atol=1e-3, rtol=1e-3), float(
        jnp.max(jnp.abs(y - y_ref))
    )

    print("KERNEL_OK")
</pallas_src>

<mosaic_0001>
module attributes {stable_mosaic.version = 11 : i64} {
  func.func @_conv1x1_kernel(%arg0: i32, %arg1: memref<2304x384xbf16, #tpu.memory_space<vmem>>, %arg2: memref<384x49xbf16, #tpu.memory_space<vmem>>, %arg3: memref<2304x49xf32, #tpu.memory_space<vmem>>) attributes {dimension_semantics = [#tpu.dimension_semantics<parallel>], iteration_bounds = array<i64: 1>, scalar_prefetch = 0 : i64, scratch_operands = 0 : i64, tpu.core_type = #tpu.core_type<tc>, window_params = [{transform_indices = @transform_0, window_bounds = array<i64: 2304, 384>}, {pipeline_mode = #tpu.pipeline_mode<synchronous>, transform_indices = @transform_1, window_bounds = array<i64: 384, 49>}, {transform_indices = @transform_2, window_bounds = array<i64: 2304, 49>}]} {
    %c0 = arith.constant 0 : index
    %c0_0 = arith.constant 0 : index
    %0 = vector.load %arg1[%c0, %c0_0] : memref<2304x384xbf16, #tpu.memory_space<vmem>>, vector<2304x384xbf16>
    %c0_1 = arith.constant 0 : index
    %c0_2 = arith.constant 0 : index
    %1 = vector.load %arg2[%c0_1, %c0_2] : memref<384x49xbf16, #tpu.memory_space<vmem>>, vector<384x49xbf16>
    %cst = arith.constant dense<0.000000e+00> : vector<2304x49xf32>
    %2 = tpu.matmul %0, %1, %cst {dimension_numbers = #tpu.dot_dimension_numbers<[1], [0], [0], [1], [0, 0, 1, 1], [], []>} : vector<2304x384xbf16>, vector<384x49xbf16>, vector<2304x49xf32> -> vector<2304x49xf32>
    %c0_3 = arith.constant 0 : index
    %c0_4 = arith.constant 0 : index
    %3 = vector.load %arg3[%c0_3, %c0_4] : memref<2304x49xf32, #tpu.memory_space<vmem>>, vector<2304x49xf32>
    tpu.vector_store %arg3[%c0_3, %c0_4], %2 {strides = array<i32>} : memref<2304x49xf32, #tpu.memory_space<vmem>>, vector<2304x49xf32>,
    return
  }
  func.func @transform_0(%arg0: i32) -> (i32, i32) {
    %c0_i32 = arith.constant 0 : i32
    %c0_i32_0 = arith.constant 0 : i32
    return %arg0, %c0_i32 : i32, i32
  }
  func.func @transform_1(%arg0: i32) -> (i32, i32) {
    %c0_i32 = arith.constant 0 : i32
    %c0_i32_0 = arith.constant 0 : i32
    %c0_i32_1 = arith.constant 0 : i32
    return %c0_i32, %c0_i32_0 : i32, i32
  }
  func.func @transform_2(%arg0: i32) -> (i32, i32) {
    %c0_i32 = arith.constant 0 : i32
    %c0_i32_0 = arith.constant 0 : i32
    return %arg0, %c0_i32 : i32, i32
  }
}

</mosaic_0001>

<bundles_post_ra>
// kernel: conv1x1.1
= control target key start
LH: loop header
LB: loop body
LE: loop exit
PB: predicated region body
PF: predicated region fallthrough
CT: control target
= control target key end

     0   :  { %7 = vsyncpa [#allocation3], 0  ;;  %s7334_s9 = smov [#allocation2]   ;;  %s9416_s0 = inlined_call_operand.hbm [shape: bf16[2304,384], index: 0, kind: input, shape index: {}]   ;;  %s9417_s1 = inlined_call_operand.vmem [shape: bf16[384,49], index: 1, kind: input, shape index: {}]   ;;  %s9418_s2 = inlined_call_operand.vmem [shape: f32[2304,49], index: 2, kind: output, shape index: {}]  }
   0x1   :  { %s13_s10 = sshll.u32 %s7334_s9, 4  ;;  %s7310_s13 = scalar_lea.hbm %s9416_s0, 55296  ;;  %s14_s10 = int_to_ptr.vmem [resolvable:$true] %s13_s10 }
   0x2   :  { %p7311_p0 = scmp.ne.s32.totalorder %s9416_s0, %s7310_s13  ;;  %p7314_p1 = scmp.lt.u32.totalorder %s7310_s13, %s9416_s0 }
   0x4   :  { %p7316_p2 = pnand %p7314_p1, %p7311_p0 }
   0x6   :  { %7319 = shalt.err (!%p7316_p2)
}
   0x7   :  { %s7320_s18 = scalar_lea.vmem %s14_s10, 55296  ;;  %p7325_p4 = scmp.lt.s32.totalorder %s14_s10, %s14_s10 }
   0x8   :  { %p7321_p3 = scmp.ne.s32.totalorder %s14_s10, %s7320_s18  ;;  %p7326_p5 = scmp.lt.s32.totalorder %s7320_s18, %s7320_s18 }
   0xa   :  { %p7327_p6 = por %p7326_p5, %p7325_p4 }
   0xc   :  { %p7328_p7 = pnand %p7327_p6, %p7321_p3 }
   0xe   :  { %7331 = shalt.err (!%p7328_p7)
}
   0xf   :  { %s7335_s19 = smov 192   ;;  %s7336_s20 = smov 12  }
  0x10   :  { %19 = dma.hbm_to_vmem [thread:$0]  %s9416_s0, 55296, %s14_s10, [#allocation3], %s7335_s19, %s7335_s19, %s7336_s20  }
  0x11   :  { %7332 = dma.done.wait [#allocation3], 55296  }
  0x12   :  { %7333 = vsyncadd [#allocation3], 4294912000  ;;  %v7337_v0 = vmov 0   ;;  %v6710_v1 = vld [vmem:[%s9417_s1] sm:$0xff]   ;;  %v6711_v2 = vld [vmem:[%s9417_s1 + $0x8] sm:$0xff]   ;;  %vm5468_vm0 = vcmask 400384  }
  0x13   :  { %3098 = vmatprep.subr.bf16.mxu0 %v7337_v0  ;;  %6674 = vmatprep.subr.bf16.mxu1 %v7337_v0  ;;  %v6712_v3 = vld [vmem:[%s9417_s1 + $0x10] sm:$0xff]   ;;  %v6713_v4 = vld [vmem:[%s9417_s1 + $0x18] sm:$0xff]   ;;  %v6714_v5 = vld [vmem:[%s9417_s1 + $0x20] sm:$0xff]  }
  0x14   :  { %3099 = vmatpush1.bf16.msra.mxu0 %v6710_v1  ;;  %6690 = vmatpush1.bf16.msra.mxu1 %v6710_v1  ;;  %v6728_v6 = vld [vmem:[#allocation2 + $0x4] ss:$12 sps:$4 sm:$0xff]   ;;  %v6715_v7 = vld [vmem:[%s9417_s1 + $0x28] sm:$0xff]   ;;  %v6717_v10 = vld [vmem:[%s9417_s1 + $0x38] sm:$0xff]  }
  0x15   :  { %3100 = vmatprep.subr.bf16.mxu0 %v7337_v0  ;;  %6675 = vmatprep.subr.bf16.mxu1 %v7337_v0  ;;  %v6731_v8 = vld [vmem:[#allocation2 + $0xa24] ss:$12 sps:$4 sm:$0xff]   ;;  %v6719_v12 = vld [vmem:[%s9417_s1 + $0x48] sm:$0xff]   ;;  %v6721_v14 = vld [vmem:[%s9417_s1 + $0x58] sm:$0xff]  }
  0x16   :  { %3130 = vmatprep.mubr.bf16.mxu0 %v6728_v6  ;;  %3994 = vmatprep.mubr.bf16.mxu1 %v6731_v8  ;;  %v6716_v9 = vld [vmem:[%s9417_s1 + $0x30] sm:$0xff]   ;;  %v6718_v11 = vld [vmem:[%s9417_s1 + $0x40] sm:$0xff]   ;;  %v6723_v16 = vld [vmem:[%s9417_s1 + $0x68] sm:$0xff]  }
  0x17   :  { %v6720_v13 = vld [vmem:[%s9417_s1 + $0x50] sm:$0xff]   ;;  %v6722_v15 = vld [vmem:[%s9417_s1 + $0x60] sm:$0xff]   ;;  %v6725_v18 = vld [vmem:[%s9417_s1 + $0x78] sm:$0xff]  }
  0x18   :  { %3101 = vmatpush1.bf16.msra.mxu0 %v6711_v2  ;;  %6691 = vmatpush1.bf16.msra.mxu1 %v6711_v2  ;;  %v6724_v17 = vld [vmem:[%s9417_s1 + $0x70] sm:$0xff]   ;;  %v6732_v19 = vld [vmem:[%s9417_s1 + $0x80] sm:$0xff]   ;;  %v6733_v22 = vld [vmem:[#allocation2 + $0x1c] ss:$12 sps:$4 sm:$0xff]  }
  0x19   :  { %3102 = vmatprep.subr.bf16.mxu0 %v7337_v0  ;;  %6676 = vmatprep.subr.bf16.mxu1 %v7337_v0  ;;  %v6726_v20 = vld [vmem:[#allocation2] ss:$12 sps:$4 sm:$0xff]   ;;  %v6735_v23 = vld [vmem:[#allocation2 + $0xa3c] ss:$12 sps:$4 sm:$0xff]   ;;  %v6737_v25 = vld [vmem:[#allocation2 + $0x18] ss:$12 sps:$4 sm:$0xff]  }
  0x1a   :  { %v6729_v21 = vld [vmem:[#allocation2 + $0xa20] ss:$12 sps:$4 sm:$0xff]   ;;  %v6738_v26 = vld [vmem:[#allocation2 + $0xa38] ss:$12 sps:$4 sm:$0xff]   ;;  %v6788_v27 = vld [vmem:[%s9417_s1 + $0x90] sm:$0xff]  }
  0x1b   :  { %v6757_v24 = vld [vmem:[%s9417_s1 + $0x88] sm:$0xff]   ;;  %v6739_v28 = vld [vmem:[#allocation2 + $0x34] ss:$12 sps:$4 sm:$0xff]   ;;  %v6813_v30 = vld [vmem:[%s9417_s1 + $0x98] sm:$0xff]  }
  0x1c   :  { %3103 = vmatpush1.bf16.msra.mxu0 %v6712_v3  ;;  %6692 = vmatpush1.bf16.msra.mxu1 %v6712_v3  ;;  %v6741_v29 = vld [vmem:[#allocation2 + $0xa54] ss:$12 sps:$4 sm:$0xff]   ;;  %v6743_v31 = vld [vmem:[#allocation2 + $0x30] ss:$12 sps:$4 sm:$0xff]   ;;  %v6745_v33 = vld [vmem:[#allocation2 + $0x4c] ss:$12 sps:$4 sm:$0xff]  }
  0x1d   :  { %3104 = vmatprep.subr.bf16.mxu0 %v7337_v0  ;;  %6677 = vmatprep.subr.bf16.mxu1 %v7337_v0  ;;  %v6744_v32 = vld [vmem:[#allocation2 + $0xa50] ss:$12 sps:$4 sm:$0xff]   ;;  %v6747_v34 = vld [vmem:[#allocation2 + $0xa6c] ss:$12 sps:$4 sm:$0xff]   ;;  %v6844_v35 = vld [vmem:[%s9417_s1 + $0xa0] sm:$0xff]  }
  0x1e   :  { %v6749_v36 = vld [vmem:[#allocation2 + $0x48] ss:$12 sps:$4 sm:$0xff]   ;;  %v6751_v38 = vld [vmem:[#allocation2 + $0x64] ss:$12 sps:$4 sm:$0xff]   ;;  %v6755_v40 = vld [vmem:[#allocation2 + $0x60] ss:$12 sps:$4 sm:$0xff]  }
  0x1f   :  { %v6750_v37 = vld [vmem:[#allocation2 + $0xa68] ss:$12 sps:$4 sm:$0xff]   ;;  %v6753_v39 = vld [vmem:[#allocation2 + $0xa84] ss:$12 sps:$4 sm:$0xff]   ;;  %v6756_v41 = vld [vmem:[#allocation2 + $0xa80] ss:$12 sps:$4 sm:$0xff]  }
  0x20   :  { %3105 = vmatpush1.bf16.msra.mxu0 %v6713_v4  ;;  %6693 = vmatpush1.bf16.msra.mxu1 %v6713_v4  ;;  %v6758_v42 = vld [vmem:[#allocation2 + $0x7c] ss:$12 sps:$4 sm:$0xff]   ;;  %v6762_v44 = vld [vmem:[#allocation2 + $0x78] ss:$12 sps:$4 sm:$0xff]   ;;  %v6764_v46 = vld [vmem:[#allocation2 + $0x94] ss:$12 sps:$4 sm:$0xff]  }
  0x21   :  { %3106 = vmatprep.subr.bf16.mxu0 %v7337_v0  ;;  %6678 = vmatprep.subr.bf16.mxu1 %v7337_v0  ;;  %v6760_v43 = vld [vmem:[#allocation2 + $0xa9c] ss:$12 sps:$4 sm:$0xff]   ;;  %v6763_v45 = vld [vmem:[#allocation2 + $0xa98] ss:$12 sps:$4 sm:$0xff]   ;;  %v6766_v47 = vld [vmem:[#allocation2 + $0xab4] ss:$12 sps:$4 sm:$0xff]  }
  0x22   :  { %v6768_v48 = vld [vmem:[#allocation2 + $0x90] ss:$12 sps:$4 sm:$0xff]   ;;  %v6770_v50 = vld [vmem:[#allocation2 + $0xac] ss:$12 sps:$4 sm:$0xff]   ;;  %v6774_v53 = vld [vmem:[#allocation2 + $0xa8] ss:$12 sps:$4 sm:$0xff]  }
  0x23   :  { %v6769_v49 = vld [vmem:[#allocation2 + $0xab0] ss:$12 sps:$4 sm:$0xff]   ;;  %v6772_v51 = vld [vmem:[#allocation2 + $0xacc] ss:$12 sps:$4 sm:$0xff]   ;;  %v6775_v54 = vld [vmem:[#allocation2 + $0xac8] ss:$12 sps:$4 sm:$0xff]  }
  0x24   :  { %3107 = vmatpush1.bf16.msra.mxu0 %v6714_v5  ;;  %6694 = vmatpush1.bf16.msra.mxu1 %v6714_v5  ;;  %v6869_v52 = vld [vmem:[%s9417_s1 + $0xa8] sm:$0xff]   ;;  %v6776_v55 = vld [vmem:[#allocation2 + $0xc4] ss:$12 sps:$4 sm:$0xff]   ;;  %v6789_v63 = vld [vmem:[#allocation2 + $0xf4] ss:$12 sps:$4 sm:$0xff]  }
  0x25   :  { %3108 = vmatprep.subr.bf16.mxu0 %v7337_v0  ;;  %6679 = vmatprep.subr.bf16.mxu1 %v7337_v0  ;;  %v6778_v56 = vld [vmem:[#allocation2 + $0xae4] ss:$12 sps:$4 sm:$0xff]   ;;  %v6780_v57 = vld [vmem:[#allocation2 + $0xc0] ss:$12 sps:$4 sm:$0xff]   ;;  %v6782_v59 = vld [vmem:[#allocation2 + $0xdc] ss:$12 sps:$4 sm:$0xff]  }
  0x26   :  { %v6781_v58 = vld [vmem:[#allocation2 + $0xae0] ss:$12 sps:$4 sm:$0xff]   ;;  %v6784_v60 = vld [vmem:[#allocation2 + $0xafc] ss:$12 sps:$4 sm:$0xff]   ;;  %v6786_v61 = vld [vmem:[#allocation2 + $0xd8] ss:$12 sps:$4 sm:$0xff]  }
  0x27   :  { %v6787_v62 = vld [vmem:[#allocation2 + $0xaf8] ss:$12 sps:$4 sm:$0xff]   ;;  %v6793_v1 = vld [vmem:[#allocation2 + $0xf0] ss:$12 sps:$4 sm:$0xff]   ;;  %v6799_v5 = vld [vmem:[#allocation2 + $0x108] ss:$12 sps:$4 sm:$0xff]  }
  0x28   :  { %3109 = vmatpush1.bf16.msra.mxu0 %v6715_v7  ;;  %6695 = vmatpush1.bf16.msra.mxu1 %v6715_v7  ;;  %v6794_v2 = vld [vmem:[#allocation2 + $0xb10] ss:$12 sps:$4 sm:$0xff]   ;;  %v6795_v3 = vld [vmem:[#allocation2 + $0x10c] ss:$12 sps:$4 sm:$0xff]   ;;  %v6800_v6 = vld [vmem:[#allocation2 + $0xb28] ss:$12 sps:$4 sm:$0xff]  }
  0x29   :  { %3110 = vmatprep.subr.bf16.mxu0 %v7337_v0  ;;  %6680 = vmatprep.subr.bf16.mxu1 %v7337_v0  ;;  %v6797_v4 = vld [vmem:[#allocation2 + $0xb2c] ss:$12 sps:$4 sm:$0xff]   ;;  %v6801_v7 = vld [vmem:[#allocation2 + $0x124] ss:$12 sps:$4 sm:$0xff]  }
  0x2a   :  { %v6803_v8 = vld [vmem:[#allocation2 + $0xb44] ss:$12 sps:$4 sm:$0xff]  }
  0x2c   :  { %3111 = vmatpush1.bf16.msra.mxu0 %v6716_v9  ;;  %6696 = vmatpush1.bf16.msra.mxu1 %v6716_v9  ;;  %v6900_v9 = vld [vmem:[%s9417_s1 + $0xb0] sm:$0xff]  }
  0x2d   :  { %3112 = vmatprep.subr.bf16.mxu0 %v7337_v0  ;;  %6681 = vmatprep.subr.bf16.mxu1 %v7337_v0 }
  0x30   :  { %3113 = vmatpush1.bf16.msra.mxu0 %v6717_v10  ;;  %6697 = vmatpush1.bf16.msra.mxu1 %v6717_v10  ;;  %v6805_v10 = vld [vmem:[#allocation2 + $0x120] ss:$12 sps:$4 sm:$0xff]  }
  0x31   :  { %3114 = vmatprep.subr.bf16.mxu0 %v7337_v0  ;;  %6682 = vmatprep.subr.bf16.mxu1 %v7337_v0 }
  0x34   :  { %3115 = vmatpush1.bf16.msra.mxu0 %v6718_v11  ;;  %6698 = vmatpush1.bf16.msra.mxu1 %v6718_v11  ;;  %v6806_v11 = vld [vmem:[#allocation2 + $0xb40] ss:$12 sps:$4 sm:$0xff]  }
  0x35   :  { %3116 = vmatprep.subr.bf16.mxu0 %v7337_v0  ;;  %6683 = vmatprep.subr.bf16.mxu1 %v7337_v0 }
  0x38   :  { %3117 = vmatpush1.bf16.msra.mxu0 %v6719_v12  ;;  %6699 = vmatpush1.bf16.msra.mxu1 %v6719_v12  ;;  %v6807_v12 = vld [vmem:[#allocation2 + $0x13c] ss:$12 sps:$4 sm:$0xff]  }
  0x39   :  { %3118 = vmatprep.subr.bf16.mxu0 %v7337_v0  ;;  %6684 = vmatprep.subr.bf16.mxu1 %v7337_v0 }
  0x3c   :  { %3119 = vmatpush1.bf16.msra.mxu0 %v6720_v13  ;;  %6700 = vmatpush1.bf16.msra.mxu1 %v6720_v13  ;;  %v6809_v13 = vld [vmem:[#allocation2 + $0xb5c] ss:$12 sps:$4 sm:$0xff]  }
  0x3d   :  { %3120 = vmatprep.subr.bf16.mxu0 %v7337_v0  ;;  %6685 = vmatprep.subr.bf16.mxu1 %v7337_v0 }
  0x40   :  { %3121 = vmatpush1.bf16.msra.mxu0 %v6721_v14  ;;  %6701 = vmatpush1.bf16.msra.mxu1 %v6721_v14  ;;  %v6811_v14 = vld [vmem:[#allocation2 + $0x138] ss:$12 sps:$4 sm:$0xff]  }
  0x41   :  { %3122 = vmatprep.subr.bf16.mxu0 %v7337_v0  ;;  %6686 = vmatprep.subr.bf16.mxu1 %v7337_v0 }
  0x44   :  { %3123 = vmatpush1.bf16.msra.mxu0 %v6722_v15  ;;  %6702 = vmatpush1.bf16.msra.mxu1 %v6722_v15  ;;  %v6812_v15 = vld [vmem:[#allocation2 + $0xb58] ss:$12 sps:$4 sm:$0xff]  }
  0x45   :  { %3124 = vmatprep.subr.bf16.mxu0 %v7337_v0  ;;  %6687 = vmatprep.subr.bf16.mxu1 %v7337_v0 }
  0x48   :  { %3125 = vmatpush1.bf16.msra.mxu0 %v6723_v16  ;;  %6703 = vmatpush1.bf16.msra.mxu1 %v6723_v16  ;;  %v6814_v16 = vld [vmem:[#allocation2 + $0x154] ss:$12 sps:$4 sm:$0xff]  }
  0x49   :  { %3126 = vmatprep.subr.bf16.mxu0 %v7337_v0  ;;  %6688 = vmatprep.subr.bf16.mxu1 %v7337_v0 }
  0x4c   :  { %3127 = vmatpush1.bf16.msra.mxu0 %v6724_v17  ;;  %6704 = vmatpush1.bf16.msra.mxu1 %v6724_v17  ;;  %v6816_v17 = vld [vmem:[#allocation2 + $0xb74] ss:$12 sps:$4 sm:$0xff]  }
  0x4d   :  { %3128 = vmatprep.subr.bf16.mxu0 %v7337_v0  ;;  %6689 = vmatprep.subr.bf16.mxu1 %v7337_v0  ;;  %v6791_v0 = vld [vmem:[#allocation2 + $0xb14] ss:$12 sps:$4 sm:$0xff]  }
  0x50   :  { %3129 = vmatpush1.bf16.msra.mxu0 %v6725_v18  ;;  %6705 = vmatpush1.bf16.msra.mxu1 %v6725_v18  ;;  %v6818_v18 = vld [vmem:[#allocation2 + $0x150] ss:$12 sps:$4 sm:$0xff]  }
  0x51   :  { %6370 = vmatprep.subr.bf16.mxu1 %v6732_v19 }
  0x53   :  { %3131 = vmatmul.mubr.bf16.vlgmr.msra.gmra.mrb[0].mxu0 %v6726_v20  ;;  %3995 = vmatmul.mubr.bf16.vlgmr.msra.gmra.mrb[0].mxu1 %v6729_v21  ;;  %v6820_v20 = vld [vmem:[#allocation2 + $0x16c] ss:$12 sps:$4 sm:$0xff]  }
  0x54   :  { %6371 = vmatpush3.bf16.msra.mxu1 %v6732_v19  ;;  %3138 = vmatprep.mubr.bf16.mxu0 %v6733_v22  ;;  %v6819_v19 = vld [vmem:[#allocation2 + $0xb70] ss:$12 sps:$4 sm:$0xff]   ;;  %v6822_v21 = vld [vmem:[#allocation2 + $0xb8c] ss:$12 sps:$4 sm:$0xff]   ;;  %v6824_v22 = vld [vmem:[#allocation2 + $0x168] ss:$12 sps:$4 sm:$0xff]  }
  0x55   :  { %4002 = vmatprep.mubr.bf16.mxu1 %v6735_v23  ;;  %6372 = vmatprep.subr.bf16.mxu1 %v6757_v24  ;;  %v6825_v23 = vld [vmem:[#allocation2 + $0xb88] ss:$12 sps:$4 sm:$0xff]  }
  0x58   :  { %6373 = vmatpush3.bf16.msra.mxu1 %v6757_v24  ;;  %v6826_v24 = vld [vmem:[#allocation2 + $0x184] ss:$12 sps:$4 sm:$0xff]  }
  0x59   :  { %6374 = vmatprep.subr.bf16.mxu1 %v6788_v27 }
  0x5b   :  { %3139 = vmatmul.mubr.bf16.gmra.mrb[4].mxu0 %v6737_v25  ;;  %4003 = vmatmul.mubr.bf16.gmra.mrb[4].mxu1 %v6738_v26  ;;  %v6828_v25 = vld [vmem:[#allocation2 + $0xba4] ss:$12 sps:$4 sm:$0xff]   ;;  %v6830_v26 = vld [vmem:[#allocation2 + $0x180] ss:$12 sps:$4 sm:$0xff]  }
  0x5c   :  { %3146 = vmatprep.mubr.bf16.mxu0 %v6739_v28  ;;  %4010 = vmatprep.mubr.bf16.mxu1 %v6741_v29  ;;  %v6925_v28 = vld [vmem:[%s9417_s1 + $0xb8] sm:$0xff]  }
  0x5d   :  { %6375 = vmatpush3.bf16.msra.mxu1 %v6788_v27  ;;  %v6831_v27 = vld [vmem:[#allocation2 + $0xba0] ss:$12 sps:$4 sm:$0xff]   ;;  %v6832_v29 = vld [vmem:[#allocation2 + $0x19c] ss:$12 sps:$4 sm:$0xff]  }
  0x5e   :  { %6376 = vmatprep.subr.bf16.mxu1 %v6813_v30 }
  0x61   :  { %6377 = vmatpush3.bf16.msra.mxu1 %v6813_v30  ;;  %v6834_v30 = vld [vmem:[#allocation2 + $0xbbc] ss:$12 sps:$4 sm:$0xff]  }
  0x62   :  { %6378 = vmatprep.subr.bf16.mxu1 %v6844_v35 }
  0x63   :  { %3147 = vmatmul.mubr.bf16.gmra.mrb[8].mxu0 %v6743_v31  ;;  %4011 = vmatmul.mubr.bf16.gmra.mrb[8].mxu1 %v6744_v32  ;;  %v6836_v31 = vld [vmem:[#allocation2 + $0x198] ss:$12 sps:$4 sm:$0xff]  }
  0x64   :  { %3154 = vmatprep.mubr.bf16.mxu0 %v6745_v33  ;;  %4018 = vmatprep.mubr.bf16.mxu1 %v6747_v34  ;;  %v6837_v32 = vld [vmem:[#allocation2 + $0xbb8] ss:$12 sps:$4 sm:$0xff]   ;;  %v6838_v33 = vld [vmem:[#allocation2 + $0x1b4] ss:$12 sps:$4 sm:$0xff]  }
  0x65   :  { %6379 = vmatpush3.bf16.msra.mxu1 %v6844_v35  ;;  %v6840_v34 = vld [vmem:[#allocation2 + $0xbd4] ss:$12 sps:$4 sm:$0xff]   ;;  %v6842_v35 = vld [vmem:[#allocation2 + $0x1b0] ss:$12 sps:$4 sm:$0xff]  }
  0x66   :  { %6380 = vmatprep.subr.bf16.mxu1 %v6869_v52 }
  0x69   :  { %6381 = vmatpush3.bf16.msra.mxu1 %v6869_v52  ;;  %v6868_v52 = vld [vmem:[#allocation2 + $0xc30] ss:$12 sps:$4 sm:$0xff]  }
  0x6a   :  { %6382 = vmatprep.subr.bf16.mxu1 %v6900_v9 }
  0x6b   :  { %3155 = vmatmul.mubr.bf16.gmra.mrb[12].mxu0 %v6749_v36  ;;  %4019 = vmatmul.mubr.bf16.gmra.mrb[12].mxu1 %v6750_v37  ;;  %v6843_v36 = vld [vmem:[#allocation2 + $0xbd0] ss:$12 sps:$4 sm:$0xff]   ;;  %v6845_v37 = vld [vmem:[#allocation2 + $0x1cc] ss:$12 sps:$4 sm:$0xff]  }
  0x6c   :  { %3162 = vmatprep.mubr.bf16.mxu0 %v6751_v38  ;;  %4026 = vmatprep.mubr.bf16.mxu1 %v6753_v39  ;;  %v6847_v38 = vld [vmem:[#allocation2 + $0xbec] ss:$12 sps:$4 sm:$0xff]   ;;  %v6849_v39 = vld [vmem:[#allocation2 + $0x1c8] ss:$12 sps:$4 sm:$0xff]  }
  0x6d   :  { %6383 = vmatpush3.bf16.msra.mxu1 %v6900_v9 }
  0x6e   :  { %6384 = vmatprep.subr.bf16.mxu1 %v6925_v28 }
  0x71   :  { %6385 = vmatpush3.bf16.msra.mxu1 %v6925_v28  ;;  %v6909_v28 = vld [vmem:[#allocation2 + $0xcdc] ss:$12 sps:$4 sm:$0xff]  }
  0x73   :  { %3163 = vmatmul.mubr.bf16.gmra.mrb[16].mxu0 %v6755_v40  ;;  %4027 = vmatmul.mubr.bf16.gmra.mrb[16].mxu1 %v6756_v41  ;;  %v6850_v40 = vld [vmem:[#allocation2 + $0xbe8] ss:$12 sps:$4 sm:$0xff]   ;;  %v6851_v41 = vld [vmem:[#allocation2 + $0x1e4] ss:$12 sps:$4 sm:$0xff]  }
  0x74   :  { %3170 = vmatprep.mubr.bf16.mxu0 %v6758_v42  ;;  %4034 = vmatprep.mubr.bf16.mxu1 %v6760_v43  ;;  %v6853_v42 = vld [vmem:[#allocation2 + $0xc04] ss:$12 sps:$4 sm:$0xff]   ;;  %v6855_v43 = vld [vmem:[#allocation2 + $0x1e0] ss:$12 sps:$4 sm:$0xff]  }
  0x7b   :  { %3171 = vmatmul.mubr.bf16.gmra.mrb[20].mxu0 %v6762_v44  ;;  %4035 = vmatmul.mubr.bf16.gmra.mrb[20].mxu1 %v6763_v45  ;;  %v6856_v44 = vld [vmem:[#allocation2 + $0xc00] ss:$12 sps:$4 sm:$0xff]   ;;  %v6857_v45 = vld [vmem:[#allocation2 + $0x1fc] ss:$12 sps:$4 sm:$0xff]  }
  0x7c   :  { %3178 = vmatprep.mubr.bf16.mxu0 %v6764_v46  ;;  %4042 = vmatprep.mubr.bf16.mxu1 %v6766_v47  ;;  %v6859_v46 = vld [vmem:[#allocation2 + $0xc1c] ss:$12 sps:$4 sm:$0xff]   ;;  %v6861_v47 = vld [vmem:[#allocation2 + $0x1f8] ss:$12 sps:$4 sm:$0xff]  }
  0x83   :  { %3179 = vmatmul.mubr.bf16.gmra.mrb[24].mxu0 %v6768_v48  ;;  %4043 = vmatmul.mubr.bf16.gmra.mrb[24].mxu1 %v6769_v49  ;;  %v6862_v48 = vld [vmem:[#allocation2 + $0xc18] ss:$12 sps:$4 sm:$0xff]   ;;  %v6863_v49 = vld [vmem:[#allocation2 + $0x214] ss:$12 sps:$4 sm:$0xff]  }
  0x84   :  { %3186 = vmatprep.mubr.bf16.mxu0 %v6770_v50  ;;  %4050 = vmatprep.mubr.bf16.mxu1 %v6772_v51  ;;  %v6865_v50 = vld [vmem:[#allocation2 + $0xc34] ss:$12 sps:$4 sm:$0xff]   ;;  %v6867_v51 = vld [vmem:[#allocation2 + $0x210] ss:$12 sps:$4 sm:$0xff]  }
  0x8b   :  { %3187 = vmatmul.mubr.bf16.gmra.mrb[28].mxu0 %v6774_v53  ;;  %4051 = vmatmul.mubr.bf16.gmra.mrb[28].mxu1 %v6775_v54  ;;  %v6870_v53 = vld [vmem:[#allocation2 + $0x22c] ss:$12 sps:$4 sm:$0xff]  }
  0x8c   :  { %3194 = vmatprep.mubr.bf16.mxu0 %v6776_v55  ;;  %4058 = vmatprep.mubr.bf16.mxu1 %v6778_v56  ;;  %v6872_v54 = vld [vmem:[#allocation2 + $0xc4c] ss:$12 sps:$4 sm:$0xff]   ;;  %v6874_v55 = vld [vmem:[#allocation2 + $0x228] ss:$12 sps:$4 sm:$0xff]  }
  0x8d   :  { %v6875_v56 = vld [vmem:[#allocation2 + $0xc48] ss:$12 sps:$4 sm:$0xff]  }
  0x93   :  { %3195 = vmatmul.mubr.bf16.gmra.mrb[32].mxu0 %v6780_v57  ;;  %4059 = vmatmul.mubr.bf16.gmra.mrb[32].mxu1 %v6781_v58  ;;  %v6876_v57 = vld [vmem:[#allocation2 + $0x244] ss:$12 sps:$4 sm:$0xff]  }
  0x94   :  { %3202 = vmatprep.mubr.bf16.mxu0 %v6782_v59  ;;  %4066 = vmatprep.mubr.bf16.mxu1 %v6784_v60  ;;  %v6878_v58 = vld [vmem:[#allocation2 + $0xc64] ss:$12 sps:$4 sm:$0xff]   ;;  %v6880_v59 = vld [vmem:[#allocation2 + $0x240] ss:$12 sps:$4 sm:$0xff]  }
  0x95   :  { %v6881_v60 = vld [vmem:[#allocation2 + $0xc60] ss:$12 sps:$4 sm:$0xff]  }
  0x9b   :  { %3203 = vmatmul.mubr.bf16.gmra.mrb[36].mxu0 %v6786_v61  ;;  %4067 = vmatmul.mubr.bf16.gmra.mrb[36].mxu1 %v6787_v62  ;;  %v6882_v61 = vld [vmem:[#allocation2 + $0x25c] ss:$12 sps:$4 sm:$0xff]  }
  0x9c   :  { %3210 = vmatprep.mubr.bf16.mxu0 %v6789_v63  ;;  %4074 = vmatprep.mubr.bf16.mxu1 %v6791_v0  ;;  %v6884_v62 = vld [vmem:[#allocation2 + $0xc7c] ss:$12 sps:$4 sm:$0xff]   ;;  %v6886_v63 = vld [vmem:[#allocation2 + $0x258] ss:$12 sps:$4 sm:$0xff]  }
  0x9d   :  { %v6887_v0 = vld [vmem:[#allocation2 + $0xc78] ss:$12 sps:$4 sm:$0xff]  }
  0xa3   :  { %3211 = vmatmul.mubr.bf16.gmra.mrb[40].mxu0 %v6793_v1  ;;  %4075 = vmatmul.mubr.bf16.gmra.mrb[40].mxu1 %v6794_v2  ;;  %v6888_v1 = vld [vmem:[#allocation2 + $0x274] ss:$12 sps:$4 sm:$0xff]  }
  0xa4   :  { %3218 = vmatprep.mubr.bf16.mxu0 %v6795_v3  ;;  %4082 = vmatprep.mubr.bf16.mxu1 %v6797_v4  ;;  %v6890_v2 = vld [vmem:[#allocation2 + $0xc94] ss:$12 sps:$4 sm:$0xff]   ;;  %v6892_v3 = vld [vmem:[#allocation2 + $0x270] ss:$12 sps:$4 sm:$0xff]  }
  0xa5   :  { %v6893_v4 = vld [vmem:[#allocation2 + $0xc90] ss:$12 sps:$4 sm:$0xff]  }
  0xab   :  { %3219 = vmatmul.mubr.bf16.gmra.mrb[44].mxu0 %v6799_v5  ;;  %4083 = vmatmul.mubr.bf16.gmra.mrb[44].mxu1 %v6800_v6  ;;  %v6894_v5 = vld [vmem:[#allocation2 + $0x28c] ss:$12 sps:$4 sm:$0xff]  }
  0xac   :  { %3226 = vmatprep.mubr.bf16.mxu0 %v6801_v7  ;;  %4090 = vmatprep.mubr.bf16.mxu1 %v6803_v8  ;;  %v6896_v6 = vld [vmem:[#allocation2 + $0xcac] ss:$12 sps:$4 sm:$0xff]  }
  0xb3   :  { %3227 = vmatmul.mubr.bf16.gmra.mrb[48].mxu0 %v6805_v10  ;;  %4091 = vmatmul.mubr.bf16.gmra.mrb[48].mxu1 %v6806_v11  ;;  %v6898_v11 = vld [vmem:[#allocation2 + $0x288] ss:$12 sps:$4 sm:$0xff]  }
  0xb4   :  { %3234 = vmatprep.mubr.bf16.mxu0 %v6807_v12  ;;  %4098 = vmatprep.mubr.bf16.mxu1 %v6809_v13  ;;  %v6899_v12 = vld [vmem:[#allocation2 + $0xca8] ss:$12 sps:$4 sm:$0xff]  }
  0xbb   :  { %3235 = vmatmul.mubr.bf16.gmra.mrb[52].mxu0 %v6811_v14  ;;  %4099 = vmatmul.mubr.bf16.gmra.mrb[52].mxu1 %v6812_v15  ;;  %v6901_v15 = vld [vmem:[#allocation2 + $0x2a4] ss:$12 sps:$4 sm:$0xff]  }
  0xbc   :  { %3242 = vmatprep.mubr.bf16.mxu0 %v6814_v16  ;;  %4106 = vmatprep.mubr.bf16.mxu1 %v6816_v17  ;;  %v6903_v16 = vld [vmem:[#allocation2 + $0xcc4] ss:$12 sps:$4 sm:$0xff]  }
  0xc3   :  { %3243 = vmatmul.mubr.bf16.gmra.mrb[56].mxu0 %v6818_v18  ;;  %4107 = vmatmul.mubr.bf16.gmra.mrb[56].mxu1 %v6819_v19 }
  0xc4   :  { %3250 = vmatprep.mubr.bf16.mxu0 %v6820_v20  ;;  %4114 = vmatprep.mubr.bf16.mxu1 %v6822_v21 }
  0xcb   :  { %3251 = vmatmul.mubr.bf16.gmra.mrb[60].mxu0 %v6824_v22  ;;  %4115 = vmatmul.mubr.bf16.gmra.mrb[60].mxu1 %v6825_v23  ;;  %v6905_v23 = vld [vmem:[#allocation2 + $0x2a0] ss:$12 sps:$4 sm:$0xff]  }
  0xcc   :  { %3258 = vmatprep.mubr.bf16.mxu0 %v6826_v24  ;;  %4122 = vmatprep.mubr.bf16.mxu1 %v6828_v25  ;;  %v6906_v24 = vld [vmem:[#allocation2 + $0xcc0] ss:$12 sps:$4 sm:$0xff]  }
  0xd3   :  { %3259 = vmatmul.mubr.bf16.gmra.mrb[64].mxu0 %v6830_v26  ;;  %4123 = vmatmul.mubr.bf16.gmra.mrb[64].mxu1 %v6831_v27  ;;  %v6907_v27 = vld [vmem:[#allocation2 + $0x2bc] ss:$12 sps:$4 sm:$0xff]  }
  0xd4   :  { %3266 = vmatprep.mubr.bf16.mxu0 %v6832_v29  ;;  %4130 = vmatprep.mubr.bf16.mxu1 %v6834_v30 }
  0xdb   :  { %3267 = vmatmul.mubr.bf16.gmra.mrb[68].mxu0 %v6836_v31  ;;  %4131 = vmatmul.mubr.bf16.gmra.mrb[68].mxu1 %v6837_v32 }
  0xdc   :  { %3274 = vmatprep.mubr.bf16.mxu0 %v6838_v33  ;;  %4138 = vmatprep.mubr.bf16.mxu1 %v6840_v34 }
  0xe3   :  { %3275 = vmatmul.mubr.bf16.gmra.mrb[72].mxu0 %v6842_v35  ;;  %4139 = vmatmul.mubr.bf16.gmra.mrb[72].mxu1 %v6843_v36  ;;  %v6911_v35 = vld [vmem:[#allocation2 + $0x2b8] ss:$12 sps:$4 sm:$0xff]  }
  0xe4   :  { %3282 = vmatprep.mubr.bf16.mxu0 %v6845_v37  ;;  %4146 = vmatprep.mubr.bf16.mxu1 %v6847_v38  ;;  %v6912_v36 = vld [vmem:[#allocation2 + $0xcd8] ss:$12 sps:$4 sm:$0xff]  }
  0xeb   :  { %3283 = vmatmul.mubr.bf16.gmra.mrb[76].mxu0 %v6849_v39  ;;  %4147 = vmatmul.mubr.bf16.gmra.mrb[76].mxu1 %v6850_v40  ;;  %v6913_v39 = vld [vmem:[#allocation2 + $0x2d4] ss:$12 sps:$4 sm:$0xff]  }
  0xec   :  { %3290 = vmatprep.mubr.bf16.mxu0 %v6851_v41  ;;  %4154 = vmatprep.mubr.bf16.mxu1 %v6853_v42  ;;  %v6915_v40 = vld [vmem:[#allocation2 + $0xcf4] ss:$12 sps:$4 sm:$0xff]  }
  0xf3   :  { %3291 = vmatmul.mubr.bf16.gmra.mrb[80].mxu0 %v6855_v43  ;;  %4155 = vmatmul.mubr.bf16.gmra.mrb[80].mxu1 %v6856_v44 }
  0xf4   :  { %3298 = vmatprep.mubr.bf16.mxu0 %v6857_v45  ;;  %4162 = vmatprep.mubr.bf16.mxu1 %v6859_v46 }
  0xfb   :  { %3299 = vmatmul.mubr.bf16.gmra.mrb[84].mxu0 %v6861_v47  ;;  %4163 = vmatmul.mubr.bf16.gmra.mrb[84].mxu1 %v6862_v48  ;;  %v6917_v47 = vld [vmem:[#allocation2 + $0x2d0] ss:$12 sps:$4 sm:$0xff]  }
  0xfc   :  { %3306 = vmatprep.mubr.bf16.mxu0 %v6863_v49  ;;  %4170 = vmatprep.mubr.bf16.mxu1 %v6865_v50  ;;  %v6918_v48 = vld [vmem:[#allocation2 + $0xcf0] ss:$12 sps:$4 sm:$0xff]  }
 0x103   :  { %3307 = vmatmul.mubr.bf16.gmra.mrb[88].mxu0 %v6867_v51  ;;  %4171 = vmatmul.mubr.bf16.gmra.mrb[88].mxu1 %v6868_v52  ;;  %v6919_v51 = vld [vmem:[#allocation2 + $0x2ec] ss:$12 sps:$4 sm:$0xff]  }
 0x104   :  { %3314 = vmatprep.mubr.bf16.mxu0 %v6870_v53  ;;  %4178 = vmatprep.mubr.bf16.mxu1 %v6872_v54  ;;  %v6921_v52 = vld [vmem:[#allocation2 + $0xd0c] ss:$12 sps:$4 sm:$0xff]  }
 0x10b   :  { %3315 = vmatmul.mubr.bf16.gmra.mrb[92].mxu0 %v6874_v55  ;;  %4179 = vmatmul.mubr.bf16.gmra.mrb[92].mxu1 %v6875_v56 }
 0x10c   :  { %3322 = vmatprep.mubr.bf16.mxu0 %v6876_v57  ;;  %4186 = vmatprep.mubr.bf16.mxu1 %v6878_v58 }
 0x113   :  { %3323 = vmatmul.mubr.bf16.gmra.mrb[96].mxu0 %v6880_v59  ;;  %4187 = vmatmul.mubr.bf16.gmra.mrb[96].mxu1 %v6881_v60  ;;  %v6923_v59 = vld [vmem:[#allocation2 + $0x2e8] ss:$12 sps:$4 sm:$0xff]  }
 0x114   :  { %3330 = vmatprep.mubr.bf16.mxu0 %v6882_v61  ;;  %4194 = vmatprep.mubr.bf16.mxu1 %v6884_v62  ;;  %v6924_v60 = vld [vmem:[#allocation2 + $0xd08] ss:$12 sps:$4 sm:$0xff]  }
 0x11b   :  { %3331 = vmatmul.mubr.bf16.gmra.mrb[100].mxu0 %v6886_v63  ;;  %4195 = vmatmul.mubr.bf16.gmra.mrb[100].mxu1 %v6887_v0  ;;  %v6926_v63 = vld [vmem:[#allocation2 + $0x304] ss:$12 sps:$4 sm:$0xff]  }
 0x11c   :  { %3338 = vmatprep.mubr.bf16.mxu0 %v6888_v1  ;;  %4202 = vmatprep.mubr.bf16.mxu1 %v6890_v2  ;;  %v6928_v0 = vld [vmem:[#allocation2 + $0xd24] ss:$12 sps:$4 sm:$0xff]  }
 0x123   :  { %3339 = vmatmul.mubr.bf16.gmra.mrb[104].mxu0 %v6892_v3  ;;  %4203 = vmatmul.mubr.bf16.gmra.mrb[104].mxu1 %v6893_v4 }
 0x124   :  { %3346 = vmatprep.mubr.bf16.mxu0 %v6894_v5  ;;  %4210 = vmatprep.mubr.bf16.mxu1 %v6896_v6 }
 0x126   :  { %v7469_v7 = vpop.f32.mrb[0].mxu0  ;;  %v7471_v8 = vpop.f32.mrb[0].mxu1 }
 0x127   :  { %9419 = vst [vmem:[#allocation5_spill] sm:$0xff] %v7471_v8  ;;  %v3134_v9 = vpop.f32.mrb[1].mxu0  ;;  %v3998_v10 = vpop.f32.mrb[1].mxu1 }
 0x128   :  { %v7473_v13 = vpop.f32.mrb[2].mxu0  ;;  %v7475_v14 = vpop.f32.mrb[2].mxu1  ;;  %v6930_v9 = vld [vmem:[#allocation2 + $0x300] ss:$12 sps:$4 sm:$0xff]  }
 0x129   :  { %9420 = vst [vmem:[#allocation6_spill] sm:$0xff] %v7475_v14  ;;  %v3137_v17 = vpop.f32.mrb[3].mxu0  ;;  %v4001_v18 = vpop.f32.mrb[3].mxu1  ;;  %v6931_v10 = vld [vmem:[#allocation2 + $0xd20] ss:$12 sps:$4 sm:$0xff]  }
 0x12b   :  { %3347 = vmatmul.mubr.bf16.gmra.mrb[108].mxu0 %v6898_v11  ;;  %4211 = vmatmul.mubr.bf16.gmra.mrb[108].mxu1 %v6899_v12 }
 0x12c   :  { %3354 = vmatprep.mubr.bf16.mxu0 %v6901_v15  ;;  %4218 = vmatprep.mubr.bf16.mxu1 %v6903_v16  ;;  %v6932_v15 = vld [vmem:[#allocation2 + $0x31c] ss:$12 sps:$4 sm:$0xff]  }
 0x12d   :  { %v6934_v16 = vld [vmem:[#allocation2 + $0xd3c] ss:$12 sps:$4 sm:$0xff]  }
 0x12e   :  { %v7477_v19 = vpop.f32.mrb[4].mxu0  ;;  %v7479_v20 = vpop.f32.mrb[4].mxu1 }
 0x12f   :  { %9421 = vst [vmem:[#allocation7_spill] sm:$0xff] %v7479_v20  ;;  %v3142_v21 = vpop.f32.mrb[5].mxu0  ;;  %v4006_v22 = vpop.f32.mrb[5].mxu1  ;;  %v7032_v20 = vld [vmem:[#allocation2 + $0x308] ss:$12 sps:$4 sm:$0xff]  }
 0x130   :  { %v7481_v25 = vpop.f32.mrb[6].mxu0  ;;  %v7483_v26 = vpop.f32.mrb[6].mxu1 }
 0x131   :  { %9422 = vst [vmem:[#allocation8_spill] sm:$0xff] %v7483_v26  ;;  %v3145_v29 = vpop.f32.mrb[7].mxu0  ;;  %v4009_v30 = vpop.f32.mrb[7].mxu1  ;;  %v7027_v26 = vld [vmem:[#allocation2 + $0x2d8] ss:$12 sps:$4 sm:$0xff]  }
 0x133   :  { %3355 = vmatmul.mubr.bf16.gmra.mrb[112].mxu0 %v6905_v23  ;;  %4219 = vmatmul.mubr.bf16.gmra.mrb[112].mxu1 %v6906_v24 }
 0x134   :  { %3362 = vmatprep.mubr.bf16.mxu0 %v6907_v27  ;;  %4226 = vmatprep.mubr.bf16.mxu1 %v6909_v28  ;;  %v6936_v27 = vld [vmem:[#allocation2 + $0x318] ss:$12 sps:$4 sm:$0xff]  }
 0x135   :  { %v6937_v28 = vld [vmem:[#allocation2 + $0xd38] ss:$12 sps:$4 sm:$0xff]  }
 0x136   :  { %v7485_v31 = vpop.f32.mrb[8].mxu0  ;;  %v7487_v32 = vpop.f32.mrb[8].mxu1 }
 0x137   :  { %9423 = vst [vmem:[#allocation9_spill] sm:$0xff] %v7487_v32  ;;  %v3150_v33 = vpop.f32.mrb[9].mxu0  ;;  %v4014_v34 = vpop.f32.mrb[9].mxu1 }
 0x138   :  { %v7489_v37 = vpop.f32.mrb[10].mxu0  ;;  %v7491_v38 = vpop.f32.mrb[10].mxu1  ;;  %v6938_v33 = vld [vmem:[#allocation2 + $0x334] ss:$12 sps:$4 sm:$0xff]  }
 0x139   :  { %9424 = vst [vmem:[#allocation10_spill] sm:$0xff] %v7491_v38  ;;  %v3153_v41 = vpop.f32.mrb[11].mxu0  ;;  %v4017_v42 = vpop.f32.mrb[11].mxu1  ;;  %v6940_v34 = vld [vmem:[#allocation2 + $0xd54] ss:$12 sps:$4 sm:$0xff]  }
 0x13b   :  { %3363 = vmatmul.mubr.bf16.gmra.mrb[116].mxu0 %v6911_v35  ;;  %4227 = vmatmul.mubr.bf16.gmra.mrb[116].mxu1 %v6912_v36 }
 0x13c   :  { %3370 = vmatprep.mubr.bf16.mxu0 %v6913_v39  ;;  %4234 = vmatprep.mubr.bf16.mxu1 %v6915_v40 }
 0x13e   :  { %v7493_v43 = vpop.f32.mrb[12].mxu0  ;;  %v7495_v44 = vpop.f32.mrb[12].mxu1 }
 0x13f   :  { %9425 = vst [vmem:[#allocation11_spill] sm:$0xff] %v7495_v44  ;;  %v3158_v45 = vpop.f32.mrb[13].mxu0  ;;  %v4022_v46 = vpop.f32.mrb[13].mxu1  ;;  %v7022_v44 = vld [vmem:[#allocation2 + $0x2a8] ss:$12 sps:$4 sm:$0xff]  }
 0x140   :  { %v7497_v49 = vpop.f32.mrb[14].mxu0  ;;  %v7499_v50 = vpop.f32.mrb[14].mxu1  ;;  %v6942_v45 = vld [vmem:[#allocation2 + $0x330] ss:$12 sps:$4 sm:$0xff]  }
 0x141   :  { %9426 = vst [vmem:[#allocation12_spill] sm:$0xff] %v7499_v50  ;;  %v3161_v53 = vpop.f32.mrb[15].mxu0  ;;  %v4025_v54 = vpop.f32.mrb[15].mxu1  ;;  %v6943_v46 = vld [vmem:[#allocation2 + $0xd50] ss:$12 sps:$4 sm:$0xff]  }
 0x142   :  { %v7017_v50 = vld [vmem:[#allocation2 + $0x278] ss:$12 sps:$4 sm:$0xff]  }
 0x143   :  { %3371 = vmatmul.mubr.bf16.gmra.mrb[120].mxu0 %v6917_v47  ;;  %4235 = vmatmul.mubr.bf16.gmra.mrb[120].mxu1 %v6918_v48 }
 0x144   :  { %3378 = vmatprep.mubr.bf16.mxu0 %v6919_v51  ;;  %4242 = vmatprep.mubr.bf16.mxu1 %v6921_v52  ;;  %v6944_v51 = vld [vmem:[#allocation2 + $0x34c] ss:$12 sps:$4 sm:$0xff]  }
 0x145   :  { %v6946_v52 = vld [vmem:[#allocation2 + $0xd6c] ss:$12 sps:$4 sm:$0xff]  }
 0x146   :  { %v7501_v55 = vpop.f32.mrb[16].mxu0  ;;  %v7503_v56 = vpop.f32.mrb[16].mxu1 }
 0x147   :  { %9427 = vst [vmem:[#allocation13_spill] sm:$0xff] %v7503_v56  ;;  %v3166_v57 = vpop.f32.mrb[17].mxu0  ;;  %v4030_v58 = vpop.f32.mrb[17].mxu1 }
 0x148   :  { %v7505_v61 = vpop.f32.mrb[18].mxu0  ;;  %v7507_v62 = vpop.f32.mrb[18].mxu1 }
 0x149   :  { %9428 = vst [vmem:[#allocation14_spill] sm:$0xff] %v7507_v62  ;;  %v3169_v1 = vpop.f32.mrb[19].mxu0  ;;  %v4033_v2 = vpop.f32.mrb[19].mxu1 }
 0x14b   :  { %3379 = vmatmul.mubr.bf16.gmra.mrb[124].mxu0 %v6923_v59  ;;  %4243 = vmatmul.mubr.bf16.gmra.mrb[124].mxu1 %v6924_v60 }
 0x14c   :  { %3386 = vmatprep.mubr.bf16.mxu0 %v6926_v63  ;;  %4250 = vmatprep.mubr.bf16.mxu1 %v6928_v0  ;;  %v6948_v63 = vld [vmem:[#allocation2 + $0x348] ss:$12 sps:$4 sm:$0xff]  }
 0x14d   :  { %v6949_v0 = vld [vmem:[#allocation2 + $0xd68] ss:$12 sps:$4 sm:$0xff]  }
 0x14e   :  { %v7509_v3 = vpop.f32.mrb[20].mxu0  ;;  %v7511_v4 = vpop.f32.mrb[20].mxu1 }
 0x14f   :  { %9429 = vst [vmem:[#allocation15_spill] sm:$0xff] %v7511_v4  ;;  %v3174_v5 = vpop.f32.mrb[21].mxu0  ;;  %v4038_v6 = vpop.f32.mrb[21].mxu1  ;;  %v7012_v4 = vld [vmem:[#allocation2 + $0x248] ss:$12 sps:$4 sm:$0xff]  }
 0x150   :  { %v7513_v11 = vpop.f32.mrb[22].mxu0  ;;  %v7515_v12 = vpop.f32.mrb[22].mxu1  ;;  %v6950_v5 = vld [vmem:[#allocation2 + $0x364] ss:$12 sps:$4 sm:$0xff]   ;;  %v6952_v6 = vld [vmem:[#allocation2 + $0x8] ss:$12 sps:$4 sm:$0xff]  }
 0x151   :  { %9430 = vst [vmem:[#allocation16_spill] sm:$0xff] %v7515_v12  ;;  %v3177_v17 = vpop.f32.mrb[23].mxu0  ;;  %v4041_v18 = vpop.f32.mrb[23].mxu1  ;;  %v7007_v12 = vld [vmem:[#allocation2 + $0x218] ss:$12 sps:$4 sm:$0xff]  }
 0x153   :  { %3387 = vmatmul.mubr.bf16.gmra.mrb[128].mxu0 %v6930_v9  ;;  %4251 = vmatmul.mubr.bf16.gmra.mrb[128].mxu1 %v6931_v10 }
 0x154   :  { %3394 = vmatprep.mubr.bf16.mxu0 %v6932_v15  ;;  %4258 = vmatprep.mubr.bf16.mxu1 %v6934_v16 }
 0x156   :  { %v7517_v21 = vpop.f32.mrb[24].mxu0  ;;  %v7519_v22 = vpop.f32.mrb[24].mxu1 }
 0x157   :  { %9431 = vst [vmem:[#allocation17_spill] sm:$0xff] %v7519_v22  ;;  %v3182_v23 = vpop.f32.mrb[25].mxu0  ;;  %v4046_v24 = vpop.f32.mrb[25].mxu1 }
 0x158   :  { %v7521_v29 = vpop.f32.mrb[26].mxu0  ;;  %v7523_v30 = vpop.f32.mrb[26].mxu1  ;;  %v6953_v23 = vld [vmem:[#allocation2 + $0x360] ss:$12 sps:$4 sm:$0xff]  }
 0x159   :  { %9432 = vst [vmem:[#allocation18_spill] sm:$0xff] %v7523_v30  ;;  %v3185_v35 = vpop.f32.mrb[27].mxu0  ;;  %v4049_v36 = vpop.f32.mrb[27].mxu1  ;;  %v6954_v24 = vld [vmem:[#allocation2 + $0x20] ss:$12 sps:$4 sm:$0xff]  }
 0x15b   :  { %3395 = vmatmul.mubr.bf16.gmra.mrb[132].mxu0 %v6936_v27  ;;  %4259 = vmatmul.mubr.bf16.gmra.mrb[132].mxu1 %v6937_v28 }
 0x15c   :  { %3402 = vmatprep.mubr.bf16.mxu0 %v6938_v33  ;;  %4266 = vmatprep.mubr.bf16.mxu1 %v6940_v34  ;;  %v6955_v33 = vld [vmem:[#allocation2 + $0x37c] ss:$12 sps:$4 sm:$0xff]   ;;  %v6957_v34 = vld [vmem:[#allocation2 + $0x38] ss:$12 sps:$4 sm:$0xff]  }
 0x15e   :  { %v7525_v39 = vpop.f32.mrb[28].mxu0  ;;  %v7527_v40 = vpop.f32.mrb[28].mxu1 }
 0x15f   :  { %9433 = vst [vmem:[#allocation19_spill] sm:$0xff] %v7527_v40  ;;  %v3190_v41 = vpop.f32.mrb[29].mxu0  ;;  %v4054_v42 = vpop.f32.mrb[29].mxu1  ;;  %v7002_v40 = vld [vmem:[#allocation2 + $0x1e8] ss:$12 sps:$4 sm:$0xff]  }
 0x160   :  { %v7529_v47 = vpop.f32.mrb[30].mxu0  ;;  %v7531_v48 = vpop.f32.mrb[30].mxu1 }
 0x161   :  { %9434 = vst [vmem:[#allocation20_spill] sm:$0xff] %v7531_v48  ;;  %v3193_v53 = vpop.f32.mrb[31].mxu0  ;;  %v4057_v54 = vpop.f32.mrb[31].mxu1  ;;  %v6997_v48 = vld [vmem:[#allocation2 + $0x1b8] ss:$12 sps:$4 sm:$0xff]  }
 0x163   :  { %3403 = vmatmul.mubr.bf16.gmra.mrb[136].mxu0 %v6942_v45  ;;  %4267 = vmatmul.mubr.bf16.gmra.mrb[136].mxu1 %v6943_v46 }
 0x164   :  { %3410 = vmatprep.mubr.bf16.mxu0 %v6944_v51  ;;  %4274 = vmatprep.mubr.bf16.mxu1 %v6946_v52  ;;  %v6958_v51 = vld [vmem:[#allocation2 + $0x378] ss:$12 sps:$4 sm:$0xff]   ;;  %v6959_v52 = vld [vmem:[#allocation2 + $0x50] ss:$12 sps:$4 sm:$0xff]  }
 0x166   :  { %v7533_v57 = vpop.f32.mrb[32].mxu0  ;;  %v7535_v58 = vpop.f32.mrb[32].mxu1 }
 0x167   :  { %9435 = vst [vmem:[#allocation21_spill] sm:$0xff] %v7535_v58  ;;  %v3198_v59 = vpop.f32.mrb[33].mxu0  ;;  %v4062_v60 = vpop.f32.mrb[33].mxu1 }
 0x168   :  { %v7537_v1 = vpop.f32.mrb[34].mxu0  ;;  %v7539_v2 = vpop.f32.mrb[34].mxu1  ;;  %v6960_v59 = vld [vmem:[#allocation2 + $0x394] ss:$12 sps:$4 sm:$0xff]  }
 0x169   :  { %9436 = vst [vmem:[#allocation22_spill] sm:$0xff] %v7539_v2  ;;  %v3201_v9 = vpop.f32.mrb[35].mxu0  ;;  %v4065_v10 = vpop.f32.mrb[35].mxu1  ;;  %v6962_v60 = vld [vmem:[#allocation2 + $0x68] ss:$12 sps:$4 sm:$0xff]  }
 0x16b   :  { %3411 = vmatmul.mubr.bf16.gmra.mrb[140].mxu0 %v6948_v63  ;;  %4275 = vmatmul.mubr.bf16.gmra.mrb[140].mxu1 %v6949_v0 }
 0x16c   :  { %3418 = vmatprep.mubr.bf16.mxu0 %v6950_v5  ;;  %6386 = vmatprep.mubr.bf16.mxu1 %v6952_v6 }
 0x16e   :  { %v7541_v15 = vpop.f32.mrb[36].mxu0  ;;  %v7543_v16 = vpop.f32.mrb[36].mxu1 }
 0x16f   :  { %9437 = vst [vmem:[#allocation23_spill] sm:$0xff] %v7543_v16  ;;  %v3206_v17 = vpop.f32.mrb[37].mxu0  ;;  %v4070_v18 = vpop.f32.mrb[37].mxu1  ;;  %v6992_v16 = vld [vmem:[#allocation2 + $0x188] ss:$12 sps:$4 sm:$0xff]  }
 0x170   :  { %v7545_v27 = vpop.f32.mrb[38].mxu0  ;;  %v7547_v28 = vpop.f32.mrb[38].mxu1  ;;  %v6963_v17 = vld [vmem:[#allocation2 + $0x390] ss:$12 sps:$4 sm:$0xff]   ;;  %v6964_v18 = vld [vmem:[#allocation2 + $0x80] ss:$12 sps:$4 sm:$0xff]  }
 0x171   :  { %9438 = vst [vmem:[#allocation24_spill] sm:$0xff] %v7547_v28  ;;  %v3209_v35 = vpop.f32.mrb[39].mxu0  ;;  %v4073_v36 = vpop.f32.mrb[39].mxu1  ;;  %v6987_v28 = vld [vmem:[#allocation2 + $0x158] ss:$12 sps:$4 sm:$0xff]  }
 0x173   :  { %3419 = vmatmul.mubr.bf16.gmra.mrb[144].mxu0 %v6953_v23  ;;  %6387 = vmatmul.mubr.bf16.vlgmr.msra.gmra.mrb[144].mxu1 %v6954_v24 }
 0x174   :  { %3426 = vmatprep.mubr.bf16.mxu0 %v6955_v33  ;;  %6390 = vmatprep.mubr.bf16.mxu1 %v6957_v34  ;;  %v6965_v33 = vld [vmem:[#allocation2 + $0x3ac] ss:$12 sps:$4 sm:$0xff]  }
 0x175   :  { %v6967_v34 = vld [vmem:[#allocation2 + $0x98] ss:$12 sps:$4 sm:$0xff]  }
 0x176   :  { %v7549_v41 = vpop.f32.mrb[40].mxu0  ;;  %v7551_v42 = vpop.f32.mrb[40].mxu1 }
 0x177   :  { %9439 = vst [vmem:[#allocation25_spill] sm:$0xff] %v7551_v42  ;;  %v3214_v45 = vpop.f32.mrb[41].mxu0  ;;  %v4078_v46 = vpop.f32.mrb[41].mxu1 }
 0x178   :  { %v7553_v53 = vpop.f32.mrb[42].mxu0  ;;  %v7555_v54 = vpop.f32.mrb[42].mxu1 }
 0x179   :  { %9440 = vst [vmem:[#allocation26_spill] sm:$0xff] %v7555_v54  ;;  %v3217_v63 = vpop.f32.mrb[43].mxu0  ;;  %v4081_v0 = vpop.f32.mrb[43].mxu1 }
 0x17b   :  { %3427 = vmatmul.mubr.bf16.gmra.mrb[148].mxu0 %v6958_v51  ;;  %6391 = vmatmul.mubr.bf16.gmra.mrb[148].mxu1 %v6959_v52 }
 0x17c   :  { %3434 = vmatprep.mubr.bf16.mxu0 %v6960_v59  ;;  %6394 = vmatprep.mubr.bf16.mxu1 %v6962_v60  ;;  %v6968_v59 = vld [vmem:[#allocation2 + $0x3a8] ss:$12 sps:$4 sm:$0xff]   ;;  %v6969_v60 = vld [vmem:[#allocation2 + $0xb0] ss:$12 sps:$4 sm:$0xff]  }
 0x17e   :  { %v7557_v5 = vpop.f32.mrb[44].mxu0  ;;  %v7559_v6 = vpop.f32.mrb[44].mxu1 }
 0x17f   :  { %9441 = vst [vmem:[#allocation27_spill] sm:$0xff] %v7559_v6  ;;  %v3222_v9 = vpop.f32.mrb[45].mxu0  ;;  %v4086_v10 = vpop.f32.mrb[45].mxu1  ;;  %v6982_v6 = vld [vmem:[#allocation2 + $0x128] ss:$12 sps:$4 sm:$0xff]  }
 0x180   :  { %v7561_v23 = vpop.f32.mrb[46].mxu0  ;;  %v7563_v24 = vpop.f32.mrb[46].mxu1  ;;  %v6970_v9 = vld [vmem:[#allocation2 + $0x3c4] ss:$12 sps:$4 sm:$0xff]   ;;  %v6972_v10 = vld [vmem:[#allocation2 + $0xc8] ss:$12 sps:$4 sm:$0xff]  }
 0x181   :  { %9442 = vst [vmem:[#allocation28_spill] sm:$0xff] %v7563_v24  ;;  %v3225_v35 = vpop.f32.mrb[47].mxu0  ;;  %v4089_v36 = vpop.f32.mrb[47].mxu1  ;;  %v6977_v24 = vld [vmem:[#allocation2 + $0xf8] ss:$12 sps:$4 sm:$0xff]  }
 0x183   :  { %3435 = vmatmul.mubr.bf16.gmra.mrb[152].mxu0 %v6963_v17  ;;  %6395 = vmatmul.mubr.bf16.gmra.mrb[152].mxu1 %v6964_v18 }
 0x184   :  { %3442 = vmatprep.mubr.bf16.mxu0 %v6965_v33  ;;  %6398 = vmatprep.mubr.bf16.mxu1 %v6967_v34 }
 0x186   :  { %v7565_v45 = vpop.f32.mrb[48].mxu0  ;;  %v7567_v46 = vpop.f32.mrb[48].mxu1 }
 0x187   :  { %9443 = vst [vmem:[#allocation29_spill] sm:$0xff] %v7567_v46  ;;  %v3230_v51 = vpop.f32.mrb[49].mxu0  ;;  %v4094_v52 = vpop.f32.mrb[49].mxu1 }
 0x188   :  { %v7569_v63 = vpop.f32.mrb[50].mxu0  ;;  %v7571_v0 = vpop.f32.mrb[50].mxu1  ;;  %v6973_v51 = vld [vmem:[#allocation2 + $0x3c0] ss:$12 sps:$4 sm:$0xff]  }
 0x189   :  { %9444 = vst [vmem:[#allocation30_spill] sm:$0xff] %v7571_v0  ;;  %v3233_v35 = vpop.f32.mrb[51].mxu0  ;;  %v4097_v36 = vpop.f32.mrb[51].mxu1  ;;  %v6974_v52 = vld [vmem:[#allocation2 + $0xe0] ss:$12 sps:$4 sm:$0xff]  }
 0x18a   :  { %v6975_v0 = vld [vmem:[#allocation2 + $0x3dc] ss:$12 sps:$4 sm:$0xff]  }
 0x18b   :  { %3443 = vmatmul.mubr.bf16.gmra.mrb[156].mxu0 %v6968_v59  ;;  %6399 = vmatmul.mubr.bf16.gmra.mrb[156].mxu1 %v6969_v60 }
 0x18c   :  { %3450 = vmatprep.mubr.bf16.mxu0 %v6970_v9  ;;  %6402 = vmatprep.mubr.bf16.mxu1 %v6972_v10 }
 0x18e   :  { %v7573_v17 = vpop.f32.mrb[52].mxu0  ;;  %v7575_v18 = vpop.f32.mrb[52].mxu1 }
 0x18f   :  { %9445 = vst [vmem:[#allocation31_spill] sm:$0xff] %v7575_v18  ;;  %v3238_v33 = vpop.f32.mrb[53].mxu0  ;;  %v4102_v34 = vpop.f32.mrb[53].mxu1 }
 0x190   :  { %v7577_v46 = vpop.f32.mrb[54].mxu0  ;;  %v7579_v54 = vpop.f32.mrb[54].mxu1  ;;  %v6978_v33 = vld [vmem:[#allocation2 + $0x3d8] ss:$12 sps:$4 sm:$0xff]   ;;  %v6979_v34 = vld [vmem:[#allocation2 + $0x110] ss:$12 sps:$4 sm:$0xff]  }
 0x191   :  { %9446 = vst [vmem:[#allocation32_spill] sm:$0xff] %v7579_v54  ;;  %v3241_v35 = vpop.f32.mrb[55].mxu0  ;;  %v4105_v36 = vpop.f32.mrb[55].mxu1  ;;  %v6980_v54 = vld [vmem:[#allocation2 + $0x3f4] ss:$12 sps:$4 sm:$0xff]  }
 0x193   :  { %3451 = vmatmul.mubr.bf16.gmra.mrb[160].mxu0 %v6973_v51  ;;  %6403 = vmatmul.mubr.bf16.gmra.mrb[160].mxu1 %v6974_v52 }
 0x194   :  { %3458 = vmatprep.mubr.bf16.mxu0 %v6975_v0  ;;  %6406 = vmatprep.mubr.bf16.mxu1 %v6977_v24 }
 0x196   :  { %v7581_v59 = vpop.f32.mrb[56].mxu0  ;;  %v7583_v60 = vpop.f32.mrb[56].mxu1 }
 0x197   :  { %9447 = vst [vmem:[#allocation33_spill] sm:$0xff] %v7583_v60  ;;  %v3246_v9 = vpop.f32.mrb[57].mxu0  ;;  %v4110_v10 = vpop.f32.mrb[57].mxu1 }
 0x198   :  { %v7585_v18 = vpop.f32.mrb[58].mxu0  ;;  %v7587_v42 = vpop.f32.mrb[58].mxu1  ;;  %v6983_v9 = vld [vmem:[#allocation2 + $0x3f0] ss:$12 sps:$4 sm:$0xff]   ;;  %v6984_v10 = vld [vmem:[#allocation2 + $0x140] ss:$12 sps:$4 sm:$0xff]  }
 0x199   :  { %9448 = vst [vmem:[#allocation34_spill] sm:$0xff] %v7587_v42  ;;  %v3249_v35 = vpop.f32.mrb[59].mxu0  ;;  %v4113_v36 = vpop.f32.mrb[59].mxu1  ;;  %v6985_v42 = vld [vmem:[#allocation2 + $0x40c] ss:$12 sps:$4 sm:$0xff]  }
 0x19b   :  { %3459 = vmatmul.mubr.bf16.gmra.mrb[164].mxu0 %v6978_v33  ;;  %6407 = vmatmul.mubr.bf16.gmra.mrb[164].mxu1 %v6979_v34 }
 0x19c   :  { %3466 = vmatprep.mubr.bf16.mxu0 %v6980_v54  ;;  %6410 = vmatprep.mubr.bf16.mxu1 %v6982_v6 }
 0x19e   :  { %v7589_v24 = vpop.f32.mrb[60].mxu0  ;;  %v7591_v0 = vpop.f32.mrb[60].mxu1 }
 0x19f   :  { %9449 = vst [vmem:[#allocation35_spill] sm:$0xff] %v7591_v0  ;;  %v3254_v51 = vpop.f32.mrb[61].mxu0  ;;  %v4118_v52 = vpop.f32.mrb[61].mxu1 }
 0x1a0   :  { %v7593_v60 = vpop.f32.mrb[62].mxu0  ;;  %v7595_v2 = vpop.f32.mrb[62].mxu1  ;;  %v6988_v51 = vld [vmem:[#allocation2 + $0x408] ss:$12 sps:$4 sm:$0xff]   ;;  %v6989_v52 = vld [vmem:[#allocation2 + $0x170] ss:$12 sps:$4 sm:$0xff]  }
 0x1a1   :  { %9450 = vst [vmem:[#allocation36_spill] sm:$0xff] %v7595_v2  ;;  %v3257_v35 = vpop.f32.mrb[63].mxu0  ;;  %v4121_v36 = vpop.f32.mrb[63].mxu1  ;;  %v6990_v2 = vld [vmem:[#allocation2 + $0x424] ss:$12 sps:$4 sm:$0xff]  }
 0x1a3   :  { %3467 = vmatmul.mubr.bf16.gmra.mrb[168].mxu0 %v6983_v9  ;;  %6411 = vmatmul.mubr.bf16.gmra.mrb[168].mxu1 %v6984_v10 }
 0x1a4   :  { %3474 = vmatprep.mubr.bf16.mxu0 %v6985_v42  ;;  %6414 = vmatprep.mubr.bf16.mxu1 %v6987_v28 }
 0x1a6   :  { %v7597_v54 = vpop.f32.mrb[64].mxu0  ;;  %v7599_v6 = vpop.f32.mrb[64].mxu1 }
 0x1a7   :  { %9451 = vst [vmem:[#allocation37_spill] sm:$0xff] %v7599_v6  ;;  %v3262_v33 = vpop.f32.mrb[65].mxu0  ;;  %v4126_v34 = vpop.f32.mrb[65].mxu1 }
 0x1a8   :  { %v7601_v0 = vpop.f32.mrb[66].mxu0  ;;  %v7603_v58 = vpop.f32.mrb[66].mxu1  ;;  %v6993_v33 = vld [vmem:[#allocation2 + $0x420] ss:$12 sps:$4 sm:$0xff]  }
 0x1a9   :  { %9452 = vst [vmem:[#allocation38_spill] sm:$0xff] %v7603_v58  ;;  %v3265_v35 = vpop.f32.mrb[67].mxu0  ;;  %v4129_v36 = vpop.f32.mrb[67].mxu1  ;;  %v6994_v34 = vld [vmem:[#allocation2 + $0x1a0] ss:$12 sps:$4 sm:$0xff]  }
 0x1aa   :  { %v6995_v58 = vld [vmem:[#allocation2 + $0x43c] ss:$12 sps:$4 sm:$0xff]  }
 0x1ab   :  { %3475 = vmatmul.mubr.bf16.gmra.mrb[172].mxu0 %v6988_v51  ;;  %6415 = vmatmul.mubr.bf16.gmra.mrb[172].mxu1 %v6989_v52 }
 0x1ac   :  { %3482 = vmatprep.mubr.bf16.mxu0 %v6990_v2  ;;  %6418 = vmatprep.mubr.bf16.mxu1 %v6992_v16 }
 0x1ae   :  { %v7605_v28 = vpop.f32.mrb[68].mxu0  ;;  %v7607_v42 = vpop.f32.mrb[68].mxu1 }
 0x1af   :  { %9453 = vst [vmem:[#allocation39_spill] sm:$0xff] %v7607_v42  ;;  %v3270_v9 = vpop.f32.mrb[69].mxu0  ;;  %v4134_v10 = vpop.f32.mrb[69].mxu1 }
 0x1b0   :  { %v7609_v6 = vpop.f32.mrb[70].mxu0  ;;  %v7611_v30 = vpop.f32.mrb[70].mxu1  ;;  %v6998_v9 = vld [vmem:[#allocation2 + $0x438] ss:$12 sps:$4 sm:$0xff]   ;;  %v6999_v10 = vld [vmem:[#allocation2 + $0x1d0] ss:$12 sps:$4 sm:$0xff]  }
 0x1b1   :  { %9454 = vst [vmem:[#allocation40_spill] sm:$0xff] %v7611_v30  ;;  %v3273_v35 = vpop.f32.mrb[71].mxu0  ;;  %v4137_v36 = vpop.f32.mrb[71].mxu1  ;;  %v7000_v30 = vld [vmem:[#allocation2 + $0x454] ss:$12 sps:$4 sm:$0xff]  }
 0x1b3   :  { %3483 = vmatmul.mubr.bf16.gmra.mrb[176].mxu0 %v6993_v33  ;;  %6419 = vmatmul.mubr.bf16.gmra.mrb[176].mxu1 %v6994_v34 }
 0x1b4   :  { %3490 = vmatprep.mubr.bf16.mxu0 %v6995_v58  ;;  %6422 = vmatprep.mubr.bf16.mxu1 %v6997_v48 }
 0x1b6   :  { %v7613_v2 = vpop.f32.mrb[72].mxu0  ;;  %v7615_v16 = vpop.f32.mrb[72].mxu1 }
 0x1b7   :  { %9455 = vst [vmem:[#allocation41_spill] sm:$0xff] %v7615_v16  ;;  %v3278_v51 = vpop.f32.mrb[73].mxu0  ;;  %v4142_v52 = vpop.f32.mrb[73].mxu1 }
 0x1b8   :  { %v7617_v42 = vpop.f32.mrb[74].mxu0  ;;  %v7619_v22 = vpop.f32.mrb[74].mxu1  ;;  %v7003_v51 = vld [vmem:[#allocation2 + $0x450] ss:$12 sps:$4 sm:$0xff]   ;;  %v7004_v52 = vld [vmem:[#allocation2 + $0x200] ss:$12 sps:$4 sm:$0xff]  }
 0x1b9   :  { %9456 = vst [vmem:[#allocation42_spill] sm:$0xff] %v7619_v22  ;;  %v3281_v35 = vpop.f32.mrb[75].mxu0  ;;  %v4145_v36 = vpop.f32.mrb[75].mxu1  ;;  %v7005_v22 = vld [vmem:[#allocation2 + $0x46c] ss:$12 sps:$4 sm:$0xff]  }
 0x1bb   :  { %3491 = vmatmul.mubr.bf16.gmra.mrb[180].mxu0 %v6998_v9  ;;  %6423 = vmatmul.mubr.bf16.gmra.mrb[180].mxu1 %v6999_v10 }
 0x1bc   :  { %3498 = vmatprep.mubr.bf16.mxu0 %v7000_v30  ;;  %6426 = vmatprep.mubr.bf16.mxu1 %v7002_v40 }
 0x1be   :  { %v7621_v48 = vpop.f32.mrb[76].mxu0  ;;  %v7623_v58 = vpop.f32.mrb[76].mxu1 }
 0x1bf   :  { %9457 = vst [vmem:[#allocation43_spill] sm:$0xff] %v7623_v58  ;;  %v3286_v33 = vpop.f32.mrb[77].mxu0  ;;  %v4150_v34 = vpop.f32.mrb[77].mxu1 }
 0x1c0   :  { %v7625_v16 = vpop.f32.mrb[78].mxu0  ;;  %v7627_v62 = vpop.f32.mrb[78].mxu1  ;;  %v7008_v33 = vld [vmem:[#allocation2 + $0x468] ss:$12 sps:$4 sm:$0xff]   ;;  %v7009_v34 = vld [vmem:[#allocation2 + $0x230] ss:$12 sps:$4 sm:$0xff]  }
 0x1c1   :  { %9458 = vst [vmem:[#allocation44_spill] sm:$0xff] %v7627_v62  ;;  %v3289_v35 = vpop.f32.mrb[79].mxu0  ;;  %v4153_v36 = vpop.f32.mrb[79].mxu1  ;;  %v7010_v62 = vld [vmem:[#allocation2 + $0x484] ss:$12 sps:$4 sm:$0xff]  }
 0x1c3   :  { %3499 = vmatmul.mubr.bf16.gmra.mrb[184].mxu0 %v7003_v51  ;;  %6427 = vmatmul.mubr.bf16.gmra.mrb[184].mxu1 %v7004_v52 }
 0x1c4   :  { %3506 = vmatprep.mubr.bf16.mxu0 %v7005_v22  ;;  %6430 = vmatprep.mubr.bf16.mxu1 %v7007_v12 }
 0x1c6   :  { %v7629_v30 = vpop.f32.mrb[80].mxu0  ;;  %v7631_v40 = vpop.f32.mrb[80].mxu1 }
 0x1c7   :  { %9459 = vst [vmem:[#allocation45_spill] sm:$0xff] %v7631_v40  ;;  %v3294_v9 = vpop.f32.mrb[81].mxu0  ;;  %v4158_v10 = vpop.f32.mrb[81].mxu1 }
 0x1c8   :  { %v7633_v58 = vpop.f32.mrb[82].mxu0  ;;  %v7635_v56 = vpop.f32.mrb[82].mxu1  ;;  %v7013_v9 = vld [vmem:[#allocation2 + $0x480] ss:$12 sps:$4 sm:$0xff]  }
 0x1c9   :  { %9460 = vst [vmem:[#allocation46_spill] sm:$0xff] %v7635_v56  ;;  %v3297_v35 = vpop.f32.mrb[83].mxu0  ;;  %v4161_v36 = vpop.f32.mrb[83].mxu1  ;;  %v7014_v10 = vld [vmem:[#allocation2 + $0x260] ss:$12 sps:$4 sm:$0xff]  }
 0x1ca   :  { %v7015_v56 = vld [vmem:[#allocation2 + $0x49c] ss:$12 sps:$4 sm:$0xff]  }
 0x1cb   :  { %3507 = vmatmul.mubr.bf16.gmra.mrb[188].mxu0 %v7008_v33  ;;  %6431 = vmatmul.mubr.bf16.gmra.mrb[188].mxu1 %v7009_v34 }
 0x1cc   :  { %3514 = vmatprep.mubr.bf16.mxu0 %v7010_v62  ;;  %6434 = vmatprep.mubr.bf16.mxu1 %v7012_v4 }
 0x1ce   :  { %v7637_v12 = vpop.f32.mrb[84].mxu0  ;;  %v7639_v22 = vpop.f32.mrb[84].mxu1 }
 0x1cf   :  { %9461 = vst [vmem:[#allocation47_spill] sm:$0xff] %v7639_v22  ;;  %v3302_v51 = vpop.f32.mrb[85].mxu0  ;;  %v4166_v52 = vpop.f32.mrb[85].mxu1 }
 0x1d0   :  { %v7641_v40 = vpop.f32.mrb[86].mxu0  ;;  %v7643_v38 = vpop.f32.mrb[86].mxu1  ;;  %v7018_v51 = vld [vmem:[#allocation2 + $0x498] ss:$12 sps:$4 sm:$0xff]   ;;  %v7019_v52 = vld [vmem:[#allocation2 + $0x290] ss:$12 sps:$4 sm:$0xff]  }
 0x1d1   :  { %9462 = vst [vmem:[#allocation48_spill] sm:$0xff] %v7643_v38  ;;  %v3305_v35 = vpop.f32.mrb[87].mxu0  ;;  %v4169_v36 = vpop.f32.mrb[87].mxu1  ;;  %v7020_v38 = vld [vmem:[#allocation2 + $0x4b4] ss:$12 sps:$4 sm:$0xff]  }
 0x1d3   :  { %3515 = vmatmul.mubr.bf16.gmra.mrb[192].mxu0 %v7013_v9  ;;  %6435 = vmatmul.mubr.bf16.gmra.mrb[192].mxu1 %v7014_v10 }
 0x1d4   :  { %3522 = vmatprep.mubr.bf16.mxu0 %v7015_v56  ;;  %6438 = vmatprep.mubr.bf16.mxu1 %v7017_v50 }
 0x1d6   :  { %v7645_v62 = vpop.f32.mrb[88].mxu0  ;;  %v7647_v4 = vpop.f32.mrb[88].mxu1 }
 0x1d7   :  { %9463 = vst [vmem:[#allocation49_spill] sm:$0xff] %v7647_v4  ;;  %v3310_v33 = vpop.f32.mrb[89].mxu0  ;;  %v4174_v34 = vpop.f32.mrb[89].mxu1 }
 0x1d8   :  { %v7649_v22 = vpop.f32.mrb[90].mxu0  ;;  %v7651_v32 = vpop.f32.mrb[90].mxu1  ;;  %v7023_v33 = vld [vmem:[#allocation2 + $0x4b0] ss:$12 sps:$4 sm:$0xff]   ;;  %v7024_v34 = vld [vmem:[#allocation2 + $0x2c0] ss:$12 sps:$4 sm:$0xff]  }
 0x1d9   :  { %9464 = vst [vmem:[#allocation50_spill] sm:$0xff] %v7651_v32  ;;  %v3313_v35 = vpop.f32.mrb[91].mxu0  ;;  %v4177_v36 = vpop.f32.mrb[91].mxu1  ;;  %v7025_v32 = vld [vmem:[#allocation2 + $0x4cc] ss:$12 sps:$4 sm:$0xff]  }
 0x1db   :  { %3523 = vmatmul.mubr.bf16.gmra.mrb[196].mxu0 %v7018_v51  ;;  %6439 = vmatmul.mubr.bf16.gmra.mrb[196].mxu1 %v7019_v52 }
 0x1dc   :  { %3530 = vmatprep.mubr.bf16.mxu0 %v7020_v38  ;;  %6442 = vmatprep.mubr.bf16.mxu1 %v7022_v44 }
 0x1de   :  { %v7653_v50 = vpop.f32.mrb[92].mxu0  ;;  %v7655_v56 = vpop.f32.mrb[92].mxu1 }
 0x1df   :  { %9465 = vst [vmem:[#allocation51_spill] sm:$0xff] %v7655_v56  ;;  %v3318_v9 = vpop.f32.mrb[93].mxu0  ;;  %v4182_v10 = vpop.f32.mrb[93].mxu1 }
 0x1e0   :  { %v7657_v4 = vpop.f32.mrb[94].mxu0  ;;  %v7659_v14 = vpop.f32.mrb[94].mxu1  ;;  %v7028_v9 = vld [vmem:[#allocation2 + $0x4c8] ss:$12 sps:$4 sm:$0xff]   ;;  %v7029_v10 = vld [vmem:[#allocation2 + $0x2f0] ss:$12 sps:$4 sm:$0xff]  }
 0x1e1   :  { %9466 = vst [vmem:[#allocation52_spill] sm:$0xff] %v7659_v14  ;;  %v3321_v35 = vpop.f32.mrb[95].mxu0  ;;  %v4185_v36 = vpop.f32.mrb[95].mxu1  ;;  %v7030_v14 = vld [vmem:[#allocation2 + $0x4e4] ss:$12 sps:$4 sm:$0xff]  }
 0x1e3   :  { %3531 = vmatmul.mubr.bf16.gmra.mrb[200].mxu0 %v7023_v33  ;;  %6443 = vmatmul.mubr.bf16.gmra.mrb[200].mxu1 %v7024_v34 }
 0x1e4   :  { %3538 = vmatprep.mubr.bf16.mxu0 %v7025_v32  ;;  %6446 = vmatprep.mubr.bf16.mxu1 %v7027_v26 }
 0x1e6   :  { %v7661_v38 = vpop.f32.mrb[96].mxu0  ;;  %v7663_v44 = vpop.f32.mrb[96].mxu1 }
 0x1e7   :  { %9467 = vst [vmem:[#allocation53_spill] sm:$0xff] %v7661_v38  ;;  %9468 = vst [vmem:[#allocation54_spill] sm:$0xff] %v7663_v44  ;;  %v3326_v51 = vpop.f32.mrb[97].mxu0  ;;  %v4190_v52 = vpop.f32.mrb[97].mxu1  ;;  %v7037_v38 = vld [vmem:[#allocation2 + $0x338] ss:$12 sps:$4 sm:$0xff]  }
 0x1e8   :  { %v7665_v56 = vpop.f32.mrb[98].mxu0  ;;  %v7667_v8 = vpop.f32.mrb[98].mxu1  ;;  %v7033_v51 = vld [vmem:[#allocation2 + $0x4e0] ss:$12 sps:$4 sm:$0xff]  }
 0x1e9   :  { %9469 = vst [vmem:[#allocation55_spill] sm:$0xff] %v7665_v56  ;;  %9470 = vst [vmem:[#allocation56_spill] sm:$0xff] %v7667_v8  ;;  %v3329_v35 = vpop.f32.mrb[99].mxu0  ;;  %v4193_v36 = vpop.f32.mrb[99].mxu1  ;;  %v7034_v52 = vld [vmem:[#allocation2 + $0x320] ss:$12 sps:$4 sm:$0xff]  }
 0x1ea   :  { %v7035_v8 = vld [vmem:[#allocation2 + $0x4fc] ss:$12 sps:$4 sm:$0xff]  }
 0x1eb   :  { %3539 = vmatmul.mubr.bf16.gmra.mrb[204].mxu0 %v7028_v9  ;;  %6447 = vmatmul.mubr.bf16.gmra.mrb[204].mxu1 %v7029_v10 }
 0x1ec   :  { %3546 = vmatprep.mubr.bf16.mxu0 %v7030_v14  ;;  %6450 = vmatprep.mubr.bf16.mxu1 %v7032_v20 }
 0x1ee   :  { %v7669_v26 = vpop.f32.mrb[100].mxu0  ;;  %v7671_v32 = vpop.f32.mrb[100].mxu1 }
 0x1ef   :  { %9471 = vst [vmem:[#allocation57_spill] sm:$0xff] %v7669_v26  ;;  %9472 = vst [vmem:[#allocation58_spill] sm:$0xff] %v7671_v32  ;;  %v3334_v33 = vpop.f32.mrb[101].mxu0  ;;  %v4198_v34 = vpop.f32.mrb[101].mxu1  ;;  %v7042_v26 = vld [vmem:[#allocation2 + $0x368] ss:$12 sps:$4 sm:$0xff]  }
 0x1f0   :  { %v7673_v44 = vpop.f32.mrb[102].mxu0  ;;  %v7675_v56 = vpop.f32.mrb[102].mxu1  ;;  %v7038_v33 = vld [vmem:[#allocation2 + $0x4f8] ss:$12 sps:$4 sm:$0xff]   ;;  %v7039_v34 = vld [vmem:[#allocation2 + $0x350] ss:$12 sps:$4 sm:$0xff]  }
 0x1f1   :  { %9473 = vst [vmem:[#allocation59_spill] sm:$0xff] %v7673_v44  ;;  %9474 = vst [vmem:[#allocation60_spill] sm:$0xff] %v7675_v56  ;;  %v3337_v35 = vpop.f32.mrb[103].mxu0  ;;  %v4201_v36 = vpop.f32.mrb[103].mxu1  ;;  %v7040_v56 = vld [vmem:[#allocation2 + $0x514] ss:$12 sps:$4 sm:$0xff]  }
 0x1f3   :  { %3547 = vmatmul.mubr.bf16.gmra.mrb[208].mxu0 %v7033_v51  ;;  %6451 = vmatmul.mubr.bf16.gmra.mrb[208].mxu1 %v7034_v52 }
 0x1f4   :  { %3554 = vmatprep.mubr.bf16.mxu0 %v7035_v8  ;;  %6454 = vmatprep.mubr.bf16.mxu1 %v7037_v38 }
 0x1f6   :  { %v7677_v14 = vpop.f32.mrb[104].mxu0  ;;  %v7679_v20 = vpop.f32.mrb[104].mxu1 }
 0x1f7   :  { %9475 = vst [vmem:[#allocation61_spill] sm:$0xff] %v7677_v14  ;;  %9476 = vst [vmem:[#allocation62_spill] sm:$0xff] %v7679_v20  ;;  %v3342_v9 = vpop.f32.mrb[105].mxu0  ;;  %v4206_v10 = vpop.f32.mrb[105].mxu1  ;;  %v7047_v14 = vld [vmem:[#allocation2 + $0x398] ss:$12 sps:$4 sm:$0xff]  }
 0x1f8   :  { %v7681_v32 = vpop.f32.mrb[106].mxu0  ;;  %v7683_v44 = vpop.f32.mrb[106].mxu1  ;;  %v7043_v9 = vld [vmem:[#allocation2 + $0x510] ss:$12 sps:$4 sm:$0xff]   ;;  %v7044_v10 = vld [vmem:[#allocation2 + $0x380] ss:$12 sps:$4 sm:$0xff]  }
 0x1f9   :  { %9477 = vst [vmem:[#allocation63_spill] sm:$0xff] %v7681_v32  ;;  %9478 = vst [vmem:[#allocation64_spill] sm:$0xff] %v7683_v44  ;;  %v3345_v35 = vpop.f32.mrb[107].mxu0  ;;  %v4209_v36 = vpop.f32.mrb[107].mxu1  ;;  %v7045_v44 = vld [vmem:[#allocation2 + $0x52c] ss:$12 sps:$4 sm:$0xff]  }
 0x1fb   :  { %3555 = vmatmul.mubr.bf16.gmra.mrb[212].mxu0 %v7038_v33  ;;  %6455 = vmatmul.mubr.bf16.gmra.mrb[212].mxu1 %v7039_v34 }
 0x1fc   :  { %3562 = vmatprep.mubr.bf16.mxu0 %v7040_v56  ;;  %6458 = vmatprep.mubr.bf16.mxu1 %v7042_v26 }
 0x1fe   :  { %v7685_v8 = vpop.f32.mrb[108].mxu0  ;;  %v7687_v38 = vpop.f32.mrb[108].mxu1 }
 0x1ff   :  { %9479 = vst [vmem:[#allocation65_spill] sm:$0xff] %v7685_v8  ;;  %9480 = vst [vmem:[#allocation66_spill] sm:$0xff] %v7687_v38  ;;  %v3350_v51 = vpop.f32.mrb[109].mxu0  ;;  %v4214_v52 = vpop.f32.mrb[109].mxu1  ;;  %v7052_v8 = vld [vmem:[#allocation2 + $0x3c8] ss:$12 sps:$4 sm:$0xff]  }
 0x200   :  { %v7689_v20 = vpop.f32.mrb[110].mxu0  ;;  %v7691_v32 = vpop.f32.mrb[110].mxu1  ;;  %v7048_v51 = vld [vmem:[#allocation2 + $0x528] ss:$12 sps:$4 sm:$0xff]   ;;  %v7049_v52 = vld [vmem:[#allocation2 + $0x3b0] ss:$12 sps:$4 sm:$0xff]  }
 0x201   :  { %9481 = vst [vmem:[#allocation67_spill] sm:$0xff] %v7689_v20  ;;  %9482 = vst [vmem:[#allocation68_spill] sm:$0xff] %v7691_v32  ;;  %v3353_v35 = vpop.f32.mrb[111].mxu0  ;;  %v4217_v36 = vpop.f32.mrb[111].mxu1  ;;  %v7050_v32 = vld [vmem:[#allocation2 + $0x544] ss:$12 sps:$4 sm:$0xff]  }
 0x203   :  { %3563 = vmatmul.mubr.bf16.gmra.mrb[216].mxu0 %v7043_v9  ;;  %6459 = vmatmul.mubr.bf16.gmra.mrb[216].mxu1 %v7044_v10 }
 0x204   :  { %3570 = vmatprep.mubr.bf16.mxu0 %v7045_v44  ;;  %6462 = vmatprep.mubr.bf16.mxu1 %v7047_v14 }
 0x206   :  { %v7693_v56 = vpop.f32.mrb[112].mxu0  ;;  %v7695_v26 = vpop.f32.mrb[112].mxu1 }
 0x207   :  { %9483 = vst [vmem:[#allocation69_spill] sm:$0xff] %v7693_v56  ;;  %9484 = vst [vmem:[#allocation70_spill] sm:$0xff] %v7695_v26  ;;  %v3358_v33 = vpop.f32.mrb[113].mxu0  ;;  %v4222_v34 = vpop.f32.mrb[113].mxu1  ;;  %v7057_v56 = vld [vmem:[#allocation2 + $0x3f8] ss:$12 sps:$4 sm:$0xff]  }
 0x208   :  { %v7697_v38 = vpop.f32.mrb[114].mxu0  ;;  %v7699_v20 = vpop.f32.mrb[114].mxu1  ;;  %v7053_v33 = vld [vmem:[#allocation2 + $0x540] ss:$12 sps:$4 sm:$0xff]  }
 0x209   :  { %9485 = vst [vmem:[#allocation71_spill] sm:$0xff] %v7697_v38  ;;  %9486 = vst [vmem:[#allocation72_spill] sm:$0xff] %v7699_v20  ;;  %v3361_v35 = vpop.f32.mrb[115].mxu0  ;;  %v4225_v36 = vpop.f32.mrb[115].mxu1  ;;  %v7054_v34 = vld [vmem:[#allocation2 + $0x3e0] ss:$12 sps:$4 sm:$0xff]  }
 0x20a   :  { %v7055_v20 = vld [vmem:[#allocation2 + $0x55c] ss:$12 sps:$4 sm:$0xff]  }
 0x20b   :  { %3571 = vmatmul.mubr.bf16.gmra.mrb[220].mxu0 %v7048_v51  ;;  %6463 = vmatmul.mubr.bf16.gmra.mrb[220].mxu1 %v7049_v52 }
 0x20c   :  { %3578 = vmatprep.mubr.bf16.mxu0 %v7050_v32  ;;  %6466 = vmatprep.mubr.bf16.mxu1 %v7052_v8 }
 0x20e   :  { %v7701_v44 = vpop.f32.mrb[116].mxu0  ;;  %v7703_v14 = vpop.f32.mrb[116].mxu1 }
 0x20f   :  { %9487 = vst [vmem:[#allocation73_spill] sm:$0xff] %v7701_v44  ;;  %9488 = vst [vmem:[#allocation74_spill] sm:$0xff] %v7703_v14  ;;  %v3366_v9 = vpop.f32.mrb[117].mxu0  ;;  %v4230_v10 = vpop.f32.mrb[117].mxu1  ;;  %v7062_v44 = vld [vmem:[#allocation2 + $0x428] ss:$12 sps:$4 sm:$0xff]  }
 0x210   :  { %v7705_v26 = vpop.f32.mrb[118].mxu0  ;;  %v7707_v38 = vpop.f32.mrb[118].mxu1  ;;  %v7058_v9 = vld [vmem:[#allocation2 + $0x558] ss:$12 sps:$4 sm:$0xff]   ;;  %v7059_v10 = vld [vmem:[#allocation2 + $0x410] ss:$12 sps:$4 sm:$0xff]  }
 0x211   :  { %9489 = vst [vmem:[#allocation75_spill] sm:$0xff] %v7705_v26  ;;  %9490 = vst [vmem:[#allocation76_spill] sm:$0xff] %v7707_v38  ;;  %v3369_v35 = vpop.f32.mrb[119].mxu0  ;;  %v4233_v36 = vpop.f32.mrb[119].mxu1  ;;  %v7060_v38 = vld [vmem:[#allocation2 + $0x574] ss:$12 sps:$4 sm:$0xff]  }
 0x213   :  { %3579 = vmatmul.mubr.bf16.gmra.mrb[224].mxu0 %v7053_v33  ;;  %6467 = vmatmul.mubr.bf16.gmra.mrb[224].mxu1 %v7054_v34 }
 0x214   :  { %3586 = vmatprep.mubr.bf16.mxu0 %v7055_v20  ;;  %6470 = vmatprep.mubr.bf16.mxu1 %v7057_v56 }
 0x216   :  { %v7709_v32 = vpop.f32.mrb[120].mxu0  ;;  %v7711_v8 = vpop.f32.mrb[120].mxu1 }
 0x217   :  { %9491 = vst [vmem:[#allocation77_spill] sm:$0xff] %v7709_v32  ;;  %9492 = vst [vmem:[#allocation78_spill] sm:$0xff] %v7711_v8  ;;  %v3374_v51 = vpop.f32.mrb[121].mxu0  ;;  %v4238_v52 = vpop.f32.mrb[121].mxu1  ;;  %v7067_v32 = vld [vmem:[#allocation2 + $0x458] ss:$12 sps:$4 sm:$0xff]  }
 0x218   :  { %v7713_v14 = vpop.f32.mrb[122].mxu0  ;;  %v7715_v26 = vpop.f32.mrb[122].mxu1  ;;  %v7063_v51 = vld [vmem:[#allocation2 + $0x570] ss:$12 sps:$4 sm:$0xff]   ;;  %v7064_v52 = vld [vmem:[#allocation2 + $0x440] ss:$12 sps:$4 sm:$0xff]  }
 0x219   :  { %9493 = vst [vmem:[#allocation79_spill] sm:$0xff] %v7713_v14  ;;  %9494 = vst [vmem:[#allocation80_spill] sm:$0xff] %v7715_v26  ;;  %v3377_v35 = vpop.f32.mrb[123].mxu0  ;;  %v4241_v36 = vpop.f32.mrb[123].mxu1  ;;  %v7065_v26 = vld [vmem:[#allocation2 + $0x58c] ss:$12 sps:$4 sm:$0xff]  }
 0x21b   :  { %3587 = vmatmul.mubr.bf16.gmra.mrb[228].mxu0 %v7058_v9  ;;  %6471 = vmatmul.mubr.bf16.gmra.mrb[228].mxu1 %v7059_v10 }
 0x21c   :  { %3594 = vmatprep.mubr.bf16.mxu0 %v7060_v38  ;;  %6474 = vmatprep.mubr.bf16.mxu1 %v7062_v44 }
 0x21e   :  { %v7717_v20 = vpop.f32.mrb[124].mxu0  ;;  %v7719_v56 = vpop.f32.mrb[124].mxu1 }
 0x21f   :  { %9495 = vst [vmem:[#allocation81_spill] sm:$0xff] %v7717_v20  ;;  %9496 = vst [vmem:[#allocation82_spill] sm:$0xff] %v7719_v56  ;;  %v3382_v33 = vpop.f32.mrb[125].mxu0  ;;  %v4246_v34 = vpop.f32.mrb[125].mxu1  ;;  %v7072_v20 = vld [vmem:[#allocation2 + $0x488] ss:$12 sps:$4 sm:$0xff]  }
 0x220   :  { %v7721_v8 = vpop.f32.mrb[126].mxu0  ;;  %v7723_v14 = vpop.f32.mrb[126].mxu1  ;;  %v7068_v33 = vld [vmem:[#allocation2 + $0x588] ss:$12 sps:$4 sm:$0xff]   ;;  %v7069_v34 = vld [vmem:[#allocation2 + $0x470] ss:$12 sps:$4 sm:$0xff]  }
 0x221   :  { %9497 = vst [vmem:[#allocation83_spill] sm:$0xff] %v7721_v8  ;;  %9498 = vst [vmem:[#allocation84_spill] sm:$0xff] %v7723_v14  ;;  %v3385_v35 = vpop.f32.mrb[127].mxu0  ;;  %v4249_v36 = vpop.f32.mrb[127].mxu1  ;;  %v7070_v14 = vld [vmem:[#allocation2 + $0x5a4] ss:$12 sps:$4 sm:$0xff]  }
 0x223   :  { %3595 = vmatmul.mubr.bf16.gmra.mrb[232].mxu0 %v7063_v51  ;;  %6475 = vmatmul.mubr.bf16.gmra.mrb[232].mxu1 %v7064_v52 }
 0x224   :  { %3602 = vmatprep.mubr.bf16.mxu0 %v7065_v26  ;;  %6478 = vmatprep.mubr.bf16.mxu1 %v7067_v32 }
 0x226   :  { %v7725_v38 = vpop.f32.mrb[128].mxu0  ;;  %v7727_v44 = vpop.f32.mrb[128].mxu1 }
 0x227   :  { %9499 = vst [vmem:[#allocation85_spill] sm:$0xff] %v7725_v38  ;;  %9500 = vst [vmem:[#allocation86_spill] sm:$0xff] %v7727_v44  ;;  %v3390_v9 = vpop.f32.mrb[129].mxu0  ;;  %v4254_v10 = vpop.f32.mrb[129].mxu1  ;;  %v7077_v38 = vld [vmem:[#allocation2 + $0x4b8] ss:$12 sps:$4 sm:$0xff]  }
 0x228   :  { %v7729_v56 = vpop.f32.mrb[130].mxu0  ;;  %v7731_v8 = vpop.f32.mrb[130].mxu1  ;;  %v7073_v9 = vld [vmem:[#allocation2 + $0x5a0] ss:$12 sps:$4 sm:$0xff]  }
 0x229   :  { %9501 = vst [vmem:[#allocation87_spill] sm:$0xff] %v7729_v56  ;;  %9502 = vst [vmem:[#allocation88_spill] sm:$0xff] %v7731_v8  ;;  %v3393_v35 = vpop.f32.mrb[131].mxu0  ;;  %v4257_v36 = vpop.f32.mrb[131].mxu1  ;;  %v7074_v10 = vld [vmem:[#allocation2 + $0x4a0] ss:$12 sps:$4 sm:$0xff]  }
 0x22a   :  { %v7075_v8 = vld [vmem:[#allocation2 + $0x5bc] ss:$12 sps:$4 sm:$0xff]  }
 0x22b   :  { %3603 = vmatmul.mubr.bf16.gmra.mrb[236].mxu0 %v7068_v33  ;;  %6479 = vmatmul.mubr.bf16.gmra.mrb[236].mxu1 %v7069_v34 }
 0x22c   :  { %3610 = vmatprep.mubr.bf16.mxu0 %v7070_v14  ;;  %6482 = vmatprep.mubr.bf16.mxu1 %v7072_v20 }
 0x22e   :  { %v7733_v26 = vpop.f32.mrb[132].mxu0  ;;  %v7735_v32 = vpop.f32.mrb[132].mxu1 }
 0x22f   :  { %9503 = vst [vmem:[#allocation89_spill] sm:$0xff] %v7733_v26  ;;  %9504 = vst [vmem:[#allocation90_spill] sm:$0xff] %v7735_v32  ;;  %v3398_v51 = vpop.f32.mrb[133].mxu0  ;;  %v4262_v52 = vpop.f32.mrb[133].mxu1  ;;  %v7082_v26 = vld [vmem:[#allocation2 + $0x4e8] ss:$12 sps:$4 sm:$0xff]  }
 0x230   :  { %v7737_v44 = vpop.f32.mrb[134].mxu0  ;;  %v7739_v56 = vpop.f32.mrb[134].mxu1  ;;  %v7078_v51 = vld [vmem:[#allocation2 + $0x5b8] ss:$12 sps:$4 sm:$0xff]   ;;  %v7079_v52 = vld [vmem:[#allocation2 + $0x4d0] ss:$12 sps:$4 sm:$0xff]  }
 0x231   :  { %9505 = vst [vmem:[#allocation91_spill] sm:$0xff] %v7737_v44  ;;  %9506 = vst [vmem:[#allocation92_spill] sm:$0xff] %v7739_v56  ;;  %v3401_v35 = vpop.f32.mrb[135].mxu0  ;;  %v4265_v36 = vpop.f32.mrb[135].mxu1  ;;  %v7080_v56 = vld [vmem:[#allocation2 + $0x5d4] ss:$12 sps:$4 sm:$0xff]  }
 0x233   :  { %3611 = vmatmul.mubr.bf16.gmra.mrb[240].mxu0 %v7073_v9  ;;  %6483 = vmatmul.mubr.bf16.gmra.mrb[240].mxu1 %v7074_v10 }
 0x234   :  { %3618 = vmatprep.mubr.bf16.mxu0 %v7075_v8  ;;  %6486 = vmatprep.mubr.bf16.mxu1 %v7077_v38 }
 0x236   :  { %v7741_v14 = vpop.f32.mrb[136].mxu0  ;;  %v7743_v20 = vpop.f32.mrb[136].mxu1 }
 0x237   :  { %9507 = vst [vmem:[#allocation93_spill] sm:$0xff] %v7741_v14  ;;  %9508 = vst [vmem:[#allocation94_spill] sm:$0xff] %v7743_v20  ;;  %v3406_v33 = vpop.f32.mrb[137].mxu0  ;;  %v4270_v34 = vpop.f32.mrb[137].mxu1  ;;  %v7087_v14 = vld [vmem:[#allocation2 + $0x518] ss:$12 sps:$4 sm:$0xff]  }
 0x238   :  { %v7745_v32 = vpop.f32.mrb[138].mxu0  ;;  %v7747_v44 = vpop.f32.mrb[138].mxu1  ;;  %v7083_v33 = vld [vmem:[#allocation2 + $0x5d0] ss:$12 sps:$4 sm:$0xff]   ;;  %v7084_v34 = vld [vmem:[#allocation2 + $0x500] ss:$12 sps:$4 sm:$0xff]  }
 0x239   :  { %9509 = vst [vmem:[#allocation95_spill] sm:$0xff] %v7745_v32  ;;  %9510 = vst [vmem:[#allocation96_spill] sm:$0xff] %v7747_v44  ;;  %v3409_v35 = vpop.f32.mrb[139].mxu0  ;;  %v4273_v36 = vpop.f32.mrb[139].mxu1  ;;  %v7085_v44 = vld [vmem:[#allocation2 + $0x5ec] ss:$12 sps:$4 sm:$0xff]  }
 0x23b   :  { %3619 = vmatmul.mubr.bf16.gmra.mrb[244].mxu0 %v7078_v51  ;;  %6487 = vmatmul.mubr.bf16.gmra.mrb[244].mxu1 %v7079_v52 }
 0x23c   :  { %3626 = vmatprep.mubr.bf16.mxu0 %v7080_v56  ;;  %6490 = vmatprep.mubr.bf16.mxu1 %v7082_v26 }
 0x23e   :  { %v7749_v8 = vpop.f32.mrb[140].mxu0  ;;  %v7751_v38 = vpop.f32.mrb[140].mxu1 }
 0x23f   :  { %9511 = vst [vmem:[#allocation97_spill] sm:$0xff] %v7751_v38  ;;  %v3414_v9 = vpop.f32.mrb[141].mxu0  ;;  %v4278_v10 = vpop.f32.mrb[141].mxu1  ;;  %v7089_v38 = vld [vmem:[#allocation2 + $0x530] ss:$12 sps:$4 sm:$0xff]  }
 0x240   :  { %v7753_v20 = vpop.f32.mrb[142].mxu0  ;;  %v7755_v32 = vpop.f32.mrb[142].mxu1  ;;  %v7088_v10 = vld [vmem:[#allocation2 + $0x5e8] ss:$12 sps:$4 sm:$0xff]  }
 0x241   :  { %9512 = vst [vmem:[#allocation98_spill] sm:$0xff] %v7753_v20  ;;  %9513 = vst [vmem:[#allocation99_spill] sm:$0xff] %v7755_v32  ;;  %v3417_v35 = vpop.f32.mrb[143].mxu0  ;;  %v4281_v36 = vpop.f32.mrb[143].mxu1 }
 0x242   :  { %v7092_v36 = vld [vmem:[#allocation2 + $0x604] ss:$12 sps:$4 sm:$0xff]  }
 0x243   :  { %3627 = vmatmul.mubr.bf16.gmra.mrb[248].mxu0 %v7083_v33  ;;  %6491 = vmatmul.mubr.bf16.gmra.mrb[248].mxu1 %v7084_v34  ;;  %v7093_v33 = vld [vmem:[#allocation2 + $0x548] ss:$12 sps:$4 sm:$0xff]  }
 0x244   :  { %3634 = vmatprep.mubr.bf16.mxu0 %v7085_v44  ;;  %6494 = vmatprep.mubr.bf16.mxu1 %v7087_v14 }
 0x246   :  { %v7757_v56 = vpop.f32.mrb[144].mxu0  ;;  %v6388_v26 = vpop.f32.mrb[144].mxu1 }
 0x247   :  { %v4326_v51 = vadd.f32 %v6388_v26, %v7477_v19  ;;  %v3422_v52 = vpop.f32.mrb[145].mxu0  ;;  %v4317_v9 = vpop.f32.mrb[145].mxu1 }
 0x248   :  { %v4318_v32 = vadd.f32 %v4317_v9, %v7469_v7  ;;  %v7761_v20 = vpop.f32.mrb[146].mxu0  ;;  %v6389_v35 = vpop.f32.mrb[146].mxu1  ;;  %v7094_v52 = vld [vmem:[#allocation2 + $0x560] ss:$12 sps:$4 sm:$0xff]  }
 0x249   :  { %5471 = vst.msk [vmem:[%s9418_s2 + $0x10] sm:$0xff] %vm5468_vm0, %v4326_v51  ;;  %v4329_v44 = vadd.f32 %v6389_v35, %v7481_v25  ;;  %v3425_v14 = vpop.f32.mrb[147].mxu0  ;;  %v4320_v19 = vpop.f32.mrb[147].mxu1  ;;  %v7090_v51 = vld [vmem:[#allocation2 + $0x600] ss:$12 sps:$4 sm:$0xff]  }
 0x24a   :  { %5469 = vst.msk [vmem:[%s9418_s2] sm:$0xff] %vm5468_vm0, %v4318_v32  ;;  %v4321_v7 = vadd.f32 %v4320_v19, %v7473_v13  ;;  %v7097_v35 = vld [vmem:[#allocation2 + $0x61c] ss:$12 sps:$4 sm:$0xff]  }
 0x24b   :  { %5472 = vst.msk [vmem:[%s9418_s2 + $0x18] sm:$0xff] %vm5468_vm0, %v4329_v44  ;;  %3635 = vmatmul.mubr.bf16.gmra.mrb[252].mxu0 %v7088_v10  ;;  %6495 = vmatmul.mubr.bf16.gmra.mrb[252].mxu1 %v7089_v38  ;;  %v7098_v44 = vld [vmem:[#allocation2 + $0x578] ss:$12 sps:$4 sm:$0xff]  }
 0x24c   :  { %5470 = vst.msk [vmem:[%s9418_s2 + $0x8] sm:$0xff] %vm5468_vm0, %v4321_v7  ;;  %3642 = vmatprep.mubr.bf16.mxu0 %v7092_v36  ;;  %6498 = vmatprep.mubr.bf16.mxu1 %v7093_v33 }
 0x24e   :  { %v7781_v25 = vpop.f32.mrb[148].mxu0  ;;  %v6392_v34 = vpop.f32.mrb[148].mxu1 }
 0x24f   :  { %v4342_v32 = vadd.f32 %v6392_v34, %v7493_v43  ;;  %v3430_v13 = vpop.f32.mrb[149].mxu0  ;;  %v4333_v26 = vpop.f32.mrb[149].mxu1  ;;  %v7095_v34 = vld [vmem:[#allocation2 + $0x618] ss:$12 sps:$4 sm:$0xff]  }
 0x250   :  { %v4334_v9 = vadd.f32 %v4333_v26, %v7485_v31  ;;  %v7785_v10 = vpop.f32.mrb[150].mxu0  ;;  %v6393_v38 = vpop.f32.mrb[150].mxu1 }
 0x251   :  { %5475 = vst.msk [vmem:[%s9418_s2 + $0x30] sm:$0xff] %vm5468_vm0, %v4342_v32  ;;  %v4345_v36 = vadd.f32 %v6393_v38, %v7497_v49  ;;  %v3433_v33 = vpop.f32.mrb[151].mxu0  ;;  %v4336_v43 = vpop.f32.mrb[151].mxu1  ;;  %v7099_v32 = vld [vmem:[#allocation2 + $0x590] ss:$12 sps:$4 sm:$0xff]  }
 0x252   :  { %5473 = vst.msk [vmem:[%s9418_s2 + $0x20] sm:$0xff] %vm5468_vm0, %v4334_v9  ;;  %v4337_v31 = vadd.f32 %v4336_v43, %v7489_v37  ;;  %v7103_v9 = vld [vmem:[#allocation2 + $0x5a8] ss:$12 sps:$4 sm:$0xff]   ;;  %v7100_v43 = vld [vmem:[#allocation2 + $0x630] ss:$12 sps:$4 sm:$0xff]  }
 0x253   :  { %5476 = vst.msk [vmem:[%s9418_s2 + $0x38] sm:$0xff] %vm5468_vm0, %v4345_v36  ;;  %3643 = vmatmul.mubr.bf16.gmra.mrb[0].mxu0 %v7090_v51  ;;  %6499 = vmatmul.mubr.bf16.gmra.mrb[0].mxu1 %v7094_v52  ;;  %v7102_v52 = vld [vmem:[#allocation2 + $0x634] ss:$12 sps:$4 sm:$0xff]  }
 0x254   :  { %5474 = vst.msk [vmem:[%s9418_s2 + $0x28] sm:$0xff] %vm5468_vm0, %v4337_v31  ;;  %3650 = vmatprep.mubr.bf16.mxu0 %v7097_v35  ;;  %6502 = vmatprep.mubr.bf16.mxu1 %v7098_v44  ;;  %v7104_v31 = vld [vmem:[#allocation2 + $0x5c0] ss:$12 sps:$4 sm:$0xff]  }
 0x256   :  { %v7805_v49 = vpop.f32.mrb[152].mxu0  ;;  %v6396_v14 = vpop.f32.mrb[152].mxu1 }
 0x257   :  { %v4358_v19 = vadd.f32 %v6396_v14, %v7509_v3  ;;  %v3438_v37 = vpop.f32.mrb[153].mxu0  ;;  %v4349_v7 = vpop.f32.mrb[153].mxu1 }
 0x258   :  { %v4350_v13 = vadd.f32 %v4349_v7, %v7501_v55  ;;  %v7809_v26 = vpop.f32.mrb[154].mxu0  ;;  %v6397_v51 = vpop.f32.mrb[154].mxu1  ;;  %v7107_v7 = vld [vmem:[#allocation2 + $0x64c] ss:$12 sps:$4 sm:$0xff]  }
 0x259   :  { %5479 = vst.msk [vmem:[%s9418_s2 + $0x50] sm:$0xff] %vm5468_vm0, %v4358_v19  ;;  %v4361_v38 = vadd.f32 %v6397_v51, %v7513_v11  ;;  %v3441_v35 = vpop.f32.mrb[155].mxu0  ;;  %v4352_v3 = vpop.f32.mrb[155].mxu1 }
 0x25a   :  { %5477 = vst.msk [vmem:[%s9418_s2 + $0x40] sm:$0xff] %vm5468_vm0, %v4350_v13  ;;  %v4353_v55 = vadd.f32 %v4352_v3, %v7505_v61  ;;  %v7109_v35 = vld [vmem:[#allocation2 + $0x5f0] ss:$12 sps:$4 sm:$0xff]  }
 0x25b   :  { %5480 = vst.msk [vmem:[%s9418_s2 + $0x58] sm:$0xff] %vm5468_vm0, %v4361_v38  ;;  %3651 = vmatmul.mubr.bf16.gmra.mrb[4].mxu0 %v7095_v34  ;;  %6503 = vmatmul.mubr.bf16.gmra.mrb[4].mxu1 %v7099_v32  ;;  %v7108_v34 = vld [vmem:[#allocation2 + $0x5d8] ss:$12 sps:$4 sm:$0xff]   ;;  %v7105_v38 = vld [vmem:[#allocation2 + $0x648] ss:$12 sps:$4 sm:$0xff]  }
 0x25c   :  { %5478 = vst.msk [vmem:[%s9418_s2 + $0x48] sm:$0xff] %vm5468_vm0, %v4353_v55  ;;  %3658 = vmatprep.mubr.bf16.mxu0 %v7102_v52  ;;  %6506 = vmatprep.mubr.bf16.mxu1 %v7103_v9 }
 0x25e   :  { %v7829_v11 = vpop.f32.mrb[156].mxu0  ;;  %v6400_v44 = vpop.f32.mrb[156].mxu1 }
 0x25f   :  { %v4374_v36 = vadd.f32 %v6400_v44, %v7525_v39  ;;  %v3446_v61 = vpop.f32.mrb[157].mxu0  ;;  %v4365_v33 = vpop.f32.mrb[157].mxu1 }
 0x260   :  { %v4366_v14 = vadd.f32 %v4365_v33, %v7517_v21  ;;  %v7833_v19 = vpop.f32.mrb[158].mxu0  ;;  %v6401_v37 = vpop.f32.mrb[158].mxu1  ;;  %v7113_v61 = vld [vmem:[#allocation2 + $0x608] ss:$12 sps:$4 sm:$0xff]  }
 0x261   :  { %5483 = vst.msk [vmem:[%s9418_s2 + $0x70] sm:$0xff] %vm5468_vm0, %v4374_v36  ;;  %v4377_v32 = vadd.f32 %v6401_v37, %v7529_v47  ;;  %v3449_v13 = vpop.f32.mrb[159].mxu0  ;;  %v4368_v39 = vpop.f32.mrb[159].mxu1  ;;  %v7112_v36 = vld [vmem:[#allocation2 + $0x664] ss:$12 sps:$4 sm:$0xff]  }
 0x262   :  { %5481 = vst.msk [vmem:[%s9418_s2 + $0x60] sm:$0xff] %vm5468_vm0, %v4366_v14  ;;  %v4369_v21 = vadd.f32 %v4368_v39, %v7521_v29 }
 0x263   :  { %5484 = vst.msk [vmem:[%s9418_s2 + $0x78] sm:$0xff] %vm5468_vm0, %v4377_v32  ;;  %3659 = vmatmul.mubr.bf16.gmra.mrb[8].mxu0 %v7100_v43  ;;  %6507 = vmatmul.mubr.bf16.gmra.mrb[8].mxu1 %v7104_v31 }
 0x264   :  { %5482 = vst.msk [vmem:[%s9418_s2 + $0x68] sm:$0xff] %vm5468_vm0, %v4369_v21  ;;  %3666 = vmatprep.mubr.bf16.mxu0 %v7107_v7  ;;  %6510 = vmatprep.mubr.bf16.mxu1 %v7108_v34  ;;  %v7110_v7 = vld [vmem:[#allocation2 + $0x660] ss:$12 sps:$4 sm:$0xff]   ;;  %v7117_v21 = vld [vmem:[#allocation2 + $0x67c] ss:$12 sps:$4 sm:$0xff]  }
 0x265   :  { %v7114_v34 = vld [vmem:[#allocation2 + $0x620] ss:$12 sps:$4 sm:$0xff]  }
 0x266   :  { %v7853_v47 = vpop.f32.mrb[160].mxu0  ;;  %v6404_v51 = vpop.f32.mrb[160].mxu1 }
 0x267   :  { %v4390_v52 = vadd.f32 %v6404_v51, %v7541_v15  ;;  %v3454_v29 = vpop.f32.mrb[161].mxu0  ;;  %v4381_v9 = vpop.f32.mrb[161].mxu1  ;;  %v7118_v51 = vld [vmem:[#allocation2 + $0x638] ss:$12 sps:$4 sm:$0xff]  }
 0x268   :  { %v4382_v3 = vadd.f32 %v4381_v9, %v7533_v57  ;;  %v7857_v55 = vpop.f32.mrb[162].mxu0  ;;  %v6405_v44 = vpop.f32.mrb[162].mxu1 }
 0x269   :  { %5487 = vst.msk [vmem:[%s9418_s2 + $0x90] sm:$0xff] %vm5468_vm0, %v4390_v52  ;;  %v4393_v33 = vadd.f32 %v6405_v44, %v7545_v27  ;;  %v3457_v43 = vpop.f32.mrb[163].mxu0  ;;  %v4384_v15 = vpop.f32.mrb[163].mxu1  ;;  %v7119_v44 = vld [vmem:[#allocation2 + $0x650] ss:$12 sps:$4 sm:$0xff]  }
 0x26a   :  { %5485 = vst.msk [vmem:[%s9418_s2 + $0x80] sm:$0xff] %vm5468_vm0, %v4382_v3  ;;  %v4385_v57 = vadd.f32 %v4384_v15, %v7537_v1  ;;  %v7115_v3 = vld [vmem:[#allocation2 + $0x678] ss:$12 sps:$4 sm:$0xff]   ;;  %v7122_v43 = vld [vmem:[#allocation2 + $0x694] ss:$12 sps:$4 sm:$0xff]  }
 0x26b   :  { %5488 = vst.msk [vmem:[%s9418_s2 + $0x98] sm:$0xff] %vm5468_vm0, %v4393_v33  ;;  %3667 = vmatmul.mubr.bf16.gmra.mrb[12].mxu0 %v7105_v38  ;;  %6511 = vmatmul.mubr.bf16.gmra.mrb[12].mxu1 %v7109_v35  ;;  %v7123_v15 = vld [vmem:[#allocation2 + $0x668] ss:$12 sps:$4 sm:$0xff]  }
 0x26c   :  { %5486 = vst.msk [vmem:[%s9418_s2 + $0x88] sm:$0xff] %vm5468_vm0, %v4385_v57  ;;  %3674 = vmatprep.mubr.bf16.mxu0 %v7112_v36  ;;  %6514 = vmatprep.mubr.bf16.mxu1 %v7113_v61 }
 0x26e   :  { %v7877_v27 = vpop.f32.mrb[164].mxu0  ;;  %v6408_v31 = vpop.f32.mrb[164].mxu1 }
 0x26f   :  { %v4406_v14 = vadd.f32 %v6408_v31, %v7557_v5  ;;  %v3462_v1 = vpop.f32.mrb[165].mxu0  ;;  %v4397_v37 = vpop.f32.mrb[165].mxu1 }
 0x270   :  { %v4398_v32 = vadd.f32 %v4397_v37, %v7549_v41  ;;  %v7881_v13 = vpop.f32.mrb[166].mxu0  ;;  %v6409_v39 = vpop.f32.mrb[166].mxu1 }
 0x271   :  { %5491 = vst.msk [vmem:[%s9418_s2 + $0xb0] sm:$0xff] %vm5468_vm0, %v4406_v14  ;;  %v4409_v52 = vadd.f32 %v6409_v39, %v7561_v23  ;;  %v3465_v29 = vpop.f32.mrb[167].mxu0  ;;  %v4400_v5 = vpop.f32.mrb[167].mxu1 }
 0x272   :  { %5489 = vst.msk [vmem:[%s9418_s2 + $0xa0] sm:$0xff] %vm5468_vm0, %v4398_v32  ;;  %v4401_v41 = vadd.f32 %v4400_v5, %v7553_v53 }
 0x273   :  { %5492 = vst.msk [vmem:[%s9418_s2 + $0xb8] sm:$0xff] %vm5468_vm0, %v4409_v52  ;;  %3675 = vmatmul.mubr.bf16.gmra.mrb[16].mxu0 %v7110_v7  ;;  %6515 = vmatmul.mubr.bf16.gmra.mrb[16].mxu1 %v7114_v34  ;;  %v7120_v7 = vld [vmem:[#allocation2 + $0x690] ss:$12 sps:$4 sm:$0xff]   ;;  %v7124_v34 = vld [vmem:[#allocation2 + $0x680] ss:$12 sps:$4 sm:$0xff]  }
 0x274   :  { %5490 = vst.msk [vmem:[%s9418_s2 + $0xa8] sm:$0xff] %vm5468_vm0, %v4401_v41  ;;  %3682 = vmatprep.mubr.bf16.mxu0 %v7117_v21  ;;  %6518 = vmatprep.mubr.bf16.mxu1 %v7118_v51  ;;  %v7127_v51 = vld [vmem:[#allocation2 + $0x6ac] ss:$12 sps:$4 sm:$0xff]  }
 0x275   :  { %v7128_v52 = vld [vmem:[#allocation2 + $0x698] ss:$12 sps:$4 sm:$0xff]  }
 0x276   :  { %v7901_v23 = vpop.f32.mrb[168].mxu0  ;;  %v6412_v9 = vpop.f32.mrb[168].mxu1 }
 0x277   :  { %v4422_v38 = vadd.f32 %v6412_v9, %v7573_v17  ;;  %v3470_v53 = vpop.f32.mrb[169].mxu0  ;;  %v4413_v35 = vpop.f32.mrb[169].mxu1 }
 0x278   :  { %v4414_v36 = vadd.f32 %v4413_v35, %v7565_v45  ;;  %v7905_v61 = vpop.f32.mrb[170].mxu0  ;;  %v6413_v33 = vpop.f32.mrb[170].mxu1  ;;  %v7125_v53 = vld [vmem:[#allocation2 + $0x6a8] ss:$12 sps:$4 sm:$0xff]   ;;  %v7129_v35 = vld [vmem:[#allocation2 + $0x6b0] ss:$12 sps:$4 sm:$0xff]  }
 0x279   :  { %5495 = vst.msk [vmem:[%s9418_s2 + $0xd0] sm:$0xff] %vm5468_vm0, %v4422_v38  ;;  %v4425_v57 = vadd.f32 %v6413_v33, %v7577_v46  ;;  %v3473_v31 = vpop.f32.mrb[171].mxu0  ;;  %v4416_v17 = vpop.f32.mrb[171].mxu1  ;;  %v7132_v33 = vld [vmem:[#allocation2 + $0x6c4] ss:$12 sps:$4 sm:$0xff]  }
 0x27a   :  { %5493 = vst.msk [vmem:[%s9418_s2 + $0xc0] sm:$0xff] %vm5468_vm0, %v4414_v36  ;;  %v4417_v45 = vadd.f32 %v4416_v17, %v7569_v63 }
 0x27b   :  { %5496 = vst.msk [vmem:[%s9418_s2 + $0xd8] sm:$0xff] %vm5468_vm0, %v4425_v57  ;;  %3683 = vmatmul.mubr.bf16.gmra.mrb[20].mxu0 %v7115_v3  ;;  %6519 = vmatmul.mubr.bf16.gmra.mrb[20].mxu1 %v7119_v44 }
 0x27c   :  { %5494 = vst.msk [vmem:[%s9418_s2 + $0xc8] sm:$0xff] %vm5468_vm0, %v4417_v45  ;;  %3690 = vmatprep.mubr.bf16.mxu0 %v7122_v43  ;;  %6522 = vmatprep.mubr.bf16.mxu1 %v7123_v15  ;;  %v7133_v43 = vld [vmem:[#allocation2 + $0x6c8] ss:$12 sps:$4 sm:$0xff]  }
 0x27e   :  { %v7925_v46 = vpop.f32.mrb[172].mxu0  ;;  %v6416_v14 = vpop.f32.mrb[172].mxu1 }
 0x27f   :  { %v4438_v1 = vadd.f32 %v6416_v14, %v7589_v24  ;;  %v3478_v63 = vpop.f32.mrb[173].mxu0  ;;  %v4429_v37 = vpop.f32.mrb[173].mxu1  ;;  %v7130_v14 = vld [vmem:[#allocation2 + $0x6c0] ss:$12 sps:$4 sm:$0xff]  }
 0x280   :  { %v4430_v32 = vadd.f32 %v4429_v37, %v7581_v59  ;;  %v7929_v39 = vpop.f32.mrb[174].mxu0  ;;  %v6417_v21 = vpop.f32.mrb[174].mxu1 }
 0x281   :  { %5499 = vst.msk [vmem:[%s9418_s2 + $0xf0] sm:$0xff] %vm5468_vm0, %v4438_v1  ;;  %v4441_v29 = vadd.f32 %v6417_v21, %v7593_v60  ;;  %v3481_v5 = vpop.f32.mrb[175].mxu0  ;;  %v4432_v24 = vpop.f32.mrb[175].mxu1  ;;  %v7134_v1 = vld [vmem:[#allocation2 + $0x6e0] ss:$12 sps:$4 sm:$0xff]  }
 0x282   :  { %5497 = vst.msk [vmem:[%s9418_s2 + $0xe0] sm:$0xff] %vm5468_vm0, %v4430_v32  ;;  %v4433_v59 = vadd.f32 %v4432_v24, %v7585_v18  ;;  %v7138_v32 = vld [vmem:[#allocation2 + $0x6f8] ss:$12 sps:$4 sm:$0xff]  }
 0x283   :  { %5500 = vst.msk [vmem:[%s9418_s2 + $0xf8] sm:$0xff] %vm5468_vm0, %v4441_v29  ;;  %3691 = vmatmul.mubr.bf16.gmra.mrb[24].mxu0 %v7120_v7  ;;  %6523 = vmatmul.mubr.bf16.gmra.mrb[24].mxu1 %v7124_v34  ;;  %v7137_v34 = vld [vmem:[#allocation2 + $0x6dc] ss:$12 sps:$4 sm:$0xff]   ;;  %v7135_v24 = vld [vmem:[#allocation2 + $0x6d8] ss:$12 sps:$4 sm:$0xff]  }
 0x284   :  { %5498 = vst.msk [vmem:[%s9418_s2 + $0xe8] sm:$0xff] %vm5468_vm0, %v4433_v59  ;;  %3698 = vmatprep.mubr.bf16.mxu0 %v7127_v51  ;;  %6526 = vmatprep.mubr.bf16.mxu1 %v7128_v52  ;;  %v7139_v59 = vld [vmem:[#allocation2 + $0x710] ss:$12 sps:$4 sm:$0xff]  }
 0x286   :  { %v7949_v60 = vpop.f32.mrb[176].mxu0  ;;  %v6420_v41 = vpop.f32.mrb[176].mxu1 }
 0x287   :  { %v4454_v9 = vadd.f32 %v6420_v41, %v7605_v28  ;;  %v3486_v18 = vpop.f32.mrb[177].mxu0  ;;  %v4445_v38 = vpop.f32.mrb[177].mxu1 }
 0x288   :  { %v4446_v3 = vadd.f32 %v4445_v38, %v7597_v54  ;;  %v7953_v44 = vpop.f32.mrb[178].mxu0  ;;  %v6421_v36 = vpop.f32.mrb[178].mxu1  ;;  %v7142_v38 = vld [vmem:[#allocation2 + $0x6f4] ss:$12 sps:$4 sm:$0xff]  }
 0x289   :  { %5503 = vst.msk [vmem:[%s9418_s2 + $0x110] sm:$0xff] %vm5468_vm0, %v4454_v9  ;;  %v4457_v15 = vadd.f32 %v6421_v36, %v7609_v6  ;;  %v3489_v57 = vpop.f32.mrb[179].mxu0  ;;  %v4448_v28 = vpop.f32.mrb[179].mxu1 }
 0x28a   :  { %5501 = vst.msk [vmem:[%s9418_s2 + $0x100] sm:$0xff] %vm5468_vm0, %v4446_v3  ;;  %v4449_v54 = vadd.f32 %v4448_v28, %v7601_v0  ;;  %v7144_v57 = vld [vmem:[#allocation2 + $0x740] ss:$12 sps:$4 sm:$0xff]  }
 0x28b   :  { %5504 = vst.msk [vmem:[%s9418_s2 + $0x118] sm:$0xff] %vm5468_vm0, %v4457_v15  ;;  %3699 = vmatmul.mubr.bf16.gmra.mrb[28].mxu0 %v7125_v53  ;;  %6527 = vmatmul.mubr.bf16.gmra.mrb[28].mxu1 %v7129_v35  ;;  %v7143_v53 = vld [vmem:[#allocation2 + $0x728] ss:$12 sps:$4 sm:$0xff]   ;;  %v7140_v15 = vld [vmem:[#allocation2 + $0x6f0] ss:$12 sps:$4 sm:$0xff]  }
 0x28c   :  { %5502 = vst.msk [vmem:[%s9418_s2 + $0x108] sm:$0xff] %vm5468_vm0, %v4449_v54  ;;  %3706 = vmatprep.mubr.bf16.mxu0 %v7132_v33  ;;  %6530 = vmatprep.mubr.bf16.mxu1 %v7133_v43 }
 0x28e   :  { %v7973_v6 = vpop.f32.mrb[180].mxu0  ;;  %v6424_v31 = vpop.f32.mrb[180].mxu1 }
 0x28f   :  { %v4470_v17 = vadd.f32 %v6424_v31, %v7621_v48  ;;  %v3494_v0 = vpop.f32.mrb[181].mxu0  ;;  %v4461_v45 = vpop.f32.mrb[181].mxu1 }
 0x290   :  { %v4462_v63 = vadd.f32 %v4461_v45, %v7613_v2  ;;  %v7977_v37 = vpop.f32.mrb[182].mxu0  ;;  %v6425_v7 = vpop.f32.mrb[182].mxu1  ;;  %v7148_v0 = vld [vmem:[#allocation2 + $0x758] ss:$12 sps:$4 sm:$0xff]  }
 0x291   :  { %5507 = vst.msk [vmem:[%s9418_s2 + $0x130] sm:$0xff] %vm5468_vm0, %v4470_v17  ;;  %v4473_v21 = vadd.f32 %v6425_v7, %v7625_v16  ;;  %v3497_v51 = vpop.f32.mrb[183].mxu0  ;;  %v4464_v48 = vpop.f32.mrb[183].mxu1  ;;  %v7147_v17 = vld [vmem:[#allocation2 + $0x70c] ss:$12 sps:$4 sm:$0xff]  }
 0x292   :  { %5505 = vst.msk [vmem:[%s9418_s2 + $0x120] sm:$0xff] %vm5468_vm0, %v4462_v63  ;;  %v4465_v2 = vadd.f32 %v4464_v48, %v7617_v42  ;;  %v9514_v63 = vld [vmem:[#allocation57_spill] sm:$0xff] }
 0x293   :  { %5508 = vst.msk [vmem:[%s9418_s2 + $0x138] sm:$0xff] %vm5468_vm0, %v4473_v21  ;;  %3707 = vmatmul.mubr.bf16.gmra.mrb[32].mxu0 %v7130_v14  ;;  %6531 = vmatmul.mubr.bf16.gmra.mrb[32].mxu1 %v7134_v1  ;;  %v7149_v21 = vld [vmem:[#allocation2 + $0x770] ss:$12 sps:$4 sm:$0xff]   ;;  %v9515_v51 = vld [vmem:[#allocation53_spill] sm:$0xff] }
 0x294   :  { %5506 = vst.msk [vmem:[%s9418_s2 + $0x128] sm:$0xff] %vm5468_vm0, %v4465_v2  ;;  %3714 = vmatprep.mubr.bf16.mxu0 %v7137_v34  ;;  %6534 = vmatprep.mubr.bf16.mxu1 %v7138_v32  ;;  %v7145_v32 = vld [vmem:[#allocation2 + $0x708] ss:$12 sps:$4 sm:$0xff]  }
 0x296   :  { %v7997_v16 = vpop.f32.mrb[184].mxu0  ;;  %v6428_v52 = vpop.f32.mrb[184].mxu1 }
 0x297   :  { %v4486_v29 = vadd.f32 %v6428_v52, %v7637_v12  ;;  %v3502_v42 = vpop.f32.mrb[185].mxu0  ;;  %v4477_v5 = vpop.f32.mrb[185].mxu1 }
 0x298   :  { %v4478_v41 = vadd.f32 %v4477_v5, %v7629_v30  ;;  %v8001_v9 = vpop.f32.mrb[186].mxu0  ;;  %v6429_v18 = vpop.f32.mrb[186].mxu1  ;;  %v7153_v42 = vld [vmem:[#allocation2 + $0x788] ss:$12 sps:$4 sm:$0xff]  }
 0x299   :  { %5511 = vst.msk [vmem:[%s9418_s2 + $0x150] sm:$0xff] %vm5468_vm0, %v4486_v29  ;;  %v4489_v35 = vadd.f32 %v6429_v18, %v7641_v40  ;;  %v3505_v3 = vpop.f32.mrb[187].mxu0  ;;  %v4480_v12 = vpop.f32.mrb[187].mxu1  ;;  %v7152_v29 = vld [vmem:[#allocation2 + $0x724] ss:$12 sps:$4 sm:$0xff]  }
 0x29a   :  { %5509 = vst.msk [vmem:[%s9418_s2 + $0x140] sm:$0xff] %vm5468_vm0, %v4478_v41  ;;  %v4481_v30 = vadd.f32 %v4480_v12, %v7633_v58  ;;  %v9516_v5 = vld [vmem:[#allocation59_spill] sm:$0xff]  ;;  %v9518_v3 = vld [vmem:[#allocation65_spill] sm:$0xff] }
 0x29b   :  { %5512 = vst.msk [vmem:[%s9418_s2 + $0x158] sm:$0xff] %vm5468_vm0, %v4489_v35  ;;  %3715 = vmatmul.mubr.bf16.gmra.mrb[36].mxu0 %v7135_v24  ;;  %6535 = vmatmul.mubr.bf16.gmra.mrb[36].mxu1 %v7139_v59  ;;  %v9517_v18 = vld [vmem:[#allocation55_spill] sm:$0xff] }
 0x29c   :  { %5510 = vst.msk [vmem:[%s9418_s2 + $0x148] sm:$0xff] %vm5468_vm0, %v4481_v30  ;;  %3722 = vmatprep.mubr.bf16.mxu0 %v7142_v38  ;;  %6538 = vmatprep.mubr.bf16.mxu1 %v7143_v53 }
 0x29e   :  { %v8021_v40 = vpop.f32.mrb[188].mxu0  ;;  %v6432_v36 = vpop.f32.mrb[188].mxu1 }
 0x29f   :  { %v4502_v33 = vadd.f32 %v6432_v36, %v7653_v50  ;;  %v3510_v58 = vpop.f32.mrb[189].mxu0  ;;  %v4493_v43 = vpop.f32.mrb[189].mxu1 }
 0x2a0   :  { %v4494_v28 = vadd.f32 %v4493_v43, %v7645_v62  ;;  %v8025_v54 = vpop.f32.mrb[190].mxu0  ;;  %v6433_v31 = vpop.f32.mrb[190].mxu1  ;;  %v7154_v58 = vld [vmem:[#allocation2 + $0x7a0] ss:$12 sps:$4 sm:$0xff]  }
 0x2a1   :  { %5515 = vst.msk [vmem:[%s9418_s2 + $0x170] sm:$0xff] %vm5468_vm0, %v4502_v33  ;;  %v4505_v45 = vadd.f32 %v6433_v31, %v7657_v4  ;;  %v3513_v14 = vpop.f32.mrb[191].mxu0  ;;  %v4496_v50 = vpop.f32.mrb[191].mxu1  ;;  %v7150_v33 = vld [vmem:[#allocation2 + $0x720] ss:$12 sps:$4 sm:$0xff]  }
 0x2a2   :  { %5513 = vst.msk [vmem:[%s9418_s2 + $0x160] sm:$0xff] %vm5468_vm0, %v4494_v28  ;;  %v4497_v62 = vadd.f32 %v4496_v50, %v7649_v22  ;;  %v9519_v43 = vld [vmem:[#allocation61_spill] sm:$0xff]  ;;  %v7157_v31 = vld [vmem:[#allocation2 + $0x73c] ss:$12 sps:$4 sm:$0xff]  }
 0x2a3   :  { %5516 = vst.msk [vmem:[%s9418_s2 + $0x178] sm:$0xff] %vm5468_vm0, %v4505_v45  ;;  %3723 = vmatmul.mubr.bf16.gmra.mrb[40].mxu0 %v7140_v15  ;;  %6539 = vmatmul.mubr.bf16.gmra.mrb[40].mxu1 %v7144_v57 }
 0x2a4   :  { %5514 = vst.msk [vmem:[%s9418_s2 + $0x168] sm:$0xff] %vm5468_vm0, %v4497_v62  ;;  %3730 = vmatprep.mubr.bf16.mxu0 %v7147_v17  ;;  %6542 = vmatprep.mubr.bf16.mxu1 %v7148_v0  ;;  %v7158_v17 = vld [vmem:[#allocation2 + $0x7b8] ss:$12 sps:$4 sm:$0xff]   ;;  %v9520_v0 = vld [vmem:[#allocation67_spill] sm:$0xff] }
 0x2a5   :  { %v9521_v62 = vld [vmem:[#allocation63_spill] sm:$0xff] }
 0x2a6   :  { %v8045_v4 = vpop.f32.mrb[192].mxu0  ;;  %v6436_v1 = vpop.f32.mrb[192].mxu1 }
 0x2a7   :  { %v4518_v7 = vadd.f32 %v6436_v1, %v9514_v63  ;;  %v3518_v22 = vpop.f32.mrb[193].mxu0  ;;  %v4509_v34 = vpop.f32.mrb[193].mxu1 }
 0x2a8   :  { %v4510_v48 = vadd.f32 %v4509_v34, %v9515_v51  ;;  %v8049_v2 = vpop.f32.mrb[194].mxu0  ;;  %v6437_v52 = vpop.f32.mrb[194].mxu1  ;;  %v9522_v22 = vld [vmem:[#allocation73_spill] sm:$0xff] }
 0x2a9   :  { %5519 = vst.msk [vmem:[%s9418_s2 + $0x190] sm:$0xff] %vm5468_vm0, %v4518_v7  ;;  %v4521_v24 = vadd.f32 %v6437_v52, %v9516_v5  ;;  %v3521_v59 = vpop.f32.mrb[195].mxu0  ;;  %v4512_v41 = vpop.f32.mrb[195].mxu1  ;;  %v7155_v51 = vld [vmem:[#allocation2 + $0x738] ss:$12 sps:$4 sm:$0xff]  }
 0x2aa   :  { %5517 = vst.msk [vmem:[%s9418_s2 + $0x180] sm:$0xff] %vm5468_vm0, %v4510_v48  ;;  %v4513_v38 = vadd.f32 %v4512_v41, %v9517_v18  ;;  %v7159_v48 = vld [vmem:[#allocation2 + $0x7d0] ss:$12 sps:$4 sm:$0xff]   ;;  %v9523_v52 = vld [vmem:[#allocation69_spill] sm:$0xff]  ;;  %v7163_v59 = vld [vmem:[#allocation2 + $0x7e8] ss:$12 sps:$4 sm:$0xff]  }
 0x2ab   :  { %5520 = vst.msk [vmem:[%s9418_s2 + $0x198] sm:$0xff] %vm5468_vm0, %v4521_v24  ;;  %3731 = vmatmul.mubr.bf16.gmra.mrb[44].mxu0 %v7145_v32  ;;  %6543 = vmatmul.mubr.bf16.gmra.mrb[44].mxu1 %v7149_v21  ;;  %v7162_v24 = vld [vmem:[#allocation2 + $0x754] ss:$12 sps:$4 sm:$0xff]  }
 0x2ac   :  { %5518 = vst.msk [vmem:[%s9418_s2 + $0x188] sm:$0xff] %vm5468_vm0, %v4513_v38  ;;  %3738 = vmatprep.mubr.bf16.mxu0 %v7152_v29  ;;  %6546 = vmatprep.mubr.bf16.mxu1 %v7153_v42  ;;  %v9524_v41 = vld [vmem:[#allocation75_spill] sm:$0xff] }
 0x2ae   :  { %v8069_v53 = vpop.f32.mrb[196].mxu0  ;;  %v6440_v35 = vpop.f32.mrb[196].mxu1 }
 0x2af   :  { %v4534_v12 = vadd.f32 %v6440_v35, %v9518_v3  ;;  %v3526_v30 = vpop.f32.mrb[197].mxu0  ;;  %v4525_v36 = vpop.f32.mrb[197].mxu1  ;;  %v9525_v3 = vld [vmem:[#allocation71_spill] sm:$0xff] }
 0x2b0   :  { %v4526_v15 = vadd.f32 %v4525_v36, %v9519_v43  ;;  %v8073_v57 = vpop.f32.mrb[198].mxu0  ;;  %v6441_v28 = vpop.f32.mrb[198].mxu1 }
 0x2b1   :  { %5523 = vst.msk [vmem:[%s9418_s2 + $0x1b0] sm:$0xff] %vm5468_vm0, %v4534_v12  ;;  %v4537_v45 = vadd.f32 %v6441_v28, %v9520_v0  ;;  %v3529_v14 = vpop.f32.mrb[199].mxu0  ;;  %v4528_v50 = vpop.f32.mrb[199].mxu1  ;;  %v7160_v28 = vld [vmem:[#allocation2 + $0x750] ss:$12 sps:$4 sm:$0xff]  }
 0x2b2   :  { %5521 = vst.msk [vmem:[%s9418_s2 + $0x1a0] sm:$0xff] %vm5468_vm0, %v4526_v15  ;;  %v4529_v1 = vadd.f32 %v4528_v50, %v9521_v62  ;;  %v7167_v50 = vld [vmem:[#allocation2 + $0x76c] ss:$12 sps:$4 sm:$0xff]  }
 0x2b3   :  { %5524 = vst.msk [vmem:[%s9418_s2 + $0x1b8] sm:$0xff] %vm5468_vm0, %v4537_v45  ;;  %3739 = vmatmul.mubr.bf16.gmra.mrb[48].mxu0 %v7150_v33  ;;  %6547 = vmatmul.mubr.bf16.gmra.mrb[48].mxu1 %v7154_v58  ;;  %v9526_v33 = vld [vmem:[#allocation81_spill] sm:$0xff] }
 0x2b4   :  { %5522 = vst.msk [vmem:[%s9418_s2 + $0x1a8] sm:$0xff] %vm5468_vm0, %v4529_v1  ;;  %3746 = vmatprep.mubr.bf16.mxu0 %v7157_v31  ;;  %6550 = vmatprep.mubr.bf16.mxu1 %v7158_v17  ;;  %v7164_v31 = vld [vmem:[#allocation2 + $0x800] ss:$12 sps:$4 sm:$0xff]   ;;  %v7168_v62 = vld [vmem:[#allocation2 + $0x818] ss:$12 sps:$4 sm:$0xff]   ;;  %v9528_v1 = vld [vmem:[#allocation83_spill] sm:$0xff] }
 0x2b5   :  { %v9527_v17 = vld [vmem:[#allocation77_spill] sm:$0xff] }
 0x2b6   :  { %v8093_v63 = vpop.f32.mrb[200].mxu0  ;;  %v6444_v7 = vpop.f32.mrb[200].mxu1 }
 0x2b7   :  { %v4550_v34 = vadd.f32 %v6444_v7, %v9522_v22  ;;  %v3534_v32 = vpop.f32.mrb[201].mxu0  ;;  %v4541_v21 = vpop.f32.mrb[201].mxu1 }
 0x2b8   :  { %v4542_v29 = vadd.f32 %v4541_v21, %v9523_v52  ;;  %v8097_v42 = vpop.f32.mrb[202].mxu0  ;;  %v6445_v5 = vpop.f32.mrb[202].mxu1  ;;  %v9529_v32 = vld [vmem:[#allocation79_spill] sm:$0xff]  ;;  %v9530_v52 = vld [vmem:[#allocation89_spill] sm:$0xff] }
 0x2b9   :  { %5527 = vst.msk [vmem:[%s9418_s2 + $0x1d0] sm:$0xff] %vm5468_vm0, %v4550_v34  ;;  %v4553_v18 = vadd.f32 %v6445_v5, %v9524_v41  ;;  %v3537_v38 = vpop.f32.mrb[203].mxu0  ;;  %v4544_v35 = vpop.f32.mrb[203].mxu1  ;;  %v7169_v41 = vld [vmem:[#allocation2 + $0x830] ss:$12 sps:$4 sm:$0xff]  }
 0x2ba   :  { %5525 = vst.msk [vmem:[%s9418_s2 + $0x1c0] sm:$0xff] %vm5468_vm0, %v4542_v29  ;;  %v4545_v12 = vadd.f32 %v4544_v35, %v9525_v3 }
 0x2bb   :  { %5528 = vst.msk [vmem:[%s9418_s2 + $0x1d8] sm:$0xff] %vm5468_vm0, %v4553_v18  ;;  %3747 = vmatmul.mubr.bf16.gmra.mrb[52].mxu0 %v7155_v51  ;;  %6551 = vmatmul.mubr.bf16.gmra.mrb[52].mxu1 %v7159_v48  ;;  %v9531_v18 = vld [vmem:[#allocation85_spill] sm:$0xff] }
 0x2bc   :  { %5526 = vst.msk [vmem:[%s9418_s2 + $0x1c8] sm:$0xff] %vm5468_vm0, %v4545_v12  ;;  %3754 = vmatprep.mubr.bf16.mxu0 %v7162_v24  ;;  %6554 = vmatprep.mubr.bf16.mxu1 %v7163_v59  ;;  %v7165_v59 = vld [vmem:[#allocation2 + $0x768] ss:$12 sps:$4 sm:$0xff]   ;;  %v7172_v12 = vld [vmem:[#allocation2 + $0x784] ss:$12 sps:$4 sm:$0xff]  }
 0x2be   :  { %v8117_v30 = vpop.f32.mrb[204].mxu0  ;;  %v6448_v36 = vpop.f32.mrb[204].mxu1 }
 0x2bf   :  { %v4566_v58 = vadd.f32 %v6448_v36, %v9526_v33  ;;  %v3542_v43 = vpop.f32.mrb[205].mxu0  ;;  %v4557_v15 = vpop.f32.mrb[205].mxu1  ;;  %v7173_v36 = vld [vmem:[#allocation2 + $0x848] ss:$12 sps:$4 sm:$0xff]  }
 0x2c0   :  { %v4558_v0 = vadd.f32 %v4557_v15, %v9527_v17  ;;  %v8121_v45 = vpop.f32.mrb[206].mxu0  ;;  %v6449_v14 = vpop.f32.mrb[206].mxu1  ;;  %v9532_v33 = vld [vmem:[#allocation91_spill] sm:$0xff] }
 0x2c1   :  { %5531 = vst.msk [vmem:[%s9418_s2 + $0x1f0] sm:$0xff] %vm5468_vm0, %v4566_v58  ;;  %v4569_v7 = vadd.f32 %v6449_v14, %v9528_v1  ;;  %v3545_v22 = vpop.f32.mrb[207].mxu0  ;;  %v4560_v34 = vpop.f32.mrb[207].mxu1  ;;  %v7170_v1 = vld [vmem:[#allocation2 + $0x780] ss:$12 sps:$4 sm:$0xff]  }
 0x2c2   :  { %5529 = vst.msk [vmem:[%s9418_s2 + $0x1e0] sm:$0xff] %vm5468_vm0, %v4558_v0  ;;  %v4561_v21 = vadd.f32 %v4560_v34, %v9529_v32  ;;  %v9534_v22 = vld [vmem:[#allocation93_spill] sm:$0xff] }
 0x2c3   :  { %5532 = vst.msk [vmem:[%s9418_s2 + $0x1f8] sm:$0xff] %vm5468_vm0, %v4569_v7  ;;  %3755 = vmatmul.mubr.bf16.gmra.mrb[56].mxu0 %v7160_v28  ;;  %6555 = vmatmul.mubr.bf16.gmra.mrb[56].mxu1 %v7164_v31  ;;  %v9533_v28 = vld [vmem:[#allocation87_spill] sm:$0xff]  ;;  %v7174_v7 = vld [vmem:[#allocation2 + $0x860] ss:$12 sps:$4 sm:$0xff]  }
 0x2c4   :  { %5530 = vst.msk [vmem:[%s9418_s2 + $0x1e8] sm:$0xff] %vm5468_vm0, %v4561_v21  ;;  %3762 = vmatprep.mubr.bf16.mxu0 %v7167_v50  ;;  %6558 = vmatprep.mubr.bf16.mxu1 %v7168_v62 }
 0x2c6   :  { %v8141_v51 = vpop.f32.mrb[208].mxu0  ;;  %v6452_v48 = vpop.f32.mrb[208].mxu1 }
 0x2c7   :  { %v4582_v29 = vadd.f32 %v6452_v48, %v9530_v52  ;;  %v3550_v5 = vpop.f32.mrb[209].mxu0  ;;  %v4573_v24 = vpop.f32.mrb[209].mxu1  ;;  %v7177_v48 = vld [vmem:[#allocation2 + $0x79c] ss:$12 sps:$4 sm:$0xff]   ;;  %v7178_v52 = vld [vmem:[#allocation2 + $0x878] ss:$12 sps:$4 sm:$0xff]  }
 0x2c8   :  { %v4574_v38 = vadd.f32 %v4573_v24, %v9531_v18  ;;  %v8145_v35 = vpop.f32.mrb[210].mxu0  ;;  %v6453_v3 = vpop.f32.mrb[210].mxu1 }
 0x2c9   :  { %5535 = vst.msk [vmem:[%s9418_s2 + $0x210] sm:$0xff] %vm5468_vm0, %v4582_v29  ;;  %v4585_v58 = vadd.f32 %v6453_v3, %v9532_v33  ;;  %v3553_v43 = vpop.f32.mrb[211].mxu0  ;;  %v4576_v15 = vpop.f32.mrb[211].mxu1  ;;  %v9535_v29 = vld [vmem:[#allocation98_spill] sm:$0xff]  ;;  %v7175_v33 = vld [vmem:[#allocation2 + $0x798] ss:$12 sps:$4 sm:$0xff]  }
 0x2ca   :  { %5533 = vst.msk [vmem:[%s9418_s2 + $0x200] sm:$0xff] %vm5468_vm0, %v4574_v38  ;;  %v4577_v31 = vadd.f32 %v4576_v15, %v9533_v28 }
 0x2cb   :  { %5536 = vst.msk [vmem:[%s9418_s2 + $0x218] sm:$0xff] %vm5468_vm0, %v4585_v58  ;;  %3763 = vmatmul.mubr.bf16.gmra.mrb[60].mxu0 %v7165_v59  ;;  %6559 = vmatmul.mubr.bf16.gmra.mrb[60].mxu1 %v7169_v41  ;;  %v9536_v59 = vld [vmem:[#allocation95_spill] sm:$0xff] }
 0x2cc   :  { %5534 = vst.msk [vmem:[%s9418_s2 + $0x208] sm:$0xff] %vm5468_vm0, %v4577_v31  ;;  %3770 = vmatprep.mubr.bf16.mxu0 %v7172_v12  ;;  %6562 = vmatprep.mubr.bf16.mxu1 %v7173_v36  ;;  %v7179_v58 = vld [vmem:[#allocation2 + $0x890] ss:$12 sps:$4 sm:$0xff]   ;;  %v7182_v31 = vld [vmem:[#allocation2 + $0x7b4] ss:$12 sps:$4 sm:$0xff]  }
 0x2ce   :  { %v8165_v17 = vpop.f32.mrb[212].mxu0  ;;  %v6456_v0 = vpop.f32.mrb[212].mxu1 }
 0x2cf   :  { %v4598_v14 = vadd.f32 %v6456_v0, %v7749_v8  ;;  %v3558_v50 = vpop.f32.mrb[213].mxu0  ;;  %v4589_v62 = vpop.f32.mrb[213].mxu1  ;;  %v7183_v0 = vld [vmem:[#allocation2 + $0x8a8] ss:$12 sps:$4 sm:$0xff]  }
 0x2d0   :  { %v4590_v34 = vadd.f32 %v4589_v62, %v9534_v22  ;;  %v8169_v32 = vpop.f32.mrb[214].mxu0  ;;  %v6457_v21 = vpop.f32.mrb[214].mxu1  ;;  %v7180_v22 = vld [vmem:[#allocation2 + $0x7b0] ss:$12 sps:$4 sm:$0xff]  }
 0x2d1   :  { %5539 = vst.msk [vmem:[%s9418_s2 + $0x230] sm:$0xff] %vm5468_vm0, %v4598_v14  ;;  %v4601_v5 = vadd.f32 %v6457_v21, %v9535_v29  ;;  %v3561_v24 = vpop.f32.mrb[215].mxu0  ;;  %v4592_v8 = vpop.f32.mrb[215].mxu1  ;;  %v7187_v29 = vld [vmem:[#allocation2 + $0x7cc] ss:$12 sps:$4 sm:$0xff]  }
 0x2d2   :  { %5537 = vst.msk [vmem:[%s9418_s2 + $0x220] sm:$0xff] %vm5468_vm0, %v4590_v34  ;;  %v4593_v41 = vadd.f32 %v4592_v8, %v9536_v59  ;;  %v7184_v34 = vld [vmem:[#allocation2 + $0x8c0] ss:$12 sps:$4 sm:$0xff]  }
 0x2d3   :  { %5540 = vst.msk [vmem:[%s9418_s2 + $0x238] sm:$0xff] %vm5468_vm0, %v4601_v5  ;;  %3771 = vmatmul.mubr.bf16.gmra.mrb[64].mxu0 %v7170_v1  ;;  %6563 = vmatmul.mubr.bf16.gmra.mrb[64].mxu1 %v7174_v7  ;;  %v7188_v5 = vld [vmem:[#allocation2 + $0x8d8] ss:$12 sps:$4 sm:$0xff]  }
 0x2d4   :  { %5538 = vst.msk [vmem:[%s9418_s2 + $0x228] sm:$0xff] %vm5468_vm0, %v4593_v41  ;;  %3778 = vmatprep.mubr.bf16.mxu0 %v7177_v48  ;;  %6566 = vmatprep.mubr.bf16.mxu1 %v7178_v52 }
 0x2d6   :  { %v8189_v18 = vpop.f32.mrb[216].mxu0  ;;  %v6460_v38 = vpop.f32.mrb[216].mxu1 }
 0x2d7   :  { %v4614_v3 = vadd.f32 %v6460_v38, %v7781_v25  ;;  %v3566_v12 = vpop.f32.mrb[217].mxu0  ;;  %v4605_v36 = vpop.f32.mrb[217].mxu1 }
 0x2d8   :  { %v4606_v43 = vadd.f32 %v4605_v36, %v7757_v56  ;;  %v8193_v15 = vpop.f32.mrb[218].mxu0  ;;  %v6461_v28 = vpop.f32.mrb[218].mxu1  ;;  %v7189_v12 = vld [vmem:[#allocation2 + $0x8f0] ss:$12 sps:$4 sm:$0xff]  }
 0x2d9   :  { %5543 = vst.msk [vmem:[%s9418_s2 + $0x250] sm:$0xff] %vm5468_vm0, %v4614_v3  ;;  %v4617_v14 = vadd.f32 %v6461_v28, %v7785_v10  ;;  %v3569_v50 = vpop.f32.mrb[219].mxu0  ;;  %v4608_v25 = vpop.f32.mrb[219].mxu1  ;;  %v7185_v3 = vld [vmem:[#allocation2 + $0x7c8] ss:$12 sps:$4 sm:$0xff]  }
 0x2da   :  { %5541 = vst.msk [vmem:[%s9418_s2 + $0x240] sm:$0xff] %vm5468_vm0, %v4606_v43  ;;  %v4609_v56 = vadd.f32 %v4608_v25, %v7761_v20  ;;  %v7192_v43 = vld [vmem:[#allocation2 + $0x7e4] ss:$12 sps:$4 sm:$0xff]   ;;  %v7193_v28 = vld [vmem:[#allocation2 + $0x908] ss:$12 sps:$4 sm:$0xff]  }
 0x2db   :  { %5544 = vst.msk [vmem:[%s9418_s2 + $0x258] sm:$0xff] %vm5468_vm0, %v4617_v14  ;;  %3779 = vmatmul.mubr.bf16.gmra.mrb[68].mxu0 %v7175_v33  ;;  %6567 = vmatmul.mubr.bf16.gmra.mrb[68].mxu1 %v7179_v58 }
 0x2dc   :  { %5542 = vst.msk [vmem:[%s9418_s2 + $0x248] sm:$0xff] %vm5468_vm0, %v4609_v56  ;;  %3786 = vmatprep.mubr.bf16.mxu0 %v7182_v31  ;;  %6570 = vmatprep.mubr.bf16.mxu1 %v7183_v0  ;;  %v7190_v56 = vld [vmem:[#allocation2 + $0x7e0] ss:$12 sps:$4 sm:$0xff]  }
 0x2de   :  { %v8213_v10 = vpop.f32.mrb[220].mxu0  ;;  %v6464_v62 = vpop.f32.mrb[220].mxu1 }
 0x2df   :  { %v4630_v1 = vadd.f32 %v6464_v62, %v7829_v11  ;;  %v3574_v20 = vpop.f32.mrb[221].mxu0  ;;  %v4621_v7 = vpop.f32.mrb[221].mxu1  ;;  %v7194_v62 = vld [vmem:[#allocation2 + $0x920] ss:$12 sps:$4 sm:$0xff]  }
 0x2e0   :  { %v4622_v21 = vadd.f32 %v4621_v7, %v7805_v49  ;;  %v8217_v48 = vpop.f32.mrb[222].mxu0  ;;  %v6465_v52 = vpop.f32.mrb[222].mxu1 }
 0x2e1   :  { %5547 = vst.msk [vmem:[%s9418_s2 + $0x270] sm:$0xff] %vm5468_vm0, %v4630_v1  ;;  %v4633_v24 = vadd.f32 %v6465_v52, %v7833_v19  ;;  %v3577_v8 = vpop.f32.mrb[223].mxu0  ;;  %v4624_v11 = vpop.f32.mrb[223].mxu1 }
 0x2e2   :  { %5545 = vst.msk [vmem:[%s9418_s2 + $0x260] sm:$0xff] %vm5468_vm0, %v4622_v21  ;;  %v4625_v49 = vadd.f32 %v4624_v11, %v7809_v26  ;;  %v7195_v8 = vld [vmem:[#allocation2 + $0x7f8] ss:$12 sps:$4 sm:$0xff]   ;;  %v7199_v11 = vld [vmem:[#allocation2 + $0x950] ss:$12 sps:$4 sm:$0xff]  }
 0x2e3   :  { %5548 = vst.msk [vmem:[%s9418_s2 + $0x278] sm:$0xff] %vm5468_vm0, %v4633_v24  ;;  %3787 = vmatmul.mubr.bf16.gmra.mrb[72].mxu0 %v7180_v22  ;;  %6571 = vmatmul.mubr.bf16.gmra.mrb[72].mxu1 %v7184_v34  ;;  %v7197_v22 = vld [vmem:[#allocation2 + $0x7fc] ss:$12 sps:$4 sm:$0xff]   ;;  %v7198_v34 = vld [vmem:[#allocation2 + $0x938] ss:$12 sps:$4 sm:$0xff]  }
 0x2e4   :  { %5546 = vst.msk [vmem:[%s9418_s2 + $0x268] sm:$0xff] %vm5468_vm0, %v4625_v49  ;;  %3794 = vmatprep.mubr.bf16.mxu0 %v7187_v29  ;;  %6574 = vmatprep.mubr.bf16.mxu1 %v7188_v5 }
 0x2e6   :  { %v8237_v19 = vpop.f32.mrb[224].mxu0  ;;  %v6468_v59 = vpop.f32.mrb[224].mxu1 }
 0x2e7   :  { %v4646_v41 = vadd.f32 %v6468_v59, %v7877_v27  ;;  %v3582_v26 = vpop.f32.mrb[225].mxu0  ;;  %v4637_v38 = vpop.f32.mrb[225].mxu1 }
 0x2e8   :  { %v4638_v36 = vadd.f32 %v4637_v38, %v7853_v47  ;;  %v8241_v33 = vpop.f32.mrb[226].mxu0  ;;  %v6469_v58 = vpop.f32.mrb[226].mxu1  ;;  %v7202_v26 = vld [vmem:[#allocation2 + $0x814] ss:$12 sps:$4 sm:$0xff]  }
 0x2e9   :  { %5551 = vst.msk [vmem:[%s9418_s2 + $0x290] sm:$0xff] %vm5468_vm0, %v4646_v41  ;;  %v4649_v31 = vadd.f32 %v6469_v58, %v7881_v13  ;;  %v3585_v0 = vpop.f32.mrb[227].mxu0  ;;  %v4640_v27 = vpop.f32.mrb[227].mxu1  ;;  %v7203_v38 = vld [vmem:[#allocation2 + $0x968] ss:$12 sps:$4 sm:$0xff]  }
 0x2ea   :  { %5549 = vst.msk [vmem:[%s9418_s2 + $0x280] sm:$0xff] %vm5468_vm0, %v4638_v36  ;;  %v4641_v47 = vadd.f32 %v4640_v27, %v7857_v55 }
 0x2eb   :  { %5552 = vst.msk [vmem:[%s9418_s2 + $0x298] sm:$0xff] %vm5468_vm0, %v4649_v31  ;;  %3795 = vmatmul.mubr.bf16.gmra.mrb[76].mxu0 %v7185_v3  ;;  %6575 = vmatmul.mubr.bf16.gmra.mrb[76].mxu1 %v7189_v12  ;;  %v7204_v31 = vld [vmem:[#allocation2 + $0x980] ss:$12 sps:$4 sm:$0xff]  }
 0x2ec   :  { %5550 = vst.msk [vmem:[%s9418_s2 + $0x288] sm:$0xff] %vm5468_vm0, %v4641_v47  ;;  %3802 = vmatprep.mubr.bf16.mxu0 %v7192_v43  ;;  %6578 = vmatprep.mubr.bf16.mxu1 %v7193_v28  ;;  %v7200_v28 = vld [vmem:[#allocation2 + $0x810] ss:$12 sps:$4 sm:$0xff]  }
 0x2ee   :  { %v8261_v13 = vpop.f32.mrb[228].mxu0  ;;  %v6472_v14 = vpop.f32.mrb[228].mxu1 }
 0x2ef   :  { %v4662_v50 = vadd.f32 %v6472_v14, %v7925_v46  ;;  %v3590_v55 = vpop.f32.mrb[229].mxu0  ;;  %v4653_v25 = vpop.f32.mrb[229].mxu1  ;;  %v7207_v14 = vld [vmem:[#allocation2 + $0x82c] ss:$12 sps:$4 sm:$0xff]  }
 0x2f0   :  { %v4654_v1 = vadd.f32 %v4653_v25, %v7901_v23  ;;  %v8265_v20 = vpop.f32.mrb[230].mxu0  ;;  %v6473_v7 = vpop.f32.mrb[230].mxu1 }
 0x2f1   :  { %5555 = vst.msk [vmem:[%s9418_s2 + $0x2b0] sm:$0xff] %vm5468_vm0, %v4662_v50  ;;  %v4665_v21 = vadd.f32 %v6473_v7, %v7929_v39  ;;  %v3593_v52 = vpop.f32.mrb[231].mxu0  ;;  %v4656_v46 = vpop.f32.mrb[231].mxu1  ;;  %v7208_v50 = vld [vmem:[#allocation2 + $0x998] ss:$12 sps:$4 sm:$0xff]  }
 0x2f2   :  { %5553 = vst.msk [vmem:[%s9418_s2 + $0x2a0] sm:$0xff] %vm5468_vm0, %v4654_v1  ;;  %v4657_v23 = vadd.f32 %v4656_v46, %v7905_v61  ;;  %v7205_v7 = vld [vmem:[#allocation2 + $0x828] ss:$12 sps:$4 sm:$0xff]   ;;  %v7212_v46 = vld [vmem:[#allocation2 + $0x844] ss:$12 sps:$4 sm:$0xff]  }
 0x2f3   :  { %5556 = vst.msk [vmem:[%s9418_s2 + $0x2b8] sm:$0xff] %vm5468_vm0, %v4665_v21  ;;  %3803 = vmatmul.mubr.bf16.gmra.mrb[80].mxu0 %v7190_v56  ;;  %6579 = vmatmul.mubr.bf16.gmra.mrb[80].mxu1 %v7194_v62 }
 0x2f4   :  { %5554 = vst.msk [vmem:[%s9418_s2 + $0x2a8] sm:$0xff] %vm5468_vm0, %v4657_v23  ;;  %3810 = vmatprep.mubr.bf16.mxu0 %v7197_v22  ;;  %6582 = vmatprep.mubr.bf16.mxu1 %v7198_v34  ;;  %v7209_v22 = vld [vmem:[#allocation2 + $0x9b0] ss:$12 sps:$4 sm:$0xff]   ;;  %v7213_v23 = vld [vmem:[#allocation2 + $0x9c8] ss:$12 sps:$4 sm:$0xff]  }
 0x2f6   :  { %v8285_v39 = vpop.f32.mrb[232].mxu0  ;;  %v6476_v29 = vpop.f32.mrb[232].mxu1 }
 0x2f7   :  { %v4678_v5 = vadd.f32 %v6476_v29, %v7973_v6  ;;  %v3598_v61 = vpop.f32.mrb[233].mxu0  ;;  %v4669_v24 = vpop.f32.mrb[233].mxu1 }
 0x2f8   :  { %v4670_v49 = vadd.f32 %v4669_v24, %v7949_v60  ;;  %v8289_v59 = vpop.f32.mrb[234].mxu0  ;;  %v6477_v41 = vpop.f32.mrb[234].mxu1 }
 0x2f9   :  { %5559 = vst.msk [vmem:[%s9418_s2 + $0x2d0] sm:$0xff] %vm5468_vm0, %v4678_v5  ;;  %v4681_v3 = vadd.f32 %v6477_v41, %v7977_v37  ;;  %v3601_v12 = vpop.f32.mrb[235].mxu0  ;;  %v4672_v6 = vpop.f32.mrb[235].mxu1 }
 0x2fa   :  { %5557 = vst.msk [vmem:[%s9418_s2 + $0x2c0] sm:$0xff] %vm5468_vm0, %v4670_v49  ;;  %v4673_v60 = vadd.f32 %v4672_v6, %v7953_v44  ;;  %v7214_v49 = vld [vmem:[#allocation2 + $0x9e0] ss:$12 sps:$4 sm:$0xff]   ;;  %v7218_v12 = vld [vmem:[#allocation2 + $0x9f8] ss:$12 sps:$4 sm:$0xff]  }
 0x2fb   :  { %5560 = vst.msk [vmem:[%s9418_s2 + $0x2d8] sm:$0xff] %vm5468_vm0, %v4681_v3  ;;  %3811 = vmatmul.mubr.bf16.gmra.mrb[84].mxu0 %v7195_v8  ;;  %6583 = vmatmul.mubr.bf16.gmra.mrb[84].mxu1 %v7199_v11  ;;  %v7210_v11 = vld [vmem:[#allocation2 + $0x840] ss:$12 sps:$4 sm:$0xff]   ;;  %v7217_v3 = vld [vmem:[#allocation2 + $0x85c] ss:$12 sps:$4 sm:$0xff]  }
 0x2fc   :  { %5558 = vst.msk [vmem:[%s9418_s2 + $0x2c8] sm:$0xff] %vm5468_vm0, %v4673_v60  ;;  %3818 = vmatprep.mubr.bf16.mxu0 %v7202_v26  ;;  %6586 = vmatprep.mubr.bf16.mxu1 %v7203_v38 }
 0x2fe   :  { %v8309_v37 = vpop.f32.mrb[236].mxu0  ;;  %v6480_v36 = vpop.f32.mrb[236].mxu1 }
 0x2ff   :  { %v4694_v58 = vadd.f32 %v6480_v36, %v8021_v40  ;;  %v3606_v44 = vpop.f32.mrb[237].mxu0  ;;  %v4685_v43 = vpop.f32.mrb[237].mxu1 }
 0x300   :  { %v4686_v0 = vadd.f32 %v4685_v43, %v7997_v16  ;;  %v8313_v27 = vpop.f32.mrb[238].mxu0  ;;  %v6481_v47 = vpop.f32.mrb[238].mxu1  ;;  %v7215_v43 = vld [vmem:[#allocation2 + $0x858] ss:$12 sps:$4 sm:$0xff]  }
 0x301   :  { %5563 = vst.msk [vmem:[%s9418_s2 + $0x2f0] sm:$0xff] %vm5468_vm0, %v4694_v58  ;;  %v4697_v55 = vadd.f32 %v6481_v47, %v8025_v54  ;;  %v3609_v25 = vpop.f32.mrb[239].mxu0  ;;  %v4688_v40 = vpop.f32.mrb[239].mxu1 }
 0x302   :  { %5561 = vst.msk [vmem:[%s9418_s2 + $0x2e0] sm:$0xff] %vm5468_vm0, %v4686_v0  ;;  %v4689_v16 = vadd.f32 %v4688_v40, %v8001_v9 }
 0x303   :  { %5564 = vst.msk [vmem:[%s9418_s2 + $0x2f8] sm:$0xff] %vm5468_vm0, %v4697_v55  ;;  %3819 = vmatmul.mubr.bf16.gmra.mrb[88].mxu0 %v7200_v28  ;;  %6587 = vmatmul.mubr.bf16.gmra.mrb[88].mxu1 %v7204_v31  ;;  %v7219_v28 = vld [vmem:[#allocation2 + $0xa10] ss:$12 sps:$4 sm:$0xff]  }
 0x304   :  { %5562 = vst.msk [vmem:[%s9418_s2 + $0x2e8] sm:$0xff] %vm5468_vm0, %v4689_v16  ;;  %3826 = vmatprep.mubr.bf16.mxu0 %v7207_v14  ;;  %6590 = vmatprep.mubr.bf16.mxu1 %v7208_v50  ;;  %v7222_v14 = vld [vmem:[#allocation2 + $0x874] ss:$12 sps:$4 sm:$0xff]  }
 0x305   :  { %v7223_v50 = vld [vmem:[#allocation2 + $0xa28] ss:$12 sps:$4 sm:$0xff]  }
 0x306   :  { %v8333_v54 = vpop.f32.mrb[240].mxu0  ;;  %v6484_v56 = vpop.f32.mrb[240].mxu1 }
 0x307   :  { %v4710_v62 = vadd.f32 %v6484_v56, %v8069_v53  ;;  %v3614_v9 = vpop.f32.mrb[241].mxu0  ;;  %v4701_v1 = vpop.f32.mrb[241].mxu1 }
 0x308   :  { %v4702_v34 = vadd.f32 %v4701_v1, %v8045_v4  ;;  %v8337_v21 = vpop.f32.mrb[242].mxu0  ;;  %v6485_v52 = vpop.f32.mrb[242].mxu1  ;;  %v7224_v9 = vld [vmem:[#allocation2 + $0xa40] ss:$12 sps:$4 sm:$0xff]  }
 0x309   :  { %5567 = vst.msk [vmem:[%s9418_s2 + $0x310] sm:$0xff] %vm5468_vm0, %v4710_v62  ;;  %v4713_v29 = vadd.f32 %v6485_v52, %v8073_v57  ;;  %v3617_v5 = vpop.f32.mrb[243].mxu0  ;;  %v4704_v53 = vpop.f32.mrb[243].mxu1  ;;  %v7220_v62 = vld [vmem:[#allocation2 + $0x870] ss:$12 sps:$4 sm:$0xff]  }
 0x30a   :  { %5565 = vst.msk [vmem:[%s9418_s2 + $0x300] sm:$0xff] %vm5468_vm0, %v4702_v34  ;;  %v4705_v4 = vadd.f32 %v4704_v53, %v8049_v2  ;;  %v7227_v34 = vld [vmem:[#allocation2 + $0x88c] ss:$12 sps:$4 sm:$0xff]  }
 0x30b   :  { %5568 = vst.msk [vmem:[%s9418_s2 + $0x318] sm:$0xff] %vm5468_vm0, %v4713_v29  ;;  %3827 = vmatmul.mubr.bf16.gmra.mrb[92].mxu0 %v7205_v7  ;;  %6591 = vmatmul.mubr.bf16.gmra.mrb[92].mxu1 %v7209_v22  ;;  %v7228_v52 = vld [vmem:[#allocation2 + $0xa58] ss:$12 sps:$4 sm:$0xff]  }
 0x30c   :  { %5566 = vst.msk [vmem:[%s9418_s2 + $0x308] sm:$0xff] %vm5468_vm0, %v4705_v4  ;;  %3834 = vmatprep.mubr.bf16.mxu0 %v7212_v46  ;;  %6594 = vmatprep.mubr.bf16.mxu1 %v7213_v23  ;;  %v7225_v4 = vld [vmem:[#allocation2 + $0x888] ss:$12 sps:$4 sm:$0xff]  }
 0x30e   :  { %v8357_v57 = vpop.f32.mrb[244].mxu0  ;;  %v6488_v61 = vpop.f32.mrb[244].mxu1 }
 0x30f   :  { %v4726_v24 = vadd.f32 %v6488_v61, %v8117_v30  ;;  %v3622_v2 = vpop.f32.mrb[245].mxu0  ;;  %v4717_v8 = vpop.f32.mrb[245].mxu1  ;;  %v7229_v61 = vld [vmem:[#allocation2 + $0xa70] ss:$12 sps:$4 sm:$0xff]  }
 0x310   :  { %v4718_v41 = vadd.f32 %v4717_v8, %v8093_v63  ;;  %v8361_v26 = vpop.f32.mrb[246].mxu0  ;;  %v6489_v38 = vpop.f32.mrb[246].mxu1 }
 0x311   :  { %5571 = vst.msk [vmem:[%s9418_s2 + $0x330] sm:$0xff] %vm5468_vm0, %v4726_v24  ;;  %v4729_v6 = vadd.f32 %v6489_v38, %v8121_v45  ;;  %v3625_v60 = vpop.f32.mrb[247].mxu0  ;;  %v4720_v30 = vpop.f32.mrb[247].mxu1 }
 0x312   :  { %5569 = vst.msk [vmem:[%s9418_s2 + $0x320] sm:$0xff] %vm5468_vm0, %v4718_v41  ;;  %v4721_v63 = vadd.f32 %v4720_v30, %v8097_v42  ;;  %v7230_v60 = vld [vmem:[#allocation2 + $0x8a0] ss:$12 sps:$4 sm:$0xff]  }
 0x313   :  { %5572 = vst.msk [vmem:[%s9418_s2 + $0x338] sm:$0xff] %vm5468_vm0, %v4729_v6  ;;  %3835 = vmatmul.mubr.bf16.gmra.mrb[96].mxu0 %v7210_v11  ;;  %6595 = vmatmul.mubr.bf16.gmra.mrb[96].mxu1 %v7214_v49  ;;  %v7232_v11 = vld [vmem:[#allocation2 + $0x8a4] ss:$12 sps:$4 sm:$0xff]   ;;  %v7233_v49 = vld [vmem:[#allocation2 + $0xa88] ss:$12 sps:$4 sm:$0xff]  }
 0x314   :  { %5570 = vst.msk [vmem:[%s9418_s2 + $0x328] sm:$0xff] %vm5468_vm0, %v4721_v63  ;;  %3842 = vmatprep.mubr.bf16.mxu0 %v7217_v3  ;;  %6598 = vmatprep.mubr.bf16.mxu1 %v7218_v12  ;;  %v7234_v30 = vld [vmem:[#allocation2 + $0xaa0] ss:$12 sps:$4 sm:$0xff]  }
 0x316   :  { %v8381_v45 = vpop.f32.mrb[248].mxu0  ;;  %v6492_v36 = vpop.f32.mrb[248].mxu1 }
 0x317   :  { %v4742_v58 = vadd.f32 %v6492_v36, %v8165_v17  ;;  %v3630_v42 = vpop.f32.mrb[249].mxu0  ;;  %v4733_v44 = vpop.f32.mrb[249].mxu1 }
 0x318   :  { %v4734_v31 = vadd.f32 %v4733_v44, %v8141_v51  ;;  %v8385_v0 = vpop.f32.mrb[250].mxu0  ;;  %v6493_v47 = vpop.f32.mrb[250].mxu1  ;;  %v7237_v42 = vld [vmem:[#allocation2 + $0x8bc] ss:$12 sps:$4 sm:$0xff]   ;;  %v7238_v44 = vld [vmem:[#allocation2 + $0xab8] ss:$12 sps:$4 sm:$0xff]  }
 0x319   :  { %5575 = vst.msk [vmem:[%s9418_s2 + $0x350] sm:$0xff] %vm5468_vm0, %v4742_v58  ;;  %v4745_v55 = vadd.f32 %v6493_v47, %v8169_v32  ;;  %v3633_v25 = vpop.f32.mrb[251].mxu0  ;;  %v4736_v17 = vpop.f32.mrb[251].mxu1 }
 0x31a   :  { %5573 = vst.msk [vmem:[%s9418_s2 + $0x340] sm:$0xff] %vm5468_vm0, %v4734_v31  ;;  %v4737_v51 = vadd.f32 %v4736_v17, %v8145_v35 }
 0x31b   :  { %5576 = vst.msk [vmem:[%s9418_s2 + $0x358] sm:$0xff] %vm5468_vm0, %v4745_v55  ;;  %3843 = vmatmul.mubr.bf16.gmra.mrb[100].mxu0 %v7215_v43  ;;  %6599 = vmatmul.mubr.bf16.gmra.mrb[100].mxu1 %v7219_v28  ;;  %v7239_v55 = vld [vmem:[#allocation2 + $0xad0] ss:$12 sps:$4 sm:$0xff]  }
 0x31c   :  { %5574 = vst.msk [vmem:[%s9418_s2 + $0x348] sm:$0xff] %vm5468_vm0, %v4737_v51  ;;  %3850 = vmatprep.mubr.bf16.mxu0 %v7222_v14  ;;  %6602 = vmatprep.mubr.bf16.mxu1 %v7223_v50  ;;  %v7235_v50 = vld [vmem:[#allocation2 + $0x8b8] ss:$12 sps:$4 sm:$0xff]  }
 0x31e   :  { %v8405_v32 = vpop.f32.mrb[252].mxu0  ;;  %v6496_v40 = vpop.f32.mrb[252].mxu1 }
 0x31f   :  { %v4758_v16 = vadd.f32 %v6496_v40, %v8213_v10  ;;  %v3638_v35 = vpop.f32.mrb[253].mxu0  ;;  %v4749_v56 = vpop.f32.mrb[253].mxu1  ;;  %v7242_v40 = vld [vmem:[#allocation2 + $0x8d4] ss:$12 sps:$4 sm:$0xff]  }
 0x320   :  { %v4750_v1 = vadd.f32 %v4749_v56, %v8189_v18  ;;  %v8409_v7 = vpop.f32.mrb[254].mxu0  ;;  %v6497_v22 = vpop.f32.mrb[254].mxu1 }
 0x321   :  { %5579 = vst.msk [vmem:[%s9418_s2 + $0x370] sm:$0xff] %vm5468_vm0, %v4758_v16  ;;  %v4761_v46 = vadd.f32 %v6497_v22, %v8217_v48  ;;  %v3641_v23 = vpop.f32.mrb[255].mxu0  ;;  %v4752_v10 = vpop.f32.mrb[255].mxu1  ;;  %v7243_v16 = vld [vmem:[#allocation2 + $0xae8] ss:$12 sps:$4 sm:$0xff]  }
 0x322   :  { %5577 = vst.msk [vmem:[%s9418_s2 + $0x360] sm:$0xff] %vm5468_vm0, %v4750_v1  ;;  %v4753_v18 = vadd.f32 %v4752_v10, %v8193_v15  ;;  %v7240_v22 = vld [vmem:[#allocation2 + $0x8d0] ss:$12 sps:$4 sm:$0xff]   ;;  %v7247_v10 = vld [vmem:[#allocation2 + $0x8ec] ss:$12 sps:$4 sm:$0xff]  }
 0x323   :  { %5580 = vst.msk [vmem:[%s9418_s2 + $0x378] sm:$0xff] %vm5468_vm0, %v4761_v46  ;;  %3851 = vmatmul.mubr.bf16.gmra.mrb[104].mxu0 %v7220_v62  ;;  %6603 = vmatmul.mubr.bf16.gmra.mrb[104].mxu1 %v7224_v9 }
 0x324   :  { %5578 = vst.msk [vmem:[%s9418_s2 + $0x368] sm:$0xff] %vm5468_vm0, %v4753_v18  ;;  %3858 = vmatprep.mubr.bf16.mxu0 %v7227_v34  ;;  %6606 = vmatprep.mubr.bf16.mxu1 %v7228_v52  ;;  %v7244_v34 = vld [vmem:[#allocation2 + $0xb00] ss:$12 sps:$4 sm:$0xff]   ;;  %v7248_v18 = vld [vmem:[#allocation2 + $0xb18] ss:$12 sps:$4 sm:$0xff]  }
 0x326   :  { %v8429_v48 = vpop.f32.mrb[0].mxu0  ;;  %v6500_v29 = vpop.f32.mrb[0].mxu1 }
 0x327   :  { %v4774_v5 = vadd.f32 %v6500_v29, %v8261_v13  ;;  %v3646_v15 = vpop.f32.mrb[1].mxu0  ;;  %v4765_v53 = vpop.f32.mrb[1].mxu1 }
 0x328   :  { %v4766_v24 = vadd.f32 %v4765_v53, %v8237_v19  ;;  %v8433_v2 = vpop.f32.mrb[2].mxu0  ;;  %v6501_v8 = vpop.f32.mrb[2].mxu1 }
 0x329   :  { %5583 = vst.msk [vmem:[%s9418_s2 + $0x390] sm:$0xff] %vm5468_vm0, %v4774_v5  ;;  %v4777_v41 = vadd.f32 %v6501_v8, %v8265_v20  ;;  %v3649_v38 = vpop.f32.mrb[3].mxu0  ;;  %v4768_v13 = vpop.f32.mrb[3].mxu1 }
 0x32a   :  { %5581 = vst.msk [vmem:[%s9418_s2 + $0x380] sm:$0xff] %vm5468_vm0, %v4766_v24  ;;  %v4769_v19 = vadd.f32 %v4768_v13, %v8241_v33  ;;  %v7249_v24 = vld [vmem:[#allocation2 + $0xb30] ss:$12 sps:$4 sm:$0xff]   ;;  %v7253_v38 = vld [vmem:[#allocation2 + $0xb48] ss:$12 sps:$4 sm:$0xff]  }
 0x32b   :  { %5584 = vst.msk [vmem:[%s9418_s2 + $0x398] sm:$0xff] %vm5468_vm0, %v4777_v41  ;;  %3859 = vmatmul.mubr.bf16.gmra.mrb[108].mxu0 %v7225_v4  ;;  %6607 = vmatmul.mubr.bf16.gmra.mrb[108].mxu1 %v7229_v61  ;;  %v7245_v61 = vld [vmem:[#allocation2 + $0x8e8] ss:$12 sps:$4 sm:$0xff]   ;;  %v7252_v41 = vld [vmem:[#allocation2 + $0x904] ss:$12 sps:$4 sm:$0xff]  }
 0x32c   :  { %5582 = vst.msk [vmem:[%s9418_s2 + $0x388] sm:$0xff] %vm5468_vm0, %v4769_v19  ;;  %3866 = vmatprep.mubr.bf16.mxu0 %v7232_v11  ;;  %6610 = vmatprep.mubr.bf16.mxu1 %v7233_v49 }
 0x32e   :  { %v8453_v20 = vpop.f32.mrb[4].mxu0  ;;  %v6504_v3 = vpop.f32.mrb[4].mxu1 }
 0x32f   :  { %v4790_v12 = vadd.f32 %v6504_v3, %v8309_v37  ;;  %v3654_v33 = vpop.f32.mrb[5].mxu0  ;;  %v4781_v6 = vpop.f32.mrb[5].mxu1 }
 0x330   :  { %v4782_v63 = vadd.f32 %v4781_v6, %v8285_v39  ;;  %v8457_v36 = vpop.f32.mrb[6].mxu0  ;;  %v6505_v58 = vpop.f32.mrb[6].mxu1 }
 0x331   :  { %5587 = vst.msk [vmem:[%s9418_s2 + $0x3b0] sm:$0xff] %vm5468_vm0, %v4790_v12  ;;  %v4793_v43 = vadd.f32 %v6505_v58, %v8313_v27  ;;  %v3657_v28 = vpop.f32.mrb[7].mxu0  ;;  %v4784_v37 = vpop.f32.mrb[7].mxu1 }
 0x332   :  { %5585 = vst.msk [vmem:[%s9418_s2 + $0x3a0] sm:$0xff] %vm5468_vm0, %v4782_v63  ;;  %v4785_v39 = vadd.f32 %v4784_v37, %v8289_v59 }
 0x333   :  { %5588 = vst.msk [vmem:[%s9418_s2 + $0x3b8] sm:$0xff] %vm5468_vm0, %v4793_v43  ;;  %3867 = vmatmul.mubr.bf16.gmra.mrb[112].mxu0 %v7230_v60  ;;  %6611 = vmatmul.mubr.bf16.gmra.mrb[112].mxu1 %v7234_v30  ;;  %v7254_v30 = vld [vmem:[#allocation2 + $0xb60] ss:$12 sps:$4 sm:$0xff]  }
 0x334   :  { %5586 = vst.msk [vmem:[%s9418_s2 + $0x3a8] sm:$0xff] %vm5468_vm0, %v4785_v39  ;;  %3874 = vmatprep.mubr.bf16.mxu0 %v7237_v42  ;;  %6614 = vmatprep.mubr.bf16.mxu1 %v7238_v44  ;;  %v7257_v42 = vld [vmem:[#allocation2 + $0x91c] ss:$12 sps:$4 sm:$0xff]   ;;  %v7258_v44 = vld [vmem:[#allocation2 + $0xb78] ss:$12 sps:$4 sm:$0xff]  }
 0x336   :  { %v8477_v27 = vpop.f32.mrb[8].mxu0  ;;  %v6508_v31 = vpop.f32.mrb[8].mxu1 }
 0x337   :  { %v4806_v47 = vadd.f32 %v6508_v31, %v8357_v57  ;;  %v3662_v59 = vpop.f32.mrb[9].mxu0  ;;  %v4797_v14 = vpop.f32.mrb[9].mxu1 }
 0x338   :  { %v4798_v25 = vadd.f32 %v4797_v14, %v8333_v54  ;;  %v8481_v17 = vpop.f32.mrb[10].mxu0  ;;  %v6509_v51 = vpop.f32.mrb[10].mxu1 }
 0x339   :  { %5591 = vst.msk [vmem:[%s9418_s2 + $0x3d0] sm:$0xff] %vm5468_vm0, %v4806_v47  ;;  %v4809_v35 = vadd.f32 %v6509_v51, %v8361_v26  ;;  %v3665_v56 = vpop.f32.mrb[11].mxu0  ;;  %v4800_v57 = vpop.f32.mrb[11].mxu1 }
 0x33a   :  { %5589 = vst.msk [vmem:[%s9418_s2 + $0x3c0] sm:$0xff] %vm5468_vm0, %v4798_v25  ;;  %v4801_v54 = vadd.f32 %v4800_v57, %v8337_v21 }
 0x33b   :  { %5592 = vst.msk [vmem:[%s9418_s2 + $0x3d8] sm:$0xff] %vm5468_vm0, %v4809_v35  ;;  %3875 = vmatmul.mubr.bf16.gmra.mrb[116].mxu0 %v7235_v50  ;;  %6615 = vmatmul.mubr.bf16.gmra.mrb[116].mxu1 %v7239_v55  ;;  %v7255_v50 = vld [vmem:[#allocation2 + $0x918] ss:$12 sps:$4 sm:$0xff]   ;;  %v7259_v55 = vld [vmem:[#allocation2 + $0xb90] ss:$12 sps:$4 sm:$0xff]  }
 0x33c   :  { %5590 = vst.msk [vmem:[%s9418_s2 + $0x3c8] sm:$0xff] %vm5468_vm0, %v4801_v54  ;;  %3882 = vmatprep.mubr.bf16.mxu0 %v7242_v40  ;;  %6618 = vmatprep.mubr.bf16.mxu1 %v7243_v16  ;;  %v7262_v40 = vld [vmem:[#allocation2 + $0x934] ss:$12 sps:$4 sm:$0xff]  }
 0x33d   :  { %v7263_v16 = vld [vmem:[#allocation2 + $0xba8] ss:$12 sps:$4 sm:$0xff]  }
 0x33e   :  { %v3668_v26 = vpop.f32.mrb[12].mxu0  ;;  %v6512_v62 = vpop.f32.mrb[12].mxu1 }
 0x33f   :  { %v4822_v9 = vadd.f32 %v6512_v62, %v8405_v32  ;;  %v3670_v1 = vpop.f32.mrb[13].mxu0  ;;  %v4813_v21 = vpop.f32.mrb[13].mxu1 }
 0x340   :  { %v4814_v52 = vadd.f32 %v4813_v21, %v8381_v45  ;;  %v3671_v46 = vpop.f32.mrb[14].mxu0  ;;  %v6513_v23 = vpop.f32.mrb[14].mxu1 }
 0x341   :  { %5595 = vst.msk [vmem:[%s9418_s2 + $0x3f0] sm:$0xff] %vm5468_vm0, %v4822_v9  ;;  %v4825_v29 = vadd.f32 %v6513_v23, %v8409_v7  ;;  %v3673_v5 = vpop.f32.mrb[15].mxu0  ;;  %v4816_v15 = vpop.f32.mrb[15].mxu1 }
 0x342   :  { %5593 = vst.msk [vmem:[%s9418_s2 + $0x3e0] sm:$0xff] %vm5468_vm0, %v4814_v52  ;;  %v4817_v45 = vadd.f32 %v4816_v15, %v8385_v0 }
 0x343   :  { %5596 = vst.msk [vmem:[%s9418_s2 + $0x3f8] sm:$0xff] %vm5468_vm0, %v4825_v29  ;;  %3883 = vmatmul.mubr.bf16.gmra.mrb[120].mxu0 %v7240_v22  ;;  %6619 = vmatmul.mubr.bf16.gmra.mrb[120].mxu1 %v7244_v34  ;;  %v7260_v22 = vld [vmem:[#allocation2 + $0x930] ss:$12 sps:$4 sm:$0xff]   ;;  %v7264_v34 = vld [vmem:[#allocation2 + $0xbc0] ss:$12 sps:$4 sm:$0xff]  }
 0x344   :  { %5594 = vst.msk [vmem:[%s9418_s2 + $0x3e8] sm:$0xff] %vm5468_vm0, %v4817_v45  ;;  %3890 = vmatprep.mubr.bf16.mxu0 %v7247_v10  ;;  %6622 = vmatprep.mubr.bf16.mxu1 %v7248_v18  ;;  %v7267_v10 = vld [vmem:[#allocation2 + $0x94c] ss:$12 sps:$4 sm:$0xff]  }
 0x345   :  { %v7268_v18 = vld [vmem:[#allocation2 + $0xbd8] ss:$12 sps:$4 sm:$0xff]  }
 0x346   :  { %v3676_v32 = vpop.f32.mrb[16].mxu0  ;;  %v6516_v7 = vpop.f32.mrb[16].mxu1 }
 0x347   :  { %v4838_v53 = vadd.f32 %v6516_v7, %v8453_v20  ;;  %v3678_v4 = vpop.f32.mrb[17].mxu0  ;;  %v4829_v0 = vpop.f32.mrb[17].mxu1 }
 0x348   :  { %v4830_v8 = vadd.f32 %v4829_v0, %v8429_v48  ;;  %v3679_v11 = vpop.f32.mrb[18].mxu0  ;;  %v6517_v49 = vpop.f32.mrb[18].mxu1  ;;  %v7265_v0 = vld [vmem:[#allocation2 + $0x948] ss:$12 sps:$4 sm:$0xff]  }
 0x349   :  { %5599 = vst.msk [vmem:[%s9418_s2 + $0x410] sm:$0xff] %vm5468_vm0, %v4838_v53  ;;  %v4841_v13 = vadd.f32 %v6517_v49, %v8457_v36  ;;  %v3681_v19 = vpop.f32.mrb[19].mxu0  ;;  %v4832_v3 = vpop.f32.mrb[19].mxu1  ;;  %v7272_v49 = vld [vmem:[#allocation2 + $0x964] ss:$12 sps:$4 sm:$0xff]  }
 0x34a   :  { %5597 = vst.msk [vmem:[%s9418_s2 + $0x400] sm:$0xff] %vm5468_vm0, %v4830_v8  ;;  %v4833_v48 = vadd.f32 %v4832_v3, %v8433_v2  ;;  %v7250_v2 = vld [vmem:[#allocation2 + $0x900] ss:$12 sps:$4 sm:$0xff]  }
 0x34b   :  { %5600 = vst.msk [vmem:[%s9418_s2 + $0x418] sm:$0xff] %vm5468_vm0, %v4841_v13  ;;  %3891 = vmatmul.mubr.bf16.gmra.mrb[124].mxu0 %v7245_v61  ;;  %6623 = vmatmul.mubr.bf16.gmra.mrb[124].mxu1 %v7249_v24  ;;  %v7269_v61 = vld [vmem:[#allocation2 + $0xbf0] ss:$12 sps:$4 sm:$0xff]  }
 0x34c   :  { %5598 = vst.msk [vmem:[%s9418_s2 + $0x408] sm:$0xff] %vm5468_vm0, %v4833_v48  ;;  %3898 = vmatprep.mubr.bf16.mxu0 %v7252_v41  ;;  %6626 = vmatprep.mubr.bf16.mxu1 %v7253_v38  ;;  %v7273_v41 = vld [vmem:[#allocation2 + $0xc08] ss:$12 sps:$4 sm:$0xff]  }
 0x34e   :  { %v3684_v20 = vpop.f32.mrb[20].mxu0  ;;  %v6520_v12 = vpop.f32.mrb[20].mxu1 }
 0x34f   :  { %v4854_v33 = vadd.f32 %v6520_v12, %v3668_v26  ;;  %v3686_v6 = vpop.f32.mrb[21].mxu0  ;;  %v4845_v60 = vpop.f32.mrb[21].mxu1 }
 0x350   :  { %v4846_v63 = vadd.f32 %v4845_v60, %v8477_v27  ;;  %v3687_v36 = vpop.f32.mrb[22].mxu0  ;;  %v6521_v58 = vpop.f32.mrb[22].mxu1  ;;  %v7270_v6 = vld [vmem:[#allocation2 + $0x960] ss:$12 sps:$4 sm:$0xff]  }
 0x351   :  { %5603 = vst.msk [vmem:[%s9418_s2 + $0x430] sm:$0xff] %vm5468_vm0, %v4854_v33  ;;  %v4857_v43 = vadd.f32 %v6521_v58, %v3671_v46  ;;  %v3689_v28 = vpop.f32.mrb[23].mxu0  ;;  %v4848_v37 = vpop.f32.mrb[23].mxu1  ;;  %v7274_v60 = vld [vmem:[#allocation2 + $0xc20] ss:$12 sps:$4 sm:$0xff]  }
 0x352   :  { %5601 = vst.msk [vmem:[%s9418_s2 + $0x420] sm:$0xff] %vm5468_vm0, %v4846_v63  ;;  %v4849_v39 = vadd.f32 %v4848_v37, %v8481_v17  ;;  %v7277_v63 = vld [vmem:[#allocation2 + $0x97c] ss:$12 sps:$4 sm:$0xff]  }
 0x353   :  { %5604 = vst.msk [vmem:[%s9418_s2 + $0x438] sm:$0xff] %vm5468_vm0, %v4857_v43  ;;  %3899 = vmatmul.mubr.bf16.gmra.mrb[128].mxu0 %v7250_v2  ;;  %6627 = vmatmul.mubr.bf16.gmra.mrb[128].mxu1 %v7254_v30 }
 0x354   :  { %5602 = vst.msk [vmem:[%s9418_s2 + $0x428] sm:$0xff] %vm5468_vm0, %v4849_v39  ;;  %3906 = vmatprep.mubr.bf16.mxu0 %v7257_v42  ;;  %6630 = vmatprep.mubr.bf16.mxu1 %v7258_v44 }
 0x356   :  { %v3692_v27 = vpop.f32.mrb[24].mxu0  ;;  %v6524_v31 = vpop.f32.mrb[24].mxu1 }
 0x357   :  { %v4870_v47 = vadd.f32 %v6524_v31, %v3684_v20  ;;  %v3694_v59 = vpop.f32.mrb[25].mxu0  ;;  %v4861_v14 = vpop.f32.mrb[25].mxu1  ;;  %v7275_v31 = vld [vmem:[#allocation2 + $0x978] ss:$12 sps:$4 sm:$0xff]  }
 0x358   :  { %v4862_v25 = vadd.f32 %v4861_v14, %v3676_v32  ;;  %v3695_v17 = vpop.f32.mrb[26].mxu0  ;;  %v6525_v51 = vpop.f32.mrb[26].mxu1 }
 0x359   :  { %5607 = vst.msk [vmem:[%s9418_s2 + $0x450] sm:$0xff] %vm5468_vm0, %v4870_v47  ;;  %v4873_v35 = vadd.f32 %v6525_v51, %v3687_v36  ;;  %v3697_v56 = vpop.f32.mrb[27].mxu0  ;;  %v4864_v57 = vpop.f32.mrb[27].mxu1  ;;  %v7278_v36 = vld [vmem:[#allocation2 + $0xc38] ss:$12 sps:$4 sm:$0xff]  }
 0x35a   :  { %5605 = vst.msk [vmem:[%s9418_s2 + $0x440] sm:$0xff] %vm5468_vm0, %v4862_v25  ;;  %v4865_v54 = vadd.f32 %v4864_v57, %v3679_v11  ;;  %v7279_v47 = vld [vmem:[#allocation2 + $0xc50] ss:$12 sps:$4 sm:$0xff]  }
 0x35b   :  { %5608 = vst.msk [vmem:[%s9418_s2 + $0x458] sm:$0xff] %vm5468_vm0, %v4873_v35  ;;  %3907 = vmatmul.mubr.bf16.gmra.mrb[132].mxu0 %v7255_v50  ;;  %6631 = vmatmul.mubr.bf16.gmra.mrb[132].mxu1 %v7259_v55  ;;  %v7282_v50 = vld [vmem:[#allocation2 + $0x994] ss:$12 sps:$4 sm:$0xff]  }
 0x35c   :  { %5606 = vst.msk [vmem:[%s9418_s2 + $0x448] sm:$0xff] %vm5468_vm0, %v4865_v54  ;;  %3914 = vmatprep.mubr.bf16.mxu0 %v7262_v40  ;;  %6634 = vmatprep.mubr.bf16.mxu1 %v7263_v16  ;;  %v7283_v55 = vld [vmem:[#allocation2 + $0xc68] ss:$12 sps:$4 sm:$0xff]   ;;  %v7280_v54 = vld [vmem:[#allocation2 + $0x990] ss:$12 sps:$4 sm:$0xff]  }
 0x35e   :  { %v3700_v26 = vpop.f32.mrb[28].mxu0  ;;  %v6528_v62 = vpop.f32.mrb[28].mxu1 }
 0x35f   :  { %v4886_v9 = vadd.f32 %v6528_v62, %v3700_v26  ;;  %v3702_v1 = vpop.f32.mrb[29].mxu0  ;;  %v4877_v21 = vpop.f32.mrb[29].mxu1  ;;  %v7284_v26 = vld [vmem:[#allocation2 + $0xc80] ss:$12 sps:$4 sm:$0xff]  }
 0x360   :  { %v4878_v52 = vadd.f32 %v4877_v21, %v3692_v27  ;;  %v3703_v46 = vpop.f32.mrb[30].mxu0  ;;  %v6529_v23 = vpop.f32.mrb[30].mxu1  ;;  %v7287_v1 = vld [vmem:[#allocation2 + $0x9ac] ss:$12 sps:$4 sm:$0xff]  }
 0x361   :  { %5611 = vst.msk [vmem:[%s9418_s2 + $0x470] sm:$0xff] %vm5468_vm0, %v4886_v9  ;;  %v4889_v29 = vadd.f32 %v6529_v23, %v3703_v46  ;;  %v3705_v5 = vpop.f32.mrb[31].mxu0  ;;  %v4880_v15 = vpop.f32.mrb[31].mxu1  ;;  %v7288_v21 = vld [vmem:[#allocation2 + $0xc98] ss:$12 sps:$4 sm:$0xff]  }
 0x362   :  { %5609 = vst.msk [vmem:[%s9418_s2 + $0x460] sm:$0xff] %vm5468_vm0, %v4878_v52  ;;  %v4881_v45 = vadd.f32 %v4880_v15, %v3695_v17  ;;  %v7285_v5 = vld [vmem:[#allocation2 + $0x9a8] ss:$12 sps:$4 sm:$0xff]   ;;  %v7289_v15 = vld [vmem:[#allocation2 + $0xcb0] ss:$12 sps:$4 sm:$0xff]  }
 0x363   :  { %5612 = vst.msk [vmem:[%s9418_s2 + $0x478] sm:$0xff] %vm5468_vm0, %v4889_v29  ;;  %3915 = vmatmul.mubr.bf16.gmra.mrb[136].mxu0 %v7260_v22  ;;  %6635 = vmatmul.mubr.bf16.gmra.mrb[136].mxu1 %v7264_v34 }
 0x364   :  { %5610 = vst.msk [vmem:[%s9418_s2 + $0x468] sm:$0xff] %vm5468_vm0, %v4881_v45  ;;  %3922 = vmatprep.mubr.bf16.mxu0 %v7267_v10  ;;  %6638 = vmatprep.mubr.bf16.mxu1 %v7268_v18 }
 0x366   :  { %v3708_v32 = vpop.f32.mrb[32].mxu0  ;;  %v6532_v7 = vpop.f32.mrb[32].mxu1 }
 0x367   :  { %v3710_v53 = vpop.f32.mrb[33].mxu0  ;;  %v4893_v4 = vpop.f32.mrb[33].mxu1 }
 0x368   :  { %v4894_v24 = vadd.f32 %v4893_v4, %v3708_v32  ;;  %v3711_v8 = vpop.f32.mrb[34].mxu0  ;;  %v6533_v11 = vpop.f32.mrb[34].mxu1  ;;  %v7293_v53 = vld [vmem:[#allocation2 + $0xcc8] ss:$12 sps:$4 sm:$0xff]  }
 0x369   :  { %v3713_v38 = vpop.f32.mrb[35].mxu0  ;;  %v4896_v13 = vpop.f32.mrb[35].mxu1 }
 0x36a   :  { %5613 = vst.msk [vmem:[%s9418_s2 + $0x480] sm:$0xff] %vm5468_vm0, %v4894_v24  ;;  %v4897_v19 = vadd.f32 %v4896_v13, %v3711_v8  ;;  %v7290_v38 = vld [vmem:[#allocation2 + $0x9c0] ss:$12 sps:$4 sm:$0xff]  }
 0x36b   :  { %3923 = vmatmul.mubr.bf16.gmra.mrb[140].mxu0 %v7265_v0  ;;  %6639 = vmatmul.mubr.bf16.gmra.mrb[140].mxu1 %v7269_v61  ;;  %v7294_v13 = vld [vmem:[#allocation2 + $0xce0] ss:$12 sps:$4 sm:$0xff]  }
 0x36c   :  { %5614 = vst.msk [vmem:[%s9418_s2 + $0x488] sm:$0xff] %vm5468_vm0, %v4897_v19  ;;  %3930 = vmatprep.mubr.bf16.mxu0 %v7272_v49  ;;  %6642 = vmatprep.mubr.bf16.mxu1 %v7273_v41 }
 0x36e   :  { %v3716_v3 = vpop.f32.mrb[36].mxu0  ;;  %v6536_v48 = vpop.f32.mrb[36].mxu1 }
 0x36f   :  { %v4902_v20 = vadd.f32 %v6532_v7, %v3716_v3  ;;  %v3718_v12 = vpop.f32.mrb[37].mxu0  ;;  %v4909_v33 = vpop.f32.mrb[37].mxu1  ;;  %v7292_v7 = vld [vmem:[#allocation2 + $0x9c4] ss:$12 sps:$4 sm:$0xff]  }
 0x370   :  { %v3719_v2 = vpop.f32.mrb[38].mxu0  ;;  %v6537_v30 = vpop.f32.mrb[38].mxu1 }
 0x371   :  { %5615 = vst.msk [vmem:[%s9418_s2 + $0x490] sm:$0xff] %vm5468_vm0, %v4902_v20  ;;  %v4905_v58 = vadd.f32 %v6533_v11, %v3719_v2  ;;  %v3721_v42 = vpop.f32.mrb[39].mxu0  ;;  %v4912_v44 = vpop.f32.mrb[39].mxu1  ;;  %v7298_v20 = vld [vmem:[#allocation2 + $0xcf8] ss:$12 sps:$4 sm:$0xff]  }
 0x372   :  { %v7299_v42 = vld [vmem:[#allocation2 + $0xd10] ss:$12 sps:$4 sm:$0xff]  }
 0x373   :  { %5616 = vst.msk [vmem:[%s9418_s2 + $0x498] sm:$0xff] %vm5468_vm0, %v4905_v58  ;;  %3931 = vmatmul.mubr.bf16.gmra.mrb[144].mxu0 %v7270_v6  ;;  %6643 = vmatmul.mubr.bf16.gmra.mrb[144].mxu1 %v7274_v60  ;;  %v7295_v58 = vld [vmem:[#allocation2 + $0x9d8] ss:$12 sps:$4 sm:$0xff]  }
 0x374   :  { %3938 = vmatprep.mubr.bf16.mxu0 %v7277_v63  ;;  %6646 = vmatprep.mubr.bf16.mxu1 %v7278_v36 }
 0x376   :  { %v3724_v43 = vpop.f32.mrb[40].mxu0  ;;  %v6540_v28 = vpop.f32.mrb[40].mxu1 }
 0x377   :  { %v4910_v37 = vadd.f32 %v4909_v33, %v3724_v43  ;;  %v3726_v39 = vpop.f32.mrb[41].mxu0  ;;  %v4925_v27 = vpop.f32.mrb[41].mxu1 }
 0x378   :  { %v3727_v59 = vpop.f32.mrb[42].mxu0  ;;  %v8607_v14 = vpop.f32.mrb[42].mxu1 }
 0x379   :  { %5617 = vst.msk [vmem:[%s9418_s2 + $0x4a0] sm:$0xff] %vm5468_vm0, %v4910_v37  ;;  %v4913_v25 = vadd.f32 %v4912_v44, %v3727_v59  ;;  %v3729_v17 = vpop.f32.mrb[43].mxu0  ;;  %v4928_v51 = vpop.f32.mrb[43].mxu1  ;;  %v7303_v37 = vld [vmem:[#allocation2 + $0xd28] ss:$12 sps:$4 sm:$0xff]  }
 0x37a   :  { %v7304_v17 = vld [vmem:[#allocation2 + $0xd40] ss:$12 sps:$4 sm:$0xff]  }
 0x37b   :  { %5618 = vst.msk [vmem:[%s9418_s2 + $0x4a8] sm:$0xff] %vm5468_vm0, %v4913_v25  ;;  %3939 = vmatmul.mubr.bf16.gmra.mrb[148].mxu0 %v7275_v31  ;;  %6647 = vmatmul.mubr.bf16.gmra.mrb[148].mxu1 %v7279_v47  ;;  %v7300_v25 = vld [vmem:[#allocation2 + $0x9f0] ss:$12 sps:$4 sm:$0xff]  }
 0x37c   :  { %3946 = vmatprep.mubr.bf16.mxu0 %v7282_v50  ;;  %6650 = vmatprep.mubr.bf16.mxu1 %v7283_v55 }
 0x37e   :  { %v3732_v40 = vpop.f32.mrb[44].mxu0  ;;  %v8617_v16 = vpop.f32.mrb[44].mxu1 }
 0x37f   :  { %v4918_v35 = vadd.f32 %v6536_v48, %v3732_v40  ;;  %v3734_v56 = vpop.f32.mrb[45].mxu0  ;;  %v4941_v57 = vpop.f32.mrb[45].mxu1  ;;  %v7297_v48 = vld [vmem:[#allocation2 + $0x9dc] ss:$12 sps:$4 sm:$0xff]  }
 0x380   :  { %v3735_v62 = vpop.f32.mrb[46].mxu0  ;;  %v8619_v9 = vpop.f32.mrb[46].mxu1  ;;  %v7308_v56 = vld [vmem:[#allocation2 + $0xd58] ss:$12 sps:$4 sm:$0xff]  }
 0x381   :  { %5619 = vst.msk [vmem:[%s9418_s2 + $0x4b0] sm:$0xff] %vm5468_vm0, %v4918_v35  ;;  %v4921_v22 = vadd.f32 %v6537_v30, %v3735_v62  ;;  %v3737_v34 = vpop.f32.mrb[47].mxu0  ;;  %v4944_v52 = vpop.f32.mrb[47].mxu1  ;;  %v7307_v35 = vld [vmem:[#allocation2 + $0xa0c] ss:$12 sps:$4 sm:$0xff]  }
 0x382   :  { %v7309_v34 = vld [vmem:[#allocation2 + $0xd70] ss:$12 sps:$4 sm:$0xff]  }
 0x383   :  { %5620 = vst.msk [vmem:[%s9418_s2 + $0x4b8] sm:$0xff] %vm5468_vm0, %v4921_v22  ;;  %3947 = vmatmul.mubr.bf16.gmra.mrb[152].mxu0 %v7280_v54  ;;  %6651 = vmatmul.mubr.bf16.gmra.mrb[152].mxu1 %v7284_v26 }
 0x384   :  { %3954 = vmatprep.mubr.bf16.mxu0 %v7287_v1  ;;  %6654 = vmatprep.mubr.bf16.mxu1 %v7288_v21 }
 0x386   :  { %v3740_v46 = vpop.f32.mrb[48].mxu0  ;;  %v8629_v23 = vpop.f32.mrb[48].mxu1 }
 0x387   :  { %v4926_v10 = vadd.f32 %v4925_v27, %v3740_v46  ;;  %v3742_v18 = vpop.f32.mrb[49].mxu0  ;;  %v8631_v29 = vpop.f32.mrb[49].mxu1 }
 0x388   :  { %v3743_v45 = vpop.f32.mrb[50].mxu0  ;;  %v8633_v32 = vpop.f32.mrb[50].mxu1 }
 0x389   :  { %5621 = vst.msk [vmem:[%s9418_s2 + $0x4c0] sm:$0xff] %vm5468_vm0, %v4926_v10  ;;  %v4929_v4 = vadd.f32 %v4928_v51, %v3743_v45  ;;  %v3745_v0 = vpop.f32.mrb[51].mxu0  ;;  %v8639_v61 = vpop.f32.mrb[51].mxu1 }
 0x38b   :  { %5622 = vst.msk [vmem:[%s9418_s2 + $0x4c8] sm:$0xff] %vm5468_vm0, %v4929_v4  ;;  %3955 = vmatmul.mubr.bf16.gmra.mrb[156].mxu0 %v7285_v5  ;;  %6655 = vmatmul.mubr.bf16.gmra.mrb[156].mxu1 %v7289_v15 }
 0x38c   :  { %3962 = vmatprep.mubr.bf16.mxu0 %v7292_v7  ;;  %6658 = vmatprep.mubr.bf16.mxu1 %v7293_v53 }
 0x38e   :  { %v3748_v24 = vpop.f32.mrb[52].mxu0  ;;  %v8645_v8 = vpop.f32.mrb[52].mxu1 }
 0x38f   :  { %v4934_v11 = vadd.f32 %v6540_v28, %v3748_v24  ;;  %v3750_v49 = vpop.f32.mrb[53].mxu0  ;;  %v8647_v41 = vpop.f32.mrb[53].mxu1  ;;  %v7302_v28 = vld [vmem:[#allocation2 + $0x9f4] ss:$12 sps:$4 sm:$0xff]  }
 0x390   :  { %v3751_v19 = vpop.f32.mrb[54].mxu0  ;;  %v8649_v3 = vpop.f32.mrb[54].mxu1 }
 0x391   :  { %5623 = vst.msk [vmem:[%s9418_s2 + $0x4d0] sm:$0xff] %vm5468_vm0, %v4934_v11  ;;  %v4937_v12 = vadd.f32 %v8607_v14, %v3751_v19  ;;  %v3753_v33 = vpop.f32.mrb[55].mxu0  ;;  %v8656_v6 = vpop.f32.mrb[55].mxu1 }
 0x393   :  { %5624 = vst.msk [vmem:[%s9418_s2 + $0x4d8] sm:$0xff] %vm5468_vm0, %v4937_v12  ;;  %3963 = vmatmul.mubr.bf16.gmra.mrb[160].mxu0 %v7290_v38  ;;  %6659 = vmatmul.mubr.bf16.gmra.mrb[160].mxu1 %v7294_v13 }
 0x394   :  { %3970 = vmatprep.mubr.bf16.mxu0 %v7297_v48  ;;  %6662 = vmatprep.mubr.bf16.mxu1 %v7298_v20 }
 0x396   :  { %v3756_v60 = vpop.f32.mrb[56].mxu0  ;;  %v8662_v2 = vpop.f32.mrb[56].mxu1 }
 0x397   :  { %v4942_v30 = vadd.f32 %v4941_v57, %v3756_v60  ;;  %v3758_v63 = vpop.f32.mrb[57].mxu0  ;;  %v8664_v36 = vpop.f32.mrb[57].mxu1 }
 0x398   :  { %v3759_v44 = vpop.f32.mrb[58].mxu0  ;;  %v8666_v43 = vpop.f32.mrb[58].mxu1 }
 0x399   :  { %5625 = vst.msk [vmem:[%s9418_s2 + $0x4e0] sm:$0xff] %vm5468_vm0, %v4942_v30  ;;  %v4945_v39 = vadd.f32 %v4944_v52, %v3759_v44  ;;  %v3761_v27 = vpop.f32.mrb[59].mxu0  ;;  %v8672_v31 = vpop.f32.mrb[59].mxu1 }
 0x39b   :  { %5626 = vst.msk [vmem:[%s9418_s2 + $0x4e8] sm:$0xff] %vm5468_vm0, %v4945_v39  ;;  %3971 = vmatmul.mubr.bf16.gmra.mrb[164].mxu0 %v7295_v58  ;;  %6663 = vmatmul.mubr.bf16.gmra.mrb[164].mxu1 %v7299_v42 }
 0x39c   :  { %3978 = vmatprep.mubr.bf16.mxu0 %v7302_v28  ;;  %6666 = vmatprep.mubr.bf16.mxu1 %v7303_v37 }
 0x39e   :  { %v3764_v47 = vpop.f32.mrb[60].mxu0  ;;  %v8678_v59 = vpop.f32.mrb[60].mxu1 }
 0x39f   :  { %v4950_v14 = vadd.f32 %v8617_v16, %v3764_v47  ;;  %v3766_v50 = vpop.f32.mrb[61].mxu0  ;;  %v8681_v55 = vpop.f32.mrb[61].mxu1 }
 0x3a0   :  { %v3767_v51 = vpop.f32.mrb[62].mxu0  ;;  %v8683_v40 = vpop.f32.mrb[62].mxu1 }
 0x3a1   :  { %5627 = vst.msk [vmem:[%s9418_s2 + $0x4f0] sm:$0xff] %vm5468_vm0, %v4950_v14  ;;  %v4953_v57 = vadd.f32 %v8619_v9, %v3767_v51  ;;  %v3769_v54 = vpop.f32.mrb[63].mxu0  ;;  %v8690_v26 = vpop.f32.mrb[63].mxu1  ;;  %v7305_v9 = vld [vmem:[#allocation2 + $0xa08] ss:$12 sps:$4 sm:$0xff]  }
 0x3a3   :  { %5628 = vst.msk [vmem:[%s9418_s2 + $0x4f8] sm:$0xff] %vm5468_vm0, %v4953_v57  ;;  %3979 = vmatmul.mubr.bf16.gmra.mrb[168].mxu0 %v7300_v25  ;;  %6667 = vmatmul.mubr.bf16.gmra.mrb[168].mxu1 %v7304_v17 }
 0x3a4   :  { %3986 = vmatprep.mubr.bf16.mxu0 %v7307_v35  ;;  %6670 = vmatprep.mubr.bf16.mxu1 %v7308_v56 }
 0x3a6   :  { %v3772_v16 = vpop.f32.mrb[64].mxu0  ;;  %v8696_v62 = vpop.f32.mrb[64].mxu1 }
 0x3a7   :  { %v4958_v1 = vadd.f32 %v8631_v29, %v3772_v16  ;;  %v3774_v21 = vpop.f32.mrb[65].mxu0  ;;  %v8699_v22 = vpop.f32.mrb[65].mxu1 }
 0x3a8   :  { %v3775_v52 = vpop.f32.mrb[66].mxu0  ;;  %v8701_v46 = vpop.f32.mrb[66].mxu1 }
 0x3a9   :  { %5629 = vst.msk [vmem:[%s9418_s2 + $0x500] sm:$0xff] %vm5468_vm0, %v4958_v1  ;;  %v4961_v10 = vadd.f32 %v8639_v61, %v3775_v52  ;;  %v3777_v18 = vpop.f32.mrb[67].mxu0  ;;  %v8708_v5 = vpop.f32.mrb[67].mxu1 }
 0x3ab   :  { %5630 = vst.msk [vmem:[%s9418_s2 + $0x508] sm:$0xff] %vm5468_vm0, %v4961_v10  ;;  %3987 = vmatmul.mubr.bf16.gmra.mrb[172].mxu0 %v7305_v9  ;;  %6671 = vmatmul.mubr.bf16.gmra.mrb[172].mxu1 %v7309_v34 }
 0x3ae   :  { %v3780_v29 = vpop.f32.mrb[68].mxu0  ;;  %v8714_v15 = vpop.f32.mrb[68].mxu1 }
 0x3af   :  { %v4966_v45 = vadd.f32 %v8629_v23, %v3780_v29  ;;  %v3782_v7 = vpop.f32.mrb[69].mxu0  ;;  %v8717_v53 = vpop.f32.mrb[69].mxu1 }
 0x3b0   :  { %v3783_v4 = vpop.f32.mrb[70].mxu0  ;;  %v8719_v0 = vpop.f32.mrb[70].mxu1 }
 0x3b1   :  { %5631 = vst.msk [vmem:[%s9418_s2 + $0x510] sm:$0xff] %vm5468_vm0, %v4966_v45  ;;  %v4969_v61 = vadd.f32 %v8633_v32, %v3783_v4  ;;  %v3785_v24 = vpop.f32.mrb[71].mxu0  ;;  %v8726_v11 = vpop.f32.mrb[71].mxu1 }
 0x3b3   :  { %5632 = vst.msk [vmem:[%s9418_s2 + $0x518] sm:$0xff] %vm5468_vm0, %v4969_v61 }
 0x3b6   :  { %v3788_v23 = vpop.f32.mrb[72].mxu0  ;;  %v8732_v49 = vpop.f32.mrb[72].mxu1 }
 0x3b7   :  { %v4974_v38 = vadd.f32 %v8647_v41, %v3788_v23  ;;  %v3790_v13 = vpop.f32.mrb[73].mxu0  ;;  %v8735_v19 = vpop.f32.mrb[73].mxu1 }
 0x3b8   :  { %v3791_v48 = vpop.f32.mrb[74].mxu0  ;;  %v8737_v20 = vpop.f32.mrb[74].mxu1 }
 0x3b9   :  { %5633 = vst.msk [vmem:[%s9418_s2 + $0x520] sm:$0xff] %vm5468_vm0, %v4974_v38  ;;  %v4977_v32 = vadd.f32 %v8656_v6, %v3791_v48  ;;  %v3793_v12 = vpop.f32.mrb[75].mxu0  ;;  %v8744_v33 = vpop.f32.mrb[75].mxu1 }
 0x3bb   :  { %5634 = vst.msk [vmem:[%s9418_s2 + $0x528] sm:$0xff] %vm5468_vm0, %v4977_v32 }
 0x3be   :  { %v3796_v41 = vpop.f32.mrb[76].mxu0  ;;  %v8750_v60 = vpop.f32.mrb[76].mxu1 }
 0x3bf   :  { %v4982_v30 = vadd.f32 %v8645_v8, %v3796_v41  ;;  %v3798_v63 = vpop.f32.mrb[77].mxu0  ;;  %v8753_v58 = vpop.f32.mrb[77].mxu1 }
 0x3c0   :  { %v3799_v42 = vpop.f32.mrb[78].mxu0  ;;  %v8755_v44 = vpop.f32.mrb[78].mxu1 }
 0x3c1   :  { %5635 = vst.msk [vmem:[%s9418_s2 + $0x530] sm:$0xff] %vm5468_vm0, %v4982_v30  ;;  %v4985_v6 = vadd.f32 %v8649_v3, %v3799_v42  ;;  %v3801_v28 = vpop.f32.mrb[79].mxu0  ;;  %v8762_v37 = vpop.f32.mrb[79].mxu1 }
 0x3c3   :  { %5636 = vst.msk [vmem:[%s9418_s2 + $0x538] sm:$0xff] %vm5468_vm0, %v4985_v6 }
 0x3c6   :  { %v3804_v8 = vpop.f32.mrb[80].mxu0  ;;  %v8768_v39 = vpop.f32.mrb[80].mxu1 }
 0x3c7   :  { %v4990_v27 = vadd.f32 %v8664_v36, %v3804_v8  ;;  %v3806_v47 = vpop.f32.mrb[81].mxu0  ;;  %v8771_v14 = vpop.f32.mrb[81].mxu1 }
 0x3c8   :  { %v3807_v50 = vpop.f32.mrb[82].mxu0  ;;  %v8773_v25 = vpop.f32.mrb[82].mxu1 }
 0x3c9   :  { %5637 = vst.msk [vmem:[%s9418_s2 + $0x540] sm:$0xff] %vm5468_vm0, %v4990_v27  ;;  %v4993_v3 = vadd.f32 %v8672_v31, %v3807_v50  ;;  %v3809_v17 = vpop.f32.mrb[83].mxu0  ;;  %v8780_v51 = vpop.f32.mrb[83].mxu1 }
 0x3cb   :  { %5638 = vst.msk [vmem:[%s9418_s2 + $0x548] sm:$0xff] %vm5468_vm0, %v4993_v3 }
 0x3ce   :  { %v3812_v36 = vpop.f32.mrb[84].mxu0  ;;  %v8786_v35 = vpop.f32.mrb[84].mxu1 }
 0x3cf   :  { %v4998_v56 = vadd.f32 %v8662_v2, %v3812_v36  ;;  %v3814_v57 = vpop.f32.mrb[85].mxu0  ;;  %v8789_v54 = vpop.f32.mrb[85].mxu1 }
 0x3d0   :  { %v3815_v16 = vpop.f32.mrb[86].mxu0  ;;  %v8791_v1 = vpop.f32.mrb[86].mxu1 }
 0x3d1   :  { %5639 = vst.msk [vmem:[%s9418_s2 + $0x550] sm:$0xff] %vm5468_vm0, %v4998_v56  ;;  %v5001_v31 = vadd.f32 %v8666_v43, %v3815_v16  ;;  %v3817_v21 = vpop.f32.mrb[87].mxu0  ;;  %v8798_v9 = vpop.f32.mrb[87].mxu1 }
 0x3d3   :  { %5640 = vst.msk [vmem:[%s9418_s2 + $0x558] sm:$0xff] %vm5468_vm0, %v5001_v31 }
 0x3d6   :  { %v3820_v2 = vpop.f32.mrb[88].mxu0  ;;  %v8804_v34 = vpop.f32.mrb[88].mxu1 }
 0x3d7   :  { %v5006_v52 = vadd.f32 %v8681_v55, %v3820_v2  ;;  %v3822_v10 = vpop.f32.mrb[89].mxu0  ;;  %v8807_v18 = vpop.f32.mrb[89].mxu1  ;;  %v9537_v2 = vld [vmem:[#allocation7_spill] sm:$0xff] }
 0x3d8   :  { %v3823_v29 = vpop.f32.mrb[90].mxu0  ;;  %v8809_v45 = vpop.f32.mrb[90].mxu1 }
 0x3d9   :  { %5641 = vst.msk [vmem:[%s9418_s2 + $0x560] sm:$0xff] %vm5468_vm0, %v5006_v52  ;;  %v5009_v43 = vadd.f32 %v8690_v26, %v3823_v29  ;;  %v3825_v7 = vpop.f32.mrb[91].mxu0  ;;  %v8816_v4 = vpop.f32.mrb[91].mxu1 }
 0x3db   :  { %5642 = vst.msk [vmem:[%s9418_s2 + $0x568] sm:$0xff] %vm5468_vm0, %v5009_v43  ;;  %v9538_v43 = vld [vmem:[#allocation5_spill] sm:$0xff] }
 0x3de   :  { %v3828_v55 = vpop.f32.mrb[92].mxu0  ;;  %v8822_v61 = vpop.f32.mrb[92].mxu1 }
 0x3df   :  { %v5014_v24 = vadd.f32 %v8678_v59, %v3828_v55  ;;  %v3830_v23 = vpop.f32.mrb[93].mxu0  ;;  %v8825_v38 = vpop.f32.mrb[93].mxu1 }
 0x3e0   :  { %v3831_v13 = vpop.f32.mrb[94].mxu0  ;;  %v8827_v48 = vpop.f32.mrb[94].mxu1 }
 0x3e1   :  { %5643 = vst.msk [vmem:[%s9418_s2 + $0x570] sm:$0xff] %vm5468_vm0, %v5014_v24  ;;  %v5017_v26 = vadd.f32 %v8683_v40, %v3831_v13  ;;  %v3833_v32 = vpop.f32.mrb[95].mxu0  ;;  %v8834_v12 = vpop.f32.mrb[95].mxu1  ;;  %v9539_v24 = vld [vmem:[#allocation8_spill] sm:$0xff] }
 0x3e2   :  { %v9540_v32 = vld [vmem:[#allocation6_spill] sm:$0xff] }
 0x3e3   :  { %5644 = vst.msk [vmem:[%s9418_s2 + $0x578] sm:$0xff] %vm5468_vm0, %v5017_v26 }
 0x3e6   :  { %v3836_v59 = vpop.f32.mrb[96].mxu0  ;;  %v8840_v41 = vpop.f32.mrb[96].mxu1 }
 0x3e7   :  { %v5022_v30 = vadd.f32 %v8699_v22, %v3836_v59  ;;  %v3838_v63 = vpop.f32.mrb[97].mxu0  ;;  %v8843_v42 = vpop.f32.mrb[97].mxu1 }
 0x3e8   :  { %v3839_v6 = vpop.f32.mrb[98].mxu0  ;;  %v8845_v28 = vpop.f32.mrb[98].mxu1 }
 0x3e9   :  { %5645 = vst.msk [vmem:[%s9418_s2 + $0x580] sm:$0xff] %vm5468_vm0, %v5022_v30  ;;  %v5025_v40 = vadd.f32 %v8708_v5, %v3839_v6  ;;  %v3841_v8 = vpop.f32.mrb[99].mxu0  ;;  %v8852_v27 = vpop.f32.mrb[99].mxu1  ;;  %v9541_v6 = vld [vmem:[#allocation11_spill] sm:$0xff] }
 0x3eb   :  { %5646 = vst.msk [vmem:[%s9418_s2 + $0x588] sm:$0xff] %vm5468_vm0, %v5025_v40 }
 0x3ee   :  { %v3844_v22 = vpop.f32.mrb[100].mxu0  ;;  %v8858_v47 = vpop.f32.mrb[100].mxu1 }
 0x3ef   :  { %v5030_v50 = vadd.f32 %v8696_v62, %v3844_v22  ;;  %v3846_v3 = vpop.f32.mrb[101].mxu0  ;;  %v8861_v17 = vpop.f32.mrb[101].mxu1 }
 0x3f0   :  { %v3847_v36 = vpop.f32.mrb[102].mxu0  ;;  %v8863_v56 = vpop.f32.mrb[102].mxu1 }
 0x3f1   :  { %5647 = vst.msk [vmem:[%s9418_s2 + $0x590] sm:$0xff] %vm5468_vm0, %v5030_v50  ;;  %v5033_v5 = vadd.f32 %v8701_v46, %v3847_v36  ;;  %v3849_v57 = vpop.f32.mrb[103].mxu0  ;;  %v8870_v16 = vpop.f32.mrb[103].mxu1  ;;  %v9542_v50 = vld [vmem:[#allocation9_spill] sm:$0xff] }
 0x3f2   :  { %v9543_v57 = vld [vmem:[#allocation12_spill] sm:$0xff] }
 0x3f3   :  { %5648 = vst.msk [vmem:[%s9418_s2 + $0x598] sm:$0xff] %vm5468_vm0, %v5033_v5 }
 0x3f6   :  { %v3852_v62 = vpop.f32.mrb[104].mxu0  ;;  %v6604_v31 = vpop.f32.mrb[104].mxu1 }
 0x3f7   :  { %v5038_v21 = vadd.f32 %v8717_v53, %v3852_v62  ;;  %v5190_v52 = vadd.f32 %v6604_v31, %v9537_v2  ;;  %v3854_v10 = vpop.f32.mrb[105].mxu0  ;;  %v5181_v29 = vpop.f32.mrb[105].mxu1  ;;  %v9544_v2 = vld [vmem:[#allocation10_spill] sm:$0xff] }
 0x3f8   :  { %v5182_v7 = vadd.f32 %v5181_v29, %v9538_v43  ;;  %v3855_v55 = vpop.f32.mrb[106].mxu0  ;;  %v6605_v46 = vpop.f32.mrb[106].mxu1  ;;  %v9545_v43 = vld [vmem:[#allocation15_spill] sm:$0xff] }
 0x3f9   :  { %5649 = vst.msk [vmem:[%s9418_s2 + $0x5a0] sm:$0xff] %vm5468_vm0, %v5038_v21  ;;  %5687 = vst.msk [vmem:[%s9418_s2 + $0x6d0] sm:$0xff] %vm5468_vm0, %v5190_v52  ;;  %v5041_v53 = vadd.f32 %v8726_v11, %v3855_v55  ;;  %v5193_v23 = vadd.f32 %v6605_v46, %v9539_v24  ;;  %v3857_v13 = vpop.f32.mrb[107].mxu0  ;;  %v5184_v26 = vpop.f32.mrb[107].mxu1 }
 0x3fa   :  { %5685 = vst.msk [vmem:[%s9418_s2 + $0x6c0] sm:$0xff] %vm5468_vm0, %v5182_v7  ;;  %v5185_v59 = vadd.f32 %v5184_v26, %v9540_v32  ;;  %v9547_v26 = vld [vmem:[#allocation16_spill] sm:$0xff] }
 0x3fb   :  { %5650 = vst.msk [vmem:[%s9418_s2 + $0x5a8] sm:$0xff] %vm5468_vm0, %v5041_v53  ;;  %5688 = vst.msk [vmem:[%s9418_s2 + $0x6d8] sm:$0xff] %vm5468_vm0, %v5193_v23  ;;  %v9546_v53 = vld [vmem:[#allocation13_spill] sm:$0xff] }
 0x3fc   :  { %5686 = vst.msk [vmem:[%s9418_s2 + $0x6c8] sm:$0xff] %vm5468_vm0, %v5185_v59 }
 0x3fe   :  { %v3860_v11 = vpop.f32.mrb[108].mxu0  ;;  %v6608_v30 = vpop.f32.mrb[108].mxu1 }
 0x3ff   :  { %v5046_v63 = vadd.f32 %v8714_v15, %v3860_v11  ;;  %v5206_v40 = vadd.f32 %v6608_v30, %v9541_v6  ;;  %v3862_v8 = vpop.f32.mrb[109].mxu0  ;;  %v5197_v22 = vpop.f32.mrb[109].mxu1  ;;  %v9548_v30 = vld [vmem:[#allocation14_spill] sm:$0xff] }
 0x400   :  { %v5198_v3 = vadd.f32 %v5197_v22, %v9542_v50  ;;  %v3863_v36 = vpop.f32.mrb[110].mxu0  ;;  %v6609_v5 = vpop.f32.mrb[110].mxu1  ;;  %v9549_v8 = vld [vmem:[#allocation19_spill] sm:$0xff] }
 0x401   :  { %5651 = vst.msk [vmem:[%s9418_s2 + $0x5b0] sm:$0xff] %vm5468_vm0, %v5046_v63  ;;  %5691 = vst.msk [vmem:[%s9418_s2 + $0x6f0] sm:$0xff] %vm5468_vm0, %v5206_v40  ;;  %v5049_v15 = vadd.f32 %v8719_v0, %v3863_v36  ;;  %v5209_v62 = vadd.f32 %v6609_v5, %v9543_v57  ;;  %v3865_v31 = vpop.f32.mrb[111].mxu0  ;;  %v5200_v21 = vpop.f32.mrb[111].mxu1  ;;  %v9550_v36 = vld [vmem:[#allocation17_spill] sm:$0xff] }
 0x402   :  { %5689 = vst.msk [vmem:[%s9418_s2 + $0x6e0] sm:$0xff] %vm5468_vm0, %v5198_v3  ;;  %v5201_v52 = vadd.f32 %v5200_v21, %v9544_v2 }
 0x403   :  { %5652 = vst.msk [vmem:[%s9418_s2 + $0x5b8] sm:$0xff] %vm5468_vm0, %v5049_v15  ;;  %5692 = vst.msk [vmem:[%s9418_s2 + $0x6f8] sm:$0xff] %vm5468_vm0, %v5209_v62  ;;  %v9551_v62 = vld [vmem:[#allocation20_spill] sm:$0xff] }
 0x404   :  { %5690 = vst.msk [vmem:[%s9418_s2 + $0x6e8] sm:$0xff] %vm5468_vm0, %v5201_v52  ;;  %v9552_v52 = vld [vmem:[#allocation18_spill] sm:$0xff] }
 0x406   :  { %v3868_v0 = vpop.f32.mrb[112].mxu0  ;;  %v6612_v10 = vpop.f32.mrb[112].mxu1 }
 0x407   :  { %v5054_v29 = vadd.f32 %v8735_v19, %v3868_v0  ;;  %v5222_v7 = vadd.f32 %v6612_v10, %v9545_v43  ;;  %v3870_v55 = vpop.f32.mrb[113].mxu0  ;;  %v5213_v46 = vpop.f32.mrb[113].mxu1  ;;  %v9553_v43 = vld [vmem:[#allocation23_spill] sm:$0xff] }
 0x408   :  { %v5214_v24 = vadd.f32 %v5213_v46, %v9546_v53  ;;  %v3871_v23 = vpop.f32.mrb[114].mxu0  ;;  %v6613_v13 = vpop.f32.mrb[114].mxu1  ;;  %v9554_v53 = vld [vmem:[#allocation21_spill] sm:$0xff] }
 0x409   :  { %5653 = vst.msk [vmem:[%s9418_s2 + $0x5c0] sm:$0xff] %vm5468_vm0, %v5054_v29  ;;  %5695 = vst.msk [vmem:[%s9418_s2 + $0x710] sm:$0xff] %vm5468_vm0, %v5222_v7  ;;  %v5057_v19 = vadd.f32 %v8744_v33, %v3871_v23  ;;  %v5225_v32 = vadd.f32 %v6613_v13, %v9547_v26  ;;  %v3873_v59 = vpop.f32.mrb[115].mxu0  ;;  %v5216_v11 = vpop.f32.mrb[115].mxu1 }
 0x40a   :  { %5693 = vst.msk [vmem:[%s9418_s2 + $0x700] sm:$0xff] %vm5468_vm0, %v5214_v24  ;;  %v5217_v63 = vadd.f32 %v5216_v11, %v9548_v30  ;;  %v9556_v11 = vld [vmem:[#allocation22_spill] sm:$0xff] }
 0x40b   :  { %5654 = vst.msk [vmem:[%s9418_s2 + $0x5c8] sm:$0xff] %vm5468_vm0, %v5057_v19  ;;  %5696 = vst.msk [vmem:[%s9418_s2 + $0x718] sm:$0xff] %vm5468_vm0, %v5225_v32  ;;  %v9555_v19 = vld [vmem:[#allocation24_spill] sm:$0xff] }
 0x40c   :  { %5694 = vst.msk [vmem:[%s9418_s2 + $0x708] sm:$0xff] %vm5468_vm0, %v5217_v63 }
 0x40e   :  { %v3876_v33 = vpop.f32.mrb[116].mxu0  ;;  %v6616_v6 = vpop.f32.mrb[116].mxu1 }
 0x40f   :  { %v5062_v40 = vadd.f32 %v8732_v49, %v3876_v33  ;;  %v5238_v22 = vadd.f32 %v6616_v6, %v9549_v8  ;;  %v3878_v50 = vpop.f32.mrb[117].mxu0  ;;  %v5229_v3 = vpop.f32.mrb[117].mxu1  ;;  %v9557_v6 = vld [vmem:[#allocation27_spill] sm:$0xff] }
 0x410   :  { %v5230_v5 = vadd.f32 %v5229_v3, %v9550_v36  ;;  %v3879_v15 = vpop.f32.mrb[118].mxu0  ;;  %v6617_v57 = vpop.f32.mrb[118].mxu1  ;;  %v9558_v50 = vld [vmem:[#allocation25_spill] sm:$0xff] }
 0x411   :  { %5655 = vst.msk [vmem:[%s9418_s2 + $0x5d0] sm:$0xff] %vm5468_vm0, %v5062_v40  ;;  %5699 = vst.msk [vmem:[%s9418_s2 + $0x730] sm:$0xff] %vm5468_vm0, %v5238_v22  ;;  %v5065_v49 = vadd.f32 %v8737_v20, %v3879_v15  ;;  %v5241_v31 = vadd.f32 %v6617_v57, %v9551_v62  ;;  %v3881_v21 = vpop.f32.mrb[119].mxu0  ;;  %v5232_v2 = vpop.f32.mrb[119].mxu1  ;;  %v9559_v15 = vld [vmem:[#allocation28_spill] sm:$0xff] }
 0x412   :  { %5697 = vst.msk [vmem:[%s9418_s2 + $0x720] sm:$0xff] %vm5468_vm0, %v5230_v5  ;;  %v5233_v0 = vadd.f32 %v5232_v2, %v9552_v52 }
 0x413   :  { %5656 = vst.msk [vmem:[%s9418_s2 + $0x5d8] sm:$0xff] %vm5468_vm0, %v5065_v49  ;;  %5700 = vst.msk [vmem:[%s9418_s2 + $0x738] sm:$0xff] %vm5468_vm0, %v5241_v31  ;;  %v9560_v31 = vld [vmem:[#allocation26_spill] sm:$0xff] }
 0x414   :  { %5698 = vst.msk [vmem:[%s9418_s2 + $0x728] sm:$0xff] %vm5468_vm0, %v5233_v0  ;;  %v9561_v0 = vld [vmem:[#allocation31_spill] sm:$0xff] }
 0x416   :  { %v3884_v20 = vpop.f32.mrb[120].mxu0  ;;  %v6620_v10 = vpop.f32.mrb[120].mxu1 }
 0x417   :  { %v5070_v29 = vadd.f32 %v8753_v58, %v3884_v20  ;;  %v5254_v7 = vadd.f32 %v6620_v10, %v9553_v43  ;;  %v3886_v55 = vpop.f32.mrb[121].mxu0  ;;  %v5245_v46 = vpop.f32.mrb[121].mxu1  ;;  %v9562_v43 = vld [vmem:[#allocation29_spill] sm:$0xff] }
 0x418   :  { %v5246_v24 = vadd.f32 %v5245_v46, %v9554_v53  ;;  %v3887_v23 = vpop.f32.mrb[122].mxu0  ;;  %v6621_v13 = vpop.f32.mrb[122].mxu1  ;;  %v9563_v53 = vld [vmem:[#allocation32_spill] sm:$0xff] }
 0x419   :  { %5657 = vst.msk [vmem:[%s9418_s2 + $0x5e0] sm:$0xff] %vm5468_vm0, %v5070_v29  ;;  %5703 = vst.msk [vmem:[%s9418_s2 + $0x750] sm:$0xff] %vm5468_vm0, %v5254_v7  ;;  %v5073_v58 = vadd.f32 %v8762_v37, %v3887_v23  ;;  %v5257_v26 = vadd.f32 %v6621_v13, %v9555_v19  ;;  %v3889_v32 = vpop.f32.mrb[123].mxu0  ;;  %v5248_v59 = vpop.f32.mrb[123].mxu1 }
 0x41a   :  { %5701 = vst.msk [vmem:[%s9418_s2 + $0x740] sm:$0xff] %vm5468_vm0, %v5246_v24  ;;  %v5249_v30 = vadd.f32 %v5248_v59, %v9556_v11  ;;  %v9565_v59 = vld [vmem:[#allocation35_spill] sm:$0xff] }
 0x41b   :  { %5658 = vst.msk [vmem:[%s9418_s2 + $0x5e8] sm:$0xff] %vm5468_vm0, %v5073_v58  ;;  %5704 = vst.msk [vmem:[%s9418_s2 + $0x758] sm:$0xff] %vm5468_vm0, %v5257_v26  ;;  %v9564_v58 = vld [vmem:[#allocation30_spill] sm:$0xff] }
 0x41c   :  { %5702 = vst.msk [vmem:[%s9418_s2 + $0x748] sm:$0xff] %vm5468_vm0, %v5249_v30 }
 0x41e   :  { %v3892_v37 = vpop.f32.mrb[124].mxu0  ;;  %v6624_v63 = vpop.f32.mrb[124].mxu1 }
 0x41f   :  { %v5078_v33 = vadd.f32 %v8750_v60, %v3892_v37  ;;  %v5270_v40 = vadd.f32 %v6624_v63, %v9557_v6  ;;  %v3894_v8 = vpop.f32.mrb[125].mxu0  ;;  %v5261_v22 = vpop.f32.mrb[125].mxu1  ;;  %v9566_v63 = vld [vmem:[#allocation33_spill] sm:$0xff] }
 0x420   :  { %v5262_v3 = vadd.f32 %v5261_v22, %v9558_v50  ;;  %v3895_v36 = vpop.f32.mrb[126].mxu0  ;;  %v6625_v5 = vpop.f32.mrb[126].mxu1  ;;  %v9567_v8 = vld [vmem:[#allocation36_spill] sm:$0xff] }
 0x421   :  { %5659 = vst.msk [vmem:[%s9418_s2 + $0x5f0] sm:$0xff] %vm5468_vm0, %v5078_v33  ;;  %5707 = vst.msk [vmem:[%s9418_s2 + $0x770] sm:$0xff] %vm5468_vm0, %v5270_v40  ;;  %v5081_v60 = vadd.f32 %v8755_v44, %v3895_v36  ;;  %v5273_v57 = vadd.f32 %v6625_v5, %v9559_v15  ;;  %v3897_v49 = vpop.f32.mrb[127].mxu0  ;;  %v5264_v62 = vpop.f32.mrb[127].mxu1  ;;  %v9568_v36 = vld [vmem:[#allocation34_spill] sm:$0xff] }
 0x422   :  { %5705 = vst.msk [vmem:[%s9418_s2 + $0x760] sm:$0xff] %vm5468_vm0, %v5262_v3  ;;  %v5265_v21 = vadd.f32 %v5264_v62, %v9560_v31 }
 0x423   :  { %5660 = vst.msk [vmem:[%s9418_s2 + $0x5f8] sm:$0xff] %vm5468_vm0, %v5081_v60  ;;  %5708 = vst.msk [vmem:[%s9418_s2 + $0x778] sm:$0xff] %vm5468_vm0, %v5273_v57  ;;  %v9569_v57 = vld [vmem:[#allocation39_spill] sm:$0xff] }
 0x424   :  { %5706 = vst.msk [vmem:[%s9418_s2 + $0x768] sm:$0xff] %vm5468_vm0, %v5265_v21  ;;  %v9570_v21 = vld [vmem:[#allocation37_spill] sm:$0xff] }
 0x426   :  { %v3900_v44 = vpop.f32.mrb[128].mxu0  ;;  %v6628_v2 = vpop.f32.mrb[128].mxu1 }
 0x427   :  { %v5086_v52 = vadd.f32 %v8771_v14, %v3900_v44  ;;  %v5286_v20 = vadd.f32 %v6628_v2, %v9561_v0  ;;  %v3902_v10 = vpop.f32.mrb[129].mxu0  ;;  %v5277_v29 = vpop.f32.mrb[129].mxu1  ;;  %v9571_v0 = vld [vmem:[#allocation40_spill] sm:$0xff] }
 0x428   :  { %v5278_v7 = vadd.f32 %v5277_v29, %v9562_v43  ;;  %v3903_v55 = vpop.f32.mrb[130].mxu0  ;;  %v6629_v46 = vpop.f32.mrb[130].mxu1  ;;  %v9572_v43 = vld [vmem:[#allocation38_spill] sm:$0xff] }
 0x429   :  { %5661 = vst.msk [vmem:[%s9418_s2 + $0x600] sm:$0xff] %vm5468_vm0, %v5086_v52  ;;  %5711 = vst.msk [vmem:[%s9418_s2 + $0x790] sm:$0xff] %vm5468_vm0, %v5286_v20  ;;  %v5089_v14 = vadd.f32 %v8780_v51, %v3903_v55  ;;  %v5289_v24 = vadd.f32 %v6629_v46, %v9563_v53  ;;  %v3905_v23 = vpop.f32.mrb[131].mxu0  ;;  %v5280_v13 = vpop.f32.mrb[131].mxu1 }
 0x42a   :  { %5709 = vst.msk [vmem:[%s9418_s2 + $0x780] sm:$0xff] %vm5468_vm0, %v5278_v7  ;;  %v5281_v19 = vadd.f32 %v5280_v13, %v9564_v58  ;;  %v9574_v13 = vld [vmem:[#allocation41_spill] sm:$0xff] }
 0x42b   :  { %5662 = vst.msk [vmem:[%s9418_s2 + $0x608] sm:$0xff] %vm5468_vm0, %v5089_v14  ;;  %5712 = vst.msk [vmem:[%s9418_s2 + $0x798] sm:$0xff] %vm5468_vm0, %v5289_v24  ;;  %v9573_v14 = vld [vmem:[#allocation43_spill] sm:$0xff] }
 0x42c   :  { %5710 = vst.msk [vmem:[%s9418_s2 + $0x788] sm:$0xff] %vm5468_vm0, %v5281_v19 }
 0x42e   :  { %v3908_v51 = vpop.f32.mrb[132].mxu0  ;;  %v6632_v26 = vpop.f32.mrb[132].mxu1 }
 0x42f   :  { %v5094_v32 = vadd.f32 %v8768_v39, %v3908_v51  ;;  %v5302_v11 = vadd.f32 %v6632_v26, %v9565_v59  ;;  %v3910_v30 = vpop.f32.mrb[133].mxu0  ;;  %v5293_v37 = vpop.f32.mrb[133].mxu1  ;;  %v9575_v26 = vld [vmem:[#allocation44_spill] sm:$0xff] }
 0x430   :  { %v5294_v33 = vadd.f32 %v5293_v37, %v9566_v63  ;;  %v3911_v6 = vpop.f32.mrb[134].mxu0  ;;  %v6633_v40 = vpop.f32.mrb[134].mxu1  ;;  %v9576_v30 = vld [vmem:[#allocation42_spill] sm:$0xff] }
 0x431   :  { %5663 = vst.msk [vmem:[%s9418_s2 + $0x610] sm:$0xff] %vm5468_vm0, %v5094_v32  ;;  %5715 = vst.msk [vmem:[%s9418_s2 + $0x7b0] sm:$0xff] %vm5468_vm0, %v5302_v11  ;;  %v5097_v39 = vadd.f32 %v8773_v25, %v3911_v6  ;;  %v5305_v22 = vadd.f32 %v6633_v40, %v9567_v8  ;;  %v3913_v50 = vpop.f32.mrb[135].mxu0  ;;  %v5296_v3 = vpop.f32.mrb[135].mxu1  ;;  %v9577_v6 = vld [vmem:[#allocation47_spill] sm:$0xff] }
 0x432   :  { %5713 = vst.msk [vmem:[%s9418_s2 + $0x7a0] sm:$0xff] %vm5468_vm0, %v5294_v33  ;;  %v5297_v5 = vadd.f32 %v5296_v3, %v9568_v36 }
 0x433   :  { %5664 = vst.msk [vmem:[%s9418_s2 + $0x618] sm:$0xff] %vm5468_vm0, %v5097_v39  ;;  %5716 = vst.msk [vmem:[%s9418_s2 + $0x7b8] sm:$0xff] %vm5468_vm0, %v5305_v22  ;;  %v9578_v22 = vld [vmem:[#allocation45_spill] sm:$0xff] }
 0x434   :  { %5714 = vst.msk [vmem:[%s9418_s2 + $0x7a8] sm:$0xff] %vm5468_vm0, %v5297_v5  ;;  %v9579_v5 = vld [vmem:[#allocation48_spill] sm:$0xff] }
 0x436   :  { %v3916_v25 = vpop.f32.mrb[136].mxu0  ;;  %v6636_v60 = vpop.f32.mrb[136].mxu1 }
 0x437   :  { %v5102_v15 = vadd.f32 %v8789_v54, %v3916_v25  ;;  %v5318_v49 = vadd.f32 %v6636_v60, %v9569_v57  ;;  %v3918_v62 = vpop.f32.mrb[137].mxu0  ;;  %v5309_v31 = vpop.f32.mrb[137].mxu1  ;;  %v9580_v57 = vld [vmem:[#allocation46_spill] sm:$0xff] }
 0x438   :  { %v5310_v44 = vadd.f32 %v5309_v31, %v9570_v21  ;;  %v3919_v2 = vpop.f32.mrb[138].mxu0  ;;  %v6637_v52 = vpop.f32.mrb[138].mxu1  ;;  %v9581_v21 = vld [vmem:[#allocation51_spill] sm:$0xff] }
 0x439   :  { %5665 = vst.msk [vmem:[%s9418_s2 + $0x620] sm:$0xff] %vm5468_vm0, %v5102_v15  ;;  %5719 = vst.msk [vmem:[%s9418_s2 + $0x7d0] sm:$0xff] %vm5468_vm0, %v5318_v49  ;;  %v5105_v54 = vadd.f32 %v8798_v9, %v3919_v2  ;;  %v5321_v20 = vadd.f32 %v6637_v52, %v9571_v0  ;;  %v3921_v10 = vpop.f32.mrb[139].mxu0  ;;  %v5312_v29 = vpop.f32.mrb[139].mxu1 }
 0x43a   :  { %5717 = vst.msk [vmem:[%s9418_s2 + $0x7c0] sm:$0xff] %vm5468_vm0, %v5310_v44  ;;  %v5313_v7 = vadd.f32 %v5312_v29, %v9572_v43  ;;  %v9583_v29 = vld [vmem:[#allocation52_spill] sm:$0xff] }
 0x43b   :  { %5666 = vst.msk [vmem:[%s9418_s2 + $0x628] sm:$0xff] %vm5468_vm0, %v5105_v54  ;;  %5720 = vst.msk [vmem:[%s9418_s2 + $0x7d8] sm:$0xff] %vm5468_vm0, %v5321_v20  ;;  %v9582_v54 = vld [vmem:[#allocation49_spill] sm:$0xff] }
 0x43c   :  { %5718 = vst.msk [vmem:[%s9418_s2 + $0x7c8] sm:$0xff] %vm5468_vm0, %v5313_v7 }
 0x43e   :  { %v3924_v9 = vpop.f32.mrb[140].mxu0  ;;  %v6640_v55 = vpop.f32.mrb[140].mxu1 }
 0x43f   :  { %v5110_v46 = vadd.f32 %v8786_v35, %v3924_v9  ;;  %v5334_v53 = vadd.f32 %v6640_v55, %v9573_v14  ;;  %v3926_v24 = vpop.f32.mrb[141].mxu0  ;;  %v5325_v23 = vpop.f32.mrb[141].mxu1  ;;  %v9584_v55 = vld [vmem:[#allocation50_spill] sm:$0xff] }
 0x440   :  { %v5326_v58 = vadd.f32 %v5325_v23, %v9574_v13  ;;  %v3927_v19 = vpop.f32.mrb[142].mxu0  ;;  %v6641_v51 = vpop.f32.mrb[142].mxu1  ;;  %v9585_v24 = vld [vmem:[#allocation58_spill] sm:$0xff] }
 0x441   :  { %5667 = vst.msk [vmem:[%s9418_s2 + $0x630] sm:$0xff] %vm5468_vm0, %v5110_v46  ;;  %5723 = vst.msk [vmem:[%s9418_s2 + $0x7f0] sm:$0xff] %vm5468_vm0, %v5334_v53  ;;  %v5113_v35 = vadd.f32 %v8791_v1, %v3927_v19  ;;  %v5337_v32 = vadd.f32 %v6641_v51, %v9575_v26  ;;  %v3929_v59 = vpop.f32.mrb[143].mxu0  ;;  %v5328_v11 = vpop.f32.mrb[143].mxu1  ;;  %v9586_v19 = vld [vmem:[#allocation54_spill] sm:$0xff] }
 0x442   :  { %5721 = vst.msk [vmem:[%s9418_s2 + $0x7e0] sm:$0xff] %vm5468_vm0, %v5326_v58  ;;  %v5329_v37 = vadd.f32 %v5328_v11, %v9576_v30 }
 0x443   :  { %5668 = vst.msk [vmem:[%s9418_s2 + $0x638] sm:$0xff] %vm5468_vm0, %v5113_v35  ;;  %5724 = vst.msk [vmem:[%s9418_s2 + $0x7f8] sm:$0xff] %vm5468_vm0, %v5337_v32  ;;  %v9587_v32 = vld [vmem:[#allocation60_spill] sm:$0xff] }
 0x444   :  { %5722 = vst.msk [vmem:[%s9418_s2 + $0x7e8] sm:$0xff] %vm5468_vm0, %v5329_v37  ;;  %v9588_v37 = vld [vmem:[#allocation56_spill] sm:$0xff] }
 0x446   :  { %v3932_v1 = vpop.f32.mrb[144].mxu0  ;;  %v6644_v63 = vpop.f32.mrb[144].mxu1 }
 0x447   :  { %v5118_v33 = vadd.f32 %v8807_v18, %v3932_v1  ;;  %v5350_v40 = vadd.f32 %v6644_v63, %v9577_v6  ;;  %v3934_v39 = vpop.f32.mrb[145].mxu0  ;;  %v5341_v8 = vpop.f32.mrb[145].mxu1  ;;  %v9589_v6 = vld [vmem:[#allocation66_spill] sm:$0xff] }
 0x448   :  { %v5342_v50 = vadd.f32 %v5341_v8, %v9578_v22  ;;  %v3935_v3 = vpop.f32.mrb[146].mxu0  ;;  %v6645_v36 = vpop.f32.mrb[146].mxu1  ;;  %v9590_v22 = vld [vmem:[#allocation62_spill] sm:$0xff] }
 0x449   :  { %5669 = vst.msk [vmem:[%s9418_s2 + $0x640] sm:$0xff] %vm5468_vm0, %v5118_v33  ;;  %5727 = vst.msk [vmem:[%s9418_s2 + $0x810] sm:$0xff] %vm5468_vm0, %v5350_v40  ;;  %v5121_v18 = vadd.f32 %v8816_v4, %v3935_v3  ;;  %v5353_v25 = vadd.f32 %v6645_v36, %v9579_v5  ;;  %v3937_v60 = vpop.f32.mrb[147].mxu0  ;;  %v5344_v15 = vpop.f32.mrb[147].mxu1 }
 0x44a   :  { %5725 = vst.msk [vmem:[%s9418_s2 + $0x800] sm:$0xff] %vm5468_vm0, %v5342_v50  ;;  %v5345_v49 = vadd.f32 %v5344_v15, %v9580_v57  ;;  %v9592_v15 = vld [vmem:[#allocation64_spill] sm:$0xff] }
 0x44b   :  { %5670 = vst.msk [vmem:[%s9418_s2 + $0x648] sm:$0xff] %vm5468_vm0, %v5121_v18  ;;  %5728 = vst.msk [vmem:[%s9418_s2 + $0x818] sm:$0xff] %vm5468_vm0, %v5353_v25  ;;  %v9591_v18 = vld [vmem:[#allocation68_spill] sm:$0xff] }
 0x44c   :  { %5726 = vst.msk [vmem:[%s9418_s2 + $0x808] sm:$0xff] %vm5468_vm0, %v5345_v49 }
 0x44e   :  { %v3940_v4 = vpop.f32.mrb[148].mxu0  ;;  %v6648_v62 = vpop.f32.mrb[148].mxu1 }
 0x44f   :  { %v5126_v31 = vadd.f32 %v8804_v34, %v3940_v4  ;;  %v5366_v44 = vadd.f32 %v6648_v62, %v9581_v21  ;;  %v3942_v2 = vpop.f32.mrb[149].mxu0  ;;  %v5357_v52 = vpop.f32.mrb[149].mxu1  ;;  %v9593_v62 = vld [vmem:[#allocation74_spill] sm:$0xff] }
 0x450   :  { %v5358_v0 = vadd.f32 %v5357_v52, %v9582_v54  ;;  %v3943_v20 = vpop.f32.mrb[150].mxu0  ;;  %v6649_v10 = vpop.f32.mrb[150].mxu1  ;;  %v9594_v2 = vld [vmem:[#allocation70_spill] sm:$0xff] }
 0x451   :  { %5671 = vst.msk [vmem:[%s9418_s2 + $0x650] sm:$0xff] %vm5468_vm0, %v5126_v31  ;;  %5731 = vst.msk [vmem:[%s9418_s2 + $0x830] sm:$0xff] %vm5468_vm0, %v5366_v44  ;;  %v5129_v34 = vadd.f32 %v8809_v45, %v3943_v20  ;;  %v5369_v43 = vadd.f32 %v6649_v10, %v9583_v29  ;;  %v3945_v7 = vpop.f32.mrb[151].mxu0  ;;  %v5360_v9 = vpop.f32.mrb[151].mxu1  ;;  %v9595_v20 = vld [vmem:[#allocation76_spill] sm:$0xff] }
 0x452   :  { %5729 = vst.msk [vmem:[%s9418_s2 + $0x820] sm:$0xff] %vm5468_vm0, %v5358_v0  ;;  %v5361_v46 = vadd.f32 %v5360_v9, %v9584_v55 }
 0x453   :  { %5672 = vst.msk [vmem:[%s9418_s2 + $0x658] sm:$0xff] %vm5468_vm0, %v5129_v34  ;;  %5732 = vst.msk [vmem:[%s9418_s2 + $0x838] sm:$0xff] %vm5468_vm0, %v5369_v43  ;;  %v9596_v43 = vld [vmem:[#allocation72_spill] sm:$0xff] }
 0x454   :  { %5730 = vst.msk [vmem:[%s9418_s2 + $0x828] sm:$0xff] %vm5468_vm0, %v5361_v46  ;;  %v9597_v46 = vld [vmem:[#allocation82_spill] sm:$0xff] }
 0x456   :  { %v3948_v45 = vpop.f32.mrb[152].mxu0  ;;  %v6652_v14 = vpop.f32.mrb[152].mxu1 }
 0x457   :  { %v5134_v53 = vadd.f32 %v8825_v38, %v3948_v45  ;;  %v5382_v23 = vadd.f32 %v6652_v14, %v9585_v24  ;;  %v3950_v13 = vpop.f32.mrb[153].mxu0  ;;  %v5373_v58 = vpop.f32.mrb[153].mxu1  ;;  %v9598_v24 = vld [vmem:[#allocation78_spill] sm:$0xff] }
 0x458   :  { %v5374_v51 = vadd.f32 %v5373_v58, %v9586_v19  ;;  %v3951_v35 = vpop.f32.mrb[154].mxu0  ;;  %v6653_v26 = vpop.f32.mrb[154].mxu1  ;;  %v9599_v19 = vld [vmem:[#allocation84_spill] sm:$0xff] }
 0x459   :  { %5673 = vst.msk [vmem:[%s9418_s2 + $0x660] sm:$0xff] %vm5468_vm0, %v5134_v53  ;;  %5735 = vst.msk [vmem:[%s9418_s2 + $0x850] sm:$0xff] %vm5468_vm0, %v5382_v23  ;;  %v5137_v38 = vadd.f32 %v8834_v12, %v3951_v35  ;;  %v5385_v59 = vadd.f32 %v6653_v26, %v9587_v32  ;;  %v3953_v11 = vpop.f32.mrb[155].mxu0  ;;  %v5376_v30 = vpop.f32.mrb[155].mxu1 }
 0x45a   :  { %5733 = vst.msk [vmem:[%s9418_s2 + $0x840] sm:$0xff] %vm5468_vm0, %v5374_v51  ;;  %v5377_v1 = vadd.f32 %v5376_v30, %v9588_v37  ;;  %v9601_v30 = vld [vmem:[#allocation90_spill] sm:$0xff] }
 0x45b   :  { %5674 = vst.msk [vmem:[%s9418_s2 + $0x668] sm:$0xff] %vm5468_vm0, %v5137_v38  ;;  %5736 = vst.msk [vmem:[%s9418_s2 + $0x858] sm:$0xff] %vm5468_vm0, %v5385_v59  ;;  %v9600_v38 = vld [vmem:[#allocation80_spill] sm:$0xff] }
 0x45c   :  { %5734 = vst.msk [vmem:[%s9418_s2 + $0x848] sm:$0xff] %vm5468_vm0, %v5377_v1 }
 0x45e   :  { %v3956_v12 = vpop.f32.mrb[156].mxu0  ;;  %v6656_v63 = vpop.f32.mrb[156].mxu1 }
 0x45f   :  { %v5142_v33 = vadd.f32 %v8822_v61, %v3956_v12  ;;  %v5398_v40 = vadd.f32 %v6656_v63, %v9589_v6  ;;  %v3958_v39 = vpop.f32.mrb[157].mxu0  ;;  %v5389_v8 = vpop.f32.mrb[157].mxu1  ;;  %v9602_v63 = vld [vmem:[#allocation86_spill] sm:$0xff] }
 0x460   :  { %v5390_v50 = vadd.f32 %v5389_v8, %v9590_v22  ;;  %v3959_v3 = vpop.f32.mrb[158].mxu0  ;;  %v6657_v36 = vpop.f32.mrb[158].mxu1  ;;  %v9603_v39 = vld [vmem:[#allocation92_spill] sm:$0xff] }
 0x461   :  { %5675 = vst.msk [vmem:[%s9418_s2 + $0x670] sm:$0xff] %vm5468_vm0, %v5142_v33  ;;  %5739 = vst.msk [vmem:[%s9418_s2 + $0x870] sm:$0xff] %vm5468_vm0, %v5398_v40  ;;  %v5145_v61 = vadd.f32 %v8827_v48, %v3959_v3  ;;  %v5401_v5 = vadd.f32 %v6657_v36, %v9591_v18  ;;  %v3961_v25 = vpop.f32.mrb[159].mxu0  ;;  %v5392_v60 = vpop.f32.mrb[159].mxu1  ;;  %v9604_v3 = vld [vmem:[#allocation88_spill] sm:$0xff] }
 0x462   :  { %5737 = vst.msk [vmem:[%s9418_s2 + $0x860] sm:$0xff] %vm5468_vm0, %v5390_v50  ;;  %v5393_v57 = vadd.f32 %v5392_v60, %v9592_v15 }
 0x463   :  { %5676 = vst.msk [vmem:[%s9418_s2 + $0x678] sm:$0xff] %vm5468_vm0, %v5145_v61  ;;  %5740 = vst.msk [vmem:[%s9418_s2 + $0x878] sm:$0xff] %vm5468_vm0, %v5401_v5  ;;  %v9605_v5 = vld [vmem:[#allocation97_spill] sm:$0xff] }
 0x464   :  { %5738 = vst.msk [vmem:[%s9418_s2 + $0x868] sm:$0xff] %vm5468_vm0, %v5393_v57  ;;  %v9606_v57 = vld [vmem:[#allocation94_spill] sm:$0xff] }
 0x466   :  { %v3964_v48 = vpop.f32.mrb[160].mxu0  ;;  %v6660_v49 = vpop.f32.mrb[160].mxu1 }
 0x467   :  { %v5150_v4 = vadd.f32 %v8843_v42, %v3964_v48  ;;  %v5414_v31 = vadd.f32 %v6660_v49, %v9593_v62  ;;  %v3966_v21 = vpop.f32.mrb[161].mxu0  ;;  %v5405_v44 = vpop.f32.mrb[161].mxu1  ;;  %v9607_v62 = vld [vmem:[#allocation99_spill] sm:$0xff] }
 0x468   :  { %v5406_v52 = vadd.f32 %v5405_v44, %v9594_v2  ;;  %v3967_v54 = vpop.f32.mrb[162].mxu0  ;;  %v6661_v0 = vpop.f32.mrb[162].mxu1  ;;  %v9608_v2 = vld [vmem:[#allocation96_spill] sm:$0xff] }
 0x469   :  { %5677 = vst.msk [vmem:[%s9418_s2 + $0x680] sm:$0xff] %vm5468_vm0, %v5150_v4  ;;  %5743 = vst.msk [vmem:[%s9418_s2 + $0x890] sm:$0xff] %vm5468_vm0, %v5414_v31  ;;  %v5153_v42 = vadd.f32 %v8852_v27, %v3967_v54  ;;  %v5417_v10 = vadd.f32 %v6661_v0, %v9595_v20  ;;  %v3969_v34 = vpop.f32.mrb[163].mxu0  ;;  %v5408_v29 = vpop.f32.mrb[163].mxu1 }
 0x46a   :  { %5741 = vst.msk [vmem:[%s9418_s2 + $0x880] sm:$0xff] %vm5468_vm0, %v5406_v52  ;;  %v5409_v7 = vadd.f32 %v5408_v29, %v9596_v43 }
 0x46b   :  { %5678 = vst.msk [vmem:[%s9418_s2 + $0x688] sm:$0xff] %vm5468_vm0, %v5153_v42  ;;  %5744 = vst.msk [vmem:[%s9418_s2 + $0x898] sm:$0xff] %vm5468_vm0, %v5417_v10 }
 0x46c   :  { %5742 = vst.msk [vmem:[%s9418_s2 + $0x888] sm:$0xff] %vm5468_vm0, %v5409_v7 }
 0x46e   :  { %v3972_v27 = vpop.f32.mrb[164].mxu0  ;;  %v6664_v9 = vpop.f32.mrb[164].mxu1 }
 0x46f   :  { %v5158_v55 = vadd.f32 %v8840_v41, %v3972_v27  ;;  %v5430_v45 = vadd.f32 %v6664_v9, %v9597_v46  ;;  %v3974_v14 = vpop.f32.mrb[165].mxu0  ;;  %v5421_v53 = vpop.f32.mrb[165].mxu1 }
 0x470   :  { %v5422_v23 = vadd.f32 %v5421_v53, %v9598_v24  ;;  %v3975_v13 = vpop.f32.mrb[166].mxu0  ;;  %v6665_v58 = vpop.f32.mrb[166].mxu1 }
 0x471   :  { %5679 = vst.msk [vmem:[%s9418_s2 + $0x690] sm:$0xff] %vm5468_vm0, %v5158_v55  ;;  %5747 = vst.msk [vmem:[%s9418_s2 + $0x8b0] sm:$0xff] %vm5468_vm0, %v5430_v45  ;;  %v5161_v41 = vadd.f32 %v8845_v28, %v3975_v13  ;;  %v5433_v51 = vadd.f32 %v6665_v58, %v9599_v19  ;;  %v3977_v35 = vpop.f32.mrb[167].mxu0  ;;  %v5424_v26 = vpop.f32.mrb[167].mxu1 }
 0x472   :  { %5745 = vst.msk [vmem:[%s9418_s2 + $0x8a0] sm:$0xff] %vm5468_vm0, %v5422_v23  ;;  %v5425_v32 = vadd.f32 %v5424_v26, %v9600_v38 }
 0x473   :  { %5680 = vst.msk [vmem:[%s9418_s2 + $0x698] sm:$0xff] %vm5468_vm0, %v5161_v41  ;;  %5748 = vst.msk [vmem:[%s9418_s2 + $0x8b8] sm:$0xff] %vm5468_vm0, %v5433_v51 }
 0x474   :  { %5746 = vst.msk [vmem:[%s9418_s2 + $0x8a8] sm:$0xff] %vm5468_vm0, %v5425_v32 }
 0x476   :  { %v3980_v28 = vpop.f32.mrb[168].mxu0  ;;  %v6668_v59 = vpop.f32.mrb[168].mxu1 }
 0x477   :  { %v5166_v11 = vadd.f32 %v8861_v17, %v3980_v28  ;;  %v5446_v37 = vadd.f32 %v6668_v59, %v9601_v30  ;;  %v3982_v1 = vpop.f32.mrb[169].mxu0  ;;  %v5437_v12 = vpop.f32.mrb[169].mxu1 }
 0x478   :  { %v5438_v33 = vadd.f32 %v5437_v12, %v9602_v63  ;;  %v3983_v6 = vpop.f32.mrb[170].mxu0  ;;  %v6669_v40 = vpop.f32.mrb[170].mxu1 }
 0x479   :  { %5681 = vst.msk [vmem:[%s9418_s2 + $0x6a0] sm:$0xff] %vm5468_vm0, %v5166_v11  ;;  %5751 = vst.msk [vmem:[%s9418_s2 + $0x8d0] sm:$0xff] %vm5468_vm0, %v5446_v37  ;;  %v5169_v17 = vadd.f32 %v8870_v16, %v3983_v6  ;;  %v5449_v8 = vadd.f32 %v6669_v40, %v9603_v39  ;;  %v3985_v22 = vpop.f32.mrb[171].mxu0  ;;  %v5440_v50 = vpop.f32.mrb[171].mxu1 }
 0x47a   :  { %5749 = vst.msk [vmem:[%s9418_s2 + $0x8c0] sm:$0xff] %vm5468_vm0, %v5438_v33  ;;  %v5441_v36 = vadd.f32 %v5440_v50, %v9604_v3 }
 0x47b   :  { %5682 = vst.msk [vmem:[%s9418_s2 + $0x6a8] sm:$0xff] %vm5468_vm0, %v5169_v17  ;;  %5752 = vst.msk [vmem:[%s9418_s2 + $0x8d8] sm:$0xff] %vm5468_vm0, %v5449_v8 }
 0x47c   :  { %5750 = vst.msk [vmem:[%s9418_s2 + $0x8c8] sm:$0xff] %vm5468_vm0, %v5441_v36 }
 0x47e   :  { %v3988_v16 = vpop.f32.mrb[172].mxu0  ;;  %v6672_v61 = vpop.f32.mrb[172].mxu1 }
 0x47f   :  { %v5174_v18 = vadd.f32 %v8858_v47, %v3988_v16  ;;  %v5462_v25 = vadd.f32 %v6672_v61, %v9605_v5  ;;  %v3990_v60 = vpop.f32.mrb[173].mxu0  ;;  %v5453_v15 = vpop.f32.mrb[173].mxu1 }
 0x480   :  { %v5454_v48 = vadd.f32 %v5453_v15, %v9606_v57  ;;  %v3991_v49 = vpop.f32.mrb[174].mxu0  ;;  %v6673_v4 = vpop.f32.mrb[174].mxu1 }
 0x481   :  { %5683 = vst.msk [vmem:[%s9418_s2 + $0x6b0] sm:$0xff] %vm5468_vm0, %v5174_v18  ;;  %5755 = vst.msk [vmem:[%s9418_s2 + $0x8f0] sm:$0xff] %vm5468_vm0, %v5462_v25  ;;  %v5177_v47 = vadd.f32 %v8863_v56, %v3991_v49  ;;  %v5465_v31 = vadd.f32 %v6673_v4, %v9607_v62  ;;  %v3993_v21 = vpop.f32.mrb[175].mxu0  ;;  %v5456_v44 = vpop.f32.mrb[175].mxu1 }
 0x482   :  { %5753 = vst.msk [vmem:[%s9418_s2 + $0x8e0] sm:$0xff] %vm5468_vm0, %v5454_v48  ;;  %v5457_v52 = vadd.f32 %v5456_v44, %v9608_v2 }
 0x483   :  { %5684 = vst.msk [vmem:[%s9418_s2 + $0x6b8] sm:$0xff] %vm5468_vm0, %v5177_v47  ;;  %5756 = vst.msk [vmem:[%s9418_s2 + $0x8f8] sm:$0xff] %vm5468_vm0, %v5465_v31 }
 0x484   :  { %5754 = vst.msk [vmem:[%s9418_s2 + $0x8e8] sm:$0xff] %vm5468_vm0, %v5457_v52 }
 0x485   :  { %5761 = vsyncpa [#allocation3], 1 }

</bundles_post_ra>
